<compile_context>
chip_gen: v7x
topology: tpu7x:2x2x1
jax: 0.10.0
libtpu: 0.0.40
codegen_flags: <defaults>
</compile_context>

<pallas_src>
import functools
import math

import jax
import jax.numpy as jnp
from jax import lax
from jax.experimental import pallas as pl
from jax.experimental.pallas import tpu as pltpu

# ---------------- problem sizes (small, consistent with the module defaults) ----------------
B = 2            # batch
M = 8            # number of agents
N = 16           # number of cities
D = 128          # embed_dim
H = 4            # num_heads
HEAD_DIM = D // H
HIDDEN = 256     # FFN hidden_dim
L = 2            # num_layers
FEAT = 13        # agent_state features: 2 indices + 4 + 4 + 3
N_FEAT = FEAT - 2
LN_EPS = 1e-5

# per-head block width in the fused qkv output: [q|k|v|pad] padded up to a 128-lane multiple so
# the per-head head-stack slices are lane-aligned (free) instead of masked 32-wide slices.
HEAD_BLOCK = max(128, ((3 * HEAD_DIM + 127) // 128) * 128)


def _layernorm(x, g, b):
    x = x.astype(jnp.float32)
    mean = jnp.mean(x, axis=-1, keepdims=True)
    var = jnp.mean(jnp.square(x - mean), axis=-1, keepdims=True)
    return (x - mean) * jax.lax.rsqrt(var + LN_EPS) * g + b


# ---------------------------------- Pallas kernel ----------------------------------
def encoder_kernel(cities_ref, graph_ref, feat_ref, idx_ref,
                   w_dp_lo_ref, w_dp_hi_ref, b_dp_ref, w_feat_ref, b_feat_ref,
                   w_g_ref, b_g_ref, w_ae_g_ref, w_ae_s_ref, b_ae_ref,
                   w_qkv_ref, b_qkv_ref, w_o_ref, b_o_ref,
                   ln1g_ref, ln1b_ref, ln2g_ref, ln2b_ref,
                   w1_ref, b1_ref, w2_ref, b2_ref,
                   out_ref, *, nb):
    f32 = jnp.float32
    bf16 = jnp.bfloat16
    R = nb * M                                   # row-slab size (batches folded into rows)

    cities = cities_ref[...]                     # (nb, N, D)  bf16 (pre-cast in wrapper)
    graph = graph_ref[...].reshape(nb, D)        # (nb, D)     bf16
    feat = feat_ref[...].reshape(R, N_FEAT)      # (R, 11)     bf16
    idx = idx_ref[...]                           # (nb, M, 2)  int32 (exact)

    # ---------------- AgentEmbedding ----------------
    # scale-aware gather: fetch the <=2M needed city rows FIRST via one-hot matmuls (exact,
    # MXU-friendly), then project only the gathered rows with the split depot weight.
    city_iota = lax.broadcasted_iota(jnp.int32, (nb, M, N), 2)
    oh0 = (city_iota == idx[:, :, 0:1]).astype(f32).astype(bf16)
    oh1 = (city_iota == idx[:, :, 1:2]).astype(f32).astype(bf16)
    dn = (((2,), (1,)), ((0,), (0,)))            # contract over N, batch over nb
    g0 = lax.dot_general(oh0, cities, dn, preferred_element_type=f32).reshape(R, D)
    g1 = lax.dot_general(oh1, cities, dn, preferred_element_type=f32).reshape(R, D)
    depot_e = (jnp.dot(g0.astype(bf16), w_dp_lo_ref[...], preferred_element_type=f32)
               + jnp.dot(g1.astype(bf16), w_dp_hi_ref[...], preferred_element_type=f32)
               + b_dp_ref[...])

    # the 3 tiny feature linears (4/4/3 -> D) fused into a single 11-wide matmul
    feat_e = jnp.dot(feat, w_feat_ref[...], preferred_element_type=f32) + b_feat_ref[...]

    # graph embedding + agent context projection (concat-free: W_ae split into halves)
    gg = jnp.dot(graph, w_g_ref[...], preferred_element_type=f32) + b_g_ref[...]     # (nb, D)
    gc = jnp.dot(gg.astype(bf16), w_ae_g_ref[...], preferred_element_type=f32)       # (nb, D)
    sum_e = depot_e + feat_e                                                          # (R, D)
    ctx_s = jnp.dot(sum_e.astype(bf16), w_ae_s_ref[...], preferred_element_type=f32)
    x = (ctx_s.reshape(nb, M, D) + gc[:, None, :] + b_ae_ref[...]).reshape(R, D)

    # ---------------- self-attention encoder stack ----------------
    for l in range(L):  # static unroll over layers
        # ONE fused (R, D) @ (D, H*HEAD_BLOCK) projection; per-head columns are
        # [q|k|v|pad] padded to HEAD_BLOCK lanes; 1/sqrt(hd) already folded into q cols/bias.
        qkv = (jnp.dot(x.astype(bf16), w_qkv_ref[l], preferred_element_type=f32)
               + b_qkv_ref[l]).astype(bf16)                                    # (R, H*128)

        # head stack: H lane-ALIGNED 128-wide slices + one sublane concat
        hstack = jnp.concatenate(
            [qkv[:, h * HEAD_BLOCK:(h + 1) * HEAD_BLOCK] for h in range(H)],
            axis=0).reshape(H * nb, M, HEAD_BLOCK)
        qh = hstack[:, :, 0:HEAD_DIM]
        kh = hstack[:, :, HEAD_DIM:2 * HEAD_DIM]
        vh = hstack[:, :, 2 * HEAD_DIM:3 * HEAD_DIM]

        # all-head scores in one leading-batch contraction; ONE stacked softmax (f32)
        sc = jnp.einsum('bqd,bkd->bqk', qh, kh, preferred_element_type=f32)    # (H*nb, M, M)
        sc = sc - jnp.max(sc, axis=-1, keepdims=True)
        p = jnp.exp(sc)
        p = p * pl.reciprocal(jnp.sum(p, axis=-1, keepdims=True), approx=True)
        head_out = jnp.einsum('bqk,bkd->bqd', p.astype(bf16), vh,
                              preferred_element_type=f32)                      # (H*nb, M, hd)

        # relayout heads back onto lanes ONCE, then a single full-depth (K=D) output proj
        ho4 = head_out.astype(bf16).reshape(H, nb, M, HEAD_DIM)
        ho = jnp.concatenate([ho4[h] for h in range(H)], axis=-1).reshape(R, D)
        att = jnp.dot(ho, w_o_ref[l], preferred_element_type=f32) + b_o_ref[l]

        x = _layernorm(x + att, ln1g_ref[l], ln1b_ref[l])

        ff = jnp.maximum(jnp.dot(x.astype(bf16), w1_ref[l],
                                 preferred_element_type=f32) + b1_ref[l], 0.0)
        ff = jnp.dot(ff.astype(bf16), w2_ref[l], preferred_element_type=f32) + b2_ref[l]
        x = _layernorm(x + ff, ln2g_ref[l], ln2b_ref[l])

    # lane-dense store: last dim = D = 128
    out_ref[...] = x.reshape(nb, M, D).astype(out_ref.dtype)


# ---------------------------------- wrapper ----------------------------------
def _pick_nb(batch):
    """Generation-aware grid folding.

    Single-TC chips (v5e/v6e): fold the whole batch into one grid step (max MXU row fill,
    no per-step overhead).  v7x has 2 TensorCores: keep 2 parallel grid steps.
    """
    try:
        kind = jax.devices()[0].device_kind.lower()
    except Exception:
        kind = ""
    if "v7" in kind and batch % 2 == 0:
        return batch // 2
    return batch


def agent_encoder(cities_embed, graph, agent_state, kparams, nb=None):
    bf16 = jnp.bfloat16
    if nb is None:
        nb = _pick_nb(B)
    assert B % nb == 0

    # pre-cast bulky activations to bf16 (halves HBM->VMEM DMA); indices stay exact int32
    data = (cities_embed.astype(bf16),
            graph.astype(bf16),
            agent_state[..., 2:].astype(bf16),
            agent_state[..., :2].astype(jnp.int32))

    def batch_spec(x):
        ndim = x.ndim
        return pl.BlockSpec((nb,) + x.shape[1:],
                            lambda b, _nd=ndim: (b,) + (0,) * (_nd - 1))

    def full_spec(x):
        # invariant weights: constant index_map -> block revisited every step (no re-DMA)
        ndim = x.ndim
        return pl.BlockSpec(x.shape, lambda b, _nd=ndim: (0,) * _nd)

    in_specs = [batch_spec(x) for x in data] + [full_spec(p) for p in kparams]

    # advisory cost estimate so XLA schedules the custom call sensibly
    flops_embed = (2 * 2 * B * M * N * D            # one-hot gathers
                   + 2 * 2 * B * M * D * D          # depot projection (two halves)
                   + 2 * B * M * N_FEAT * D         # fused feature linear
                   + 2 * B * D * D                  # graph embed
                   + 2 * B * D * D + 2 * B * M * D * D)   # agent_embed halves
    flops_layer = (2 * B * M * D * (H * HEAD_BLOCK)       # fused qkv
                   + 2 * 2 * B * H * M * M * HEAD_DIM     # attention
                   + 2 * B * M * D * D                    # output projection
                   + 2 * 2 * B * M * D * HIDDEN)          # FFN
    bytes_accessed = (sum(int(a.size) * a.dtype.itemsize for a in data)
                      + sum(int(p.size) * p.dtype.itemsize for p in kparams)
                      + B * M * D * 4)
    cost = pl.CostEstimate(
        flops=int(flops_embed + L * flops_layer),
        transcendentals=int(L * (B * H * M * M + B * H * M + 2 * B * M)),
        bytes_accessed=int(bytes_accessed))

    grid_spec = pltpu.PrefetchScalarGridSpec(
        num_scalar_prefetch=0,
        grid=(B // nb,),
        in_specs=in_specs,
        out_specs=pl.BlockSpec((nb, M, D), lambda b: (b, 0, 0)),
    )

    return pl.pallas_call(
        functools.partial(encoder_kernel, nb=nb),
        out_shape=jax.ShapeDtypeStruct((B, M, D), jnp.float32),
        grid_spec=grid_spec,
        compiler_params=pltpu.CompilerParams(
            dimension_semantics=("parallel",)),
        cost_estimate=cost,
    )(*data, *kparams)


# -------------------- wrapper-side weight fusion / bf16 casting --------------------
def prepare_params(p):
    bf16 = jnp.bfloat16
    f32 = jnp.float32
    pad = HEAD_BLOCK - 3 * HEAD_DIM

    w_dp_lo = p['w_dp'][:D, :].astype(bf16)
    w_dp_hi = p['w_dp'][D:, :].astype(bf16)
    b_dp = p['b_dp'].reshape(1, D).astype(f32)
    w_feat = jnp.concatenate([p['w_dist'], p['w_next'], p['w_ps']], axis=0).astype(bf16)
    # fusing the 3 biases is valid only because the three feature embeddings are summed
    b_feat = (p['b_dist'] + p['b_next'] + p['b_ps']).reshape(1, D).astype(f32)
    w_g = p['w_g'].astype(bf16)
    b_g = p['b_g'].reshape(1, D).astype(f32)
    w_ae_g = p['w_ae'][:D, :].astype(bf16)
    w_ae_s = p['w_ae'][D:, :].astype(bf16)
    b_ae = p['b_ae'].reshape(1, D).astype(f32)

    # fused qkv with per-head [q|k|v|pad] 128-lane blocks; 1/sqrt(hd) folded into q cols/bias
    s = 1.0 / math.sqrt(HEAD_DIM)
    wq, wk, wv = p['w_q'] * s, p['w_k'], p['w_v']
    bq, bk, bv = p['b_q'] * s, p['b_k'], p['b_v']
    wpad = jnp.zeros((L, D, pad), f32)
    bpad = jnp.zeros((L, pad), f32)
    wblocks, bblocks = [], []
    for h in range(H):
        sl = slice(h * HEAD_DIM, (h + 1) * HEAD_DIM)
        wblocks.append(jnp.concatenate([wq[:, :, sl], wk[:, :, sl], wv[:, :, sl], wpad], axis=2))
        bblocks.append(jnp.concatenate([bq[:, sl], bk[:, sl], bv[:, sl], bpad], axis=1))
    w_qkv = jnp.concatenate(wblocks, axis=2).astype(bf16)    # (L, D, H*HEAD_BLOCK)
    b_qkv = jnp.concatenate(bblocks, axis=1).astype(f32)     # (L, H*HEAD_BLOCK)

    return (w_dp_lo, w_dp_hi, b_dp, w_feat, b_feat, w_g, b_g, w_ae_g, w_ae_s, b_ae,
            w_qkv, b_qkv, p['w_o'].astype(bf16), p['b_o'],
            p['ln1g'], p['ln1b'], p['ln2g'], p['ln2b'],
            p['w1'].astype(bf16), p['b1'], p['w2'].astype(bf16), p['b2'])


# ---------------------------------- pure-JAX reference ----------------------------------
# Faithful to the PyTorch module structure (separate linears, gather, concat); matmul
# operands are cast to bf16 like the kernel so the comparison isolates the restructuring.
def reference(cities_embed, graph, agent_state, p):
    bf16 = jnp.bfloat16
    f32 = jnp.float32

    def lin(x, w, b):
        return jnp.dot(x.astype(bf16), w.astype(bf16), preferred_element_type=f32) + b

    inv_sqrt_hd = 1.0 / math.sqrt(HEAD_DIM)

    def one(cities, graph_row, ag):
        idx = ag[:, 0:2].astype(jnp.int32)
        depot_pos = cities[idx].reshape(M, 2 * D)
        dp_e = lin(depot_pos, p['w_dp'], p['b_dp'])
        dist_e = lin(ag[:, 2:6], p['w_dist'], p['b_dist'])
        nxt_e = lin(ag[:, 6:10], p['w_next'], p['b_next'])
        ps_e = lin(ag[:, 10:13], p['w_ps'], p['b_ps'])
        gg = lin(graph_row, p['w_g'], p['b_g'])                       # (1, D)
        ctx = jnp.concatenate([jnp.broadcast_to(gg, (M, D)),
                               dp_e + dist_e + nxt_e + ps_e], axis=-1)
        x = lin(ctx, p['w_ae'], p['b_ae'])
        for l in range(L):
            q = lin(x, p['w_q'][l], p['b_q'][l]).reshape(M, H, HEAD_DIM)
            k = lin(x, p['w_k'][l], p['b_k'][l]).reshape(M, H, HEAD_DIM)
            v = lin(x, p['w_v'][l], p['b_v'][l]).reshape(M, H, HEAD_DIM)
            sc = jnp.einsum('qhd,khd->hqk', q.astype(bf16), k.astype(bf16),
                            preferred_element_type=f32) * inv_sqrt_hd
            sc = sc - jnp.max(sc, axis=-1, keepdims=True)
            pr = jnp.exp(sc)
            pr = pr / jnp.sum(pr, axis=-1, keepdims=True)
            ho = jnp.einsum('hqk,khd->qhd', pr.astype(bf16), v.astype(bf16),
                            preferred_element_type=f32)
            att = lin(ho.reshape(M, D), p['w_o'][l], p['b_o'][l])
            x = _layernorm(x + att, p['ln1g'][l], p['ln1b'][l])
            ff = jnp.maximum(lin(x, p['w1'][l], p['b1'][l]), 0.0)
            ff = lin(ff, p['w2'][l], p['b2'][l])
            x = _layernorm(x + ff, p['ln2g'][l], p['ln2b'][l])
        return x

    return jax.vmap(one)(cities_embed, graph, agent_state)


# ---------------------------------- parameter init ----------------------------------
def init_params(key):
    ks = jax.random.split(key, 24)

    def u(k, shape, fan_in):
        s = 1.0 / math.sqrt(fan_in)
        return jax.random.uniform(k, shape, jnp.float32, -s, s)

    p = {}
    p['w_dp'] = u(ks[0], (2 * D, D), 2 * D); p['b_dp'] = u(ks[1], (D,), 2 * D)
    p['w_dist'] = u(ks[2], (4, D), 4);       p['b_dist'] = u(ks[3], (D,), 4)
    p['w_next'] = u(ks[4], (4, D), 4);       p['b_next'] = u(ks[5], (D,), 4)
    p['w_ps'] = u(ks[6], (3, D), 3);         p['b_ps'] = u(ks[7], (D,), 3)
    p['w_g'] = u(ks[8], (D, D), D);          p['b_g'] = u(ks[9], (D,), D)
    p['w_ae'] = u(ks[10], (2 * D, D), 2 * D); p['b_ae'] = u(ks[11], (D,), 2 * D)
    p['w_q'] = u(ks[12], (L, D, D), D); p['b_q'] = jnp.zeros((L, D), jnp.float32)
    p['w_k'] = u(ks[13], (L, D, D), D); p['b_k'] = jnp.zeros((L, D), jnp.float32)
    p['w_v'] = u(ks[14], (L, D, D), D); p['b_v'] = jnp.zeros((L, D), jnp.float32)
    p['w_o'] = u(ks[15], (L, D, D), D); p['b_o'] = u(ks[16], (L, D), D)
    p['ln1g'] = jnp.ones((L, D), jnp.float32); p['ln1b'] = jnp.zeros((L, D), jnp.float32)
    p['ln2g'] = jnp.ones((L, D), jnp.float32); p['ln2b'] = jnp.zeros((L, D), jnp.float32)
    p['w1'] = u(ks[17], (L, D, HIDDEN), D);      p['b1'] = u(ks[18], (L, HIDDEN), D)
    p['w2'] = u(ks[19], (L, HIDDEN, D), HIDDEN); p['b2'] = u(ks[20], (L, D), HIDDEN)
    return p


if __name__ == "__main__":
    key = jax.random.PRNGKey(0)
    k_c, k_i, k_f, k_p = jax.random.split(key, 4)

    cities_embed = jax.random.normal(k_c, (B, N, D), jnp.float32)
    graph = jnp.mean(cities_embed, axis=1, keepdims=True)            # (B, 1, D) graph embedding
    idx = jax.random.randint(k_i, (B, M, 2), 0, N)
    feats = jax.random.normal(k_f, (B, M, FEAT - 2), jnp.float32)
    agent_state = jnp.concatenate([idx.astype(jnp.float32), feats], axis=-1)   # (B, M, 13)

    raw_params = init_params(k_p)
    kparams = prepare_params(raw_params)

    out = agent_encoder(cities_embed, graph, agent_state, kparams)
    out = jax.block_until_ready(out)

    ref = reference(cities_embed, graph, agent_state, raw_params)
    assert out.shape == (B, M, D)
    # Tolerance accounts for the two review-sanctioned approximations that diverge from the
    # (bf16-operand) reference at the bf16-rounding level: 1/sqrt(hd) folded into the bf16 q
    # weights/bias, and the approx-reciprocal softmax normalization. Real bugs show up as O(0.1+).
    assert jnp.allclose(out, ref, atol=5e-3, rtol=5e-3), "mismatch vs reference"

    print("KERNEL_OK")
</pallas_src>

<mosaic_0001>
module attributes {stable_mosaic.version = 11 : i64} {
  func.func @encoder_kernel(%arg0: i32, %arg1: memref<2x16x128xbf16, #tpu.memory_space<vmem>>, %arg2: memref<2x1x128xbf16, #tpu.memory_space<vmem>>, %arg3: memref<2x8x11xbf16, #tpu.memory_space<vmem>>, %arg4: memref<2x8x2xi32, #tpu.memory_space<vmem>>, %arg5: memref<128x128xbf16, #tpu.memory_space<vmem>>, %arg6: memref<128x128xbf16, #tpu.memory_space<vmem>>, %arg7: memref<1x128xf32, #tpu.memory_space<vmem>>, %arg8: memref<11x128xbf16, #tpu.memory_space<vmem>>, %arg9: memref<1x128xf32, #tpu.memory_space<vmem>>, %arg10: memref<128x128xbf16, #tpu.memory_space<vmem>>, %arg11: memref<1x128xf32, #tpu.memory_space<vmem>>, %arg12: memref<128x128xbf16, #tpu.memory_space<vmem>>, %arg13: memref<128x128xbf16, #tpu.memory_space<vmem>>, %arg14: memref<1x128xf32, #tpu.memory_space<vmem>>, %arg15: memref<2x128x512xbf16, #tpu.memory_space<vmem>>, %arg16: memref<2x512xf32, #tpu.memory_space<vmem>>, %arg17: memref<2x128x128xbf16, #tpu.memory_space<vmem>>, %arg18: memref<2x128xf32, #tpu.memory_space<vmem>>, %arg19: memref<2x128xf32, #tpu.memory_space<vmem>>, %arg20: memref<2x128xf32, #tpu.memory_space<vmem>>, %arg21: memref<2x128xf32, #tpu.memory_space<vmem>>, %arg22: memref<2x128xf32, #tpu.memory_space<vmem>>, %arg23: memref<2x128x256xbf16, #tpu.memory_space<vmem>>, %arg24: memref<2x256xf32, #tpu.memory_space<vmem>>, %arg25: memref<2x256x128xbf16, #tpu.memory_space<vmem>>, %arg26: memref<2x128xf32, #tpu.memory_space<vmem>>, %arg27: memref<2x8x128xf32, #tpu.memory_space<vmem>>) attributes {dimension_semantics = [#tpu.dimension_semantics<parallel>], iteration_bounds = array<i64: 1>, scalar_prefetch = 0 : i64, scratch_operands = 0 : i64, tpu.core_type = #tpu.core_type<tc>, window_params = [{transform_indices = @transform_0, window_bounds = array<i64: 2, 16, 128>}, {transform_indices = @transform_1, window_bounds = array<i64: 2, 1, 128>}, {transform_indices = @transform_2, window_bounds = array<i64: 2, 8, 11>}, {transform_indices = @transform_3, window_bounds = array<i64: 2, 8, 2>}, {pipeline_mode = #tpu.pipeline_mode<synchronous>, transform_indices = @transform_4, window_bounds = array<i64: 128, 128>}, {pipeline_mode = #tpu.pipeline_mode<synchronous>, transform_indices = @transform_5, window_bounds = array<i64: 128, 128>}, {pipeline_mode = #tpu.pipeline_mode<synchronous>, transform_indices = @transform_6, window_bounds = array<i64: 1, 128>}, {pipeline_mode = #tpu.pipeline_mode<synchronous>, transform_indices = @transform_7, window_bounds = array<i64: 11, 128>}, {pipeline_mode = #tpu.pipeline_mode<synchronous>, transform_indices = @transform_8, window_bounds = array<i64: 1, 128>}, {pipeline_mode = #tpu.pipeline_mode<synchronous>, transform_indices = @transform_9, window_bounds = array<i64: 128, 128>}, {pipeline_mode = #tpu.pipeline_mode<synchronous>, transform_indices = @transform_10, window_bounds = array<i64: 1, 128>}, {pipeline_mode = #tpu.pipeline_mode<synchronous>, transform_indices = @transform_11, window_bounds = array<i64: 128, 128>}, {pipeline_mode = #tpu.pipeline_mode<synchronous>, transform_indices = @transform_12, window_bounds = array<i64: 128, 128>}, {pipeline_mode = #tpu.pipeline_mode<synchronous>, transform_indices = @transform_13, window_bounds = array<i64: 1, 128>}, {pipeline_mode = #tpu.pipeline_mode<synchronous>, transform_indices = @transform_14, window_bounds = array<i64: 2, 128, 512>}, {pipeline_mode = #tpu.pipeline_mode<synchronous>, transform_indices = @transform_15, window_bounds = array<i64: 2, 512>}, {pipeline_mode = #tpu.pipeline_mode<synchronous>, transform_indices = @transform_16, window_bounds = array<i64: 2, 128, 128>}, {pipeline_mode = #tpu.pipeline_mode<synchronous>, transform_indices = @transform_17, window_bounds = array<i64: 2, 128>}, {pipeline_mode = #tpu.pipeline_mode<synchronous>, transform_indices = @transform_18, window_bounds = array<i64: 2, 128>}, {pipeline_mode = #tpu.pipeline_mode<synchronous>, transform_indices = @transform_19, window_bounds = array<i64: 2, 128>}, {pipeline_mode = #tpu.pipeline_mode<synchronous>, transform_indices = @transform_20, window_bounds = array<i64: 2, 128>}, {pipeline_mode = #tpu.pipeline_mode<synchronous>, transform_indices = @transform_21, window_bounds = array<i64: 2, 128>}, {pipeline_mode = #tpu.pipeline_mode<synchronous>, transform_indices = @transform_22, window_bounds = array<i64: 2, 128, 256>}, {pipeline_mode = #tpu.pipeline_mode<synchronous>, transform_indices = @transform_23, window_bounds = array<i64: 2, 256>}, {pipeline_mode = #tpu.pipeline_mode<synchronous>, transform_indices = @transform_24, window_bounds = array<i64: 2, 256, 128>}, {pipeline_mode = #tpu.pipeline_mode<synchronous>, transform_indices = @transform_25, window_bounds = array<i64: 2, 128>}, {transform_indices = @transform_26, window_bounds = array<i64: 2, 8, 128>}]} {
    %c0 = arith.constant 0 : index
    %c0_0 = arith.constant 0 : index
    %c0_1 = arith.constant 0 : index
    %0 = vector.load %arg1[%c0, %c0_0, %c0_1] : memref<2x16x128xbf16, #tpu.memory_space<vmem>>, vector<2x16x128xbf16>
    %c0_2 = arith.constant 0 : index
    %c0_3 = arith.constant 0 : index
    %c0_4 = arith.constant 0 : index
    %1 = vector.load %arg2[%c0_2, %c0_3, %c0_4] : memref<2x1x128xbf16, #tpu.memory_space<vmem>>, vector<2x1x128xbf16>
    %2 = vector.shape_cast %1 : vector<2x1x128xbf16> to vector<2x128xbf16>
    %c0_5 = arith.constant 0 : index
    %c0_6 = arith.constant 0 : index
    %c0_7 = arith.constant 0 : index
    %3 = vector.load %arg3[%c0_5, %c0_6, %c0_7] : memref<2x8x11xbf16, #tpu.memory_space<vmem>>, vector<2x8x11xbf16>
    %4 = vector.shape_cast %3 : vector<2x8x11xbf16> to vector<16x11xbf16>
    %c0_8 = arith.constant 0 : index
    %c0_9 = arith.constant 0 : index
    %c0_10 = arith.constant 0 : index
    %5 = vector.load %arg4[%c0_8, %c0_9, %c0_10] : memref<2x8x2xi32, #tpu.memory_space<vmem>>, vector<2x8x2xi32>
    %6 = tpu.iota {dimensions = array<i32: 2>} : vector<2x8x16xi32>
    %7 = vector.extract_strided_slice %5 {offsets = [0, 0, 0], sizes = [2, 8, 1], strides = [1, 1, 1]} : vector<2x8x2xi32> to vector<2x8x1xi32>
    %8 = vector.broadcast %7 : vector<2x8x1xi32> to vector<2x8x16xi32>
    %9 = arith.cmpi eq, %6, %8 : vector<2x8x16xi32>
    %10 = arith.extui %9 : vector<2x8x16xi1> to vector<2x8x16xi32>
    %11 = arith.sitofp %10 : vector<2x8x16xi32> to vector<2x8x16xf32>
    %12 = arith.truncf %11 : vector<2x8x16xf32> to vector<2x8x16xbf16>
    %13 = vector.extract_strided_slice %5 {offsets = [0, 0, 1], sizes = [2, 8, 1], strides = [1, 1, 1]} : vector<2x8x2xi32> to vector<2x8x1xi32>
    %14 = vector.broadcast %13 : vector<2x8x1xi32> to vector<2x8x16xi32>
    %15 = arith.cmpi eq, %6, %14 : vector<2x8x16xi32>
    %16 = arith.extui %15 : vector<2x8x16xi1> to vector<2x8x16xi32>
    %17 = arith.sitofp %16 : vector<2x8x16xi32> to vector<2x8x16xf32>
    %18 = arith.truncf %17 : vector<2x8x16xf32> to vector<2x8x16xbf16>
    %cst = arith.constant dense<0.000000e+00> : vector<2x8x128xf32>
    %19 = tpu.matmul %12, %0, %cst {dimension_numbers = #tpu.dot_dimension_numbers<[2], [1], [1], [2], [0, 0, 0, 1, 1, 2], [0], [0]>} : vector<2x8x16xbf16>, vector<2x16x128xbf16>, vector<2x8x128xf32> -> vector<2x8x128xf32>
    %20 = vector.shape_cast %19 : vector<2x8x128xf32> to vector<16x128xf32>
    %cst_11 = arith.constant dense<0.000000e+00> : vector<2x8x128xf32>
    %21 = tpu.matmul %18, %0, %cst_11 {dimension_numbers = #tpu.dot_dimension_numbers<[2], [1], [1], [2], [0, 0, 0, 1, 1, 2], [0], [0]>} : vector<2x8x16xbf16>, vector<2x16x128xbf16>, vector<2x8x128xf32> -> vector<2x8x128xf32>
    %22 = vector.shape_cast %21 : vector<2x8x128xf32> to vector<16x128xf32>
    %23 = arith.truncf %20 : vector<16x128xf32> to vector<16x128xbf16>
    %c0_12 = arith.constant 0 : index
    %c0_13 = arith.constant 0 : index
    %24 = vector.load %arg5[%c0_12, %c0_13] : memref<128x128xbf16, #tpu.memory_space<vmem>>, vector<128x128xbf16>
    %cst_14 = arith.constant dense<0.000000e+00> : vector<16x128xf32>
    %25 = tpu.matmul %23, %24, %cst_14 {dimension_numbers = #tpu.dot_dimension_numbers<[1], [0], [0], [1], [0, 0, 1, 1], [], []>} : vector<16x128xbf16>, vector<128x128xbf16>, vector<16x128xf32> -> vector<16x128xf32>
    %26 = arith.truncf %22 : vector<16x128xf32> to vector<16x128xbf16>
    %c0_15 = arith.constant 0 : index
    %c0_16 = arith.constant 0 : index
    %27 = vector.load %arg6[%c0_15, %c0_16] : memref<128x128xbf16, #tpu.memory_space<vmem>>, vector<128x128xbf16>
    %cst_17 = arith.constant dense<0.000000e+00> : vector<16x128xf32>
    %28 = tpu.matmul %26, %27, %cst_17 {dimension_numbers = #tpu.dot_dimension_numbers<[1], [0], [0], [1], [0, 0, 1, 1], [], []>} : vector<16x128xbf16>, vector<128x128xbf16>, vector<16x128xf32> -> vector<16x128xf32>
    %29 = arith.addf %25, %28 : vector<16x128xf32>
    %c0_18 = arith.constant 0 : index
    %c0_19 = arith.constant 0 : index
    %30 = vector.load %arg7[%c0_18, %c0_19] : memref<1x128xf32, #tpu.memory_space<vmem>>, vector<1x128xf32>
    %31 = vector.broadcast %30 : vector<1x128xf32> to vector<16x128xf32>
    %32 = arith.addf %29, %31 : vector<16x128xf32>
    %c0_20 = arith.constant 0 : index
    %c0_21 = arith.constant 0 : index
    %33 = vector.load %arg8[%c0_20, %c0_21] : memref<11x128xbf16, #tpu.memory_space<vmem>>, vector<11x128xbf16>
    %cst_22 = arith.constant dense<0.000000e+00> : vector<16x128xf32>
    %34 = tpu.matmul %4, %33, %cst_22 {dimension_numbers = #tpu.dot_dimension_numbers<[1], [0], [0], [1], [0, 0, 1, 1], [], []>} : vector<16x11xbf16>, vector<11x128xbf16>, vector<16x128xf32> -> vector<16x128xf32>
    %c0_23 = arith.constant 0 : index
    %c0_24 = arith.constant 0 : index
    %35 = vector.load %arg9[%c0_23, %c0_24] : memref<1x128xf32, #tpu.memory_space<vmem>>, vector<1x128xf32>
    %36 = vector.broadcast %35 : vector<1x128xf32> to vector<16x128xf32>
    %37 = arith.addf %34, %36 : vector<16x128xf32>
    %c0_25 = arith.constant 0 : index
    %c0_26 = arith.constant 0 : index
    %38 = vector.load %arg10[%c0_25, %c0_26] : memref<128x128xbf16, #tpu.memory_space<vmem>>, vector<128x128xbf16>
    %cst_27 = arith.constant dense<0.000000e+00> : vector<2x128xf32>
    %39 = tpu.matmul %2, %38, %cst_27 {dimension_numbers = #tpu.dot_dimension_numbers<[1], [0], [0], [1], [0, 0, 1, 1], [], []>} : vector<2x128xbf16>, vector<128x128xbf16>, vector<2x128xf32> -> vector<2x128xf32>
    %c0_28 = arith.constant 0 : index
    %c0_29 = arith.constant 0 : index
    %40 = vector.load %arg11[%c0_28, %c0_29] : memref<1x128xf32, #tpu.memory_space<vmem>>, vector<1x128xf32>
    %41 = vector.broadcast %40 : vector<1x128xf32> to vector<2x128xf32>
    %42 = arith.addf %39, %41 : vector<2x128xf32>
    %43 = arith.truncf %42 : vector<2x128xf32> to vector<2x128xbf16>
    %c0_30 = arith.constant 0 : index
    %c0_31 = arith.constant 0 : index
    %44 = vector.load %arg12[%c0_30, %c0_31] : memref<128x128xbf16, #tpu.memory_space<vmem>>, vector<128x128xbf16>
    %cst_32 = arith.constant dense<0.000000e+00> : vector<2x128xf32>
    %45 = tpu.matmul %43, %44, %cst_32 {dimension_numbers = #tpu.dot_dimension_numbers<[1], [0], [0], [1], [0, 0, 1, 1], [], []>} : vector<2x128xbf16>, vector<128x128xbf16>, vector<2x128xf32> -> vector<2x128xf32>
    %46 = arith.addf %32, %37 : vector<16x128xf32>
    %47 = arith.truncf %46 : vector<16x128xf32> to vector<16x128xbf16>
    %c0_33 = arith.constant 0 : index
    %c0_34 = arith.constant 0 : index
    %48 = vector.load %arg13[%c0_33, %c0_34] : memref<128x128xbf16, #tpu.memory_space<vmem>>, vector<128x128xbf16>
    %cst_35 = arith.constant dense<0.000000e+00> : vector<16x128xf32>
    %49 = tpu.matmul %47, %48, %cst_35 {dimension_numbers = #tpu.dot_dimension_numbers<[1], [0], [0], [1], [0, 0, 1, 1], [], []>} : vector<16x128xbf16>, vector<128x128xbf16>, vector<16x128xf32> -> vector<16x128xf32>
    %50 = vector.shape_cast %49 : vector<16x128xf32> to vector<2x8x128xf32>
    %51 = vector.shape_cast %45 : vector<2x128xf32> to vector<2x1x128xf32>
    %52 = vector.broadcast %51 : vector<2x1x128xf32> to vector<2x8x128xf32>
    %53 = arith.addf %50, %52 : vector<2x8x128xf32>
    %c0_36 = arith.constant 0 : index
    %c0_37 = arith.constant 0 : index
    %54 = vector.load %arg14[%c0_36, %c0_37] : memref<1x128xf32, #tpu.memory_space<vmem>>, vector<1x128xf32>
    %55 = vector.shape_cast %54 : vector<1x128xf32> to vector<1x1x128xf32>
    %56 = vector.broadcast %55 : vector<1x1x128xf32> to vector<2x8x128xf32>
    %57 = arith.addf %53, %56 : vector<2x8x128xf32>
    %58 = vector.shape_cast %57 : vector<2x8x128xf32> to vector<16x128xf32>
    %59 = arith.truncf %58 : vector<16x128xf32> to vector<16x128xbf16>
    %c0_38 = arith.constant 0 : index
    %c0_39 = arith.constant 0 : index
    %c0_40 = arith.constant 0 : index
    %60 = vector.load %arg15[%c0_38, %c0_39, %c0_40] : memref<2x128x512xbf16, #tpu.memory_space<vmem>>, vector<1x128x512xbf16>
    %61 = vector.shape_cast %60 : vector<1x128x512xbf16> to vector<128x512xbf16>
    %cst_41 = arith.constant dense<0.000000e+00> : vector<16x512xf32>
    %62 = tpu.matmul %59, %61, %cst_41 {dimension_numbers = #tpu.dot_dimension_numbers<[1], [0], [0], [1], [0, 0, 1, 1], [], []>} : vector<16x128xbf16>, vector<128x512xbf16>, vector<16x512xf32> -> vector<16x512xf32>
    %c0_42 = arith.constant 0 : index
    %c0_43 = arith.constant 0 : index
    %63 = vector.load %arg16[%c0_42, %c0_43] : memref<2x512xf32, #tpu.memory_space<vmem>>, vector<1x512xf32>
    %64 = vector.shape_cast %63 : vector<1x512xf32> to vector<512xf32>
    %65 = vector.shape_cast %64 : vector<512xf32> to vector<1x512xf32>
    %66 = vector.broadcast %65 : vector<1x512xf32> to vector<16x512xf32>
    %67 = arith.addf %62, %66 : vector<16x512xf32>
    %68 = arith.truncf %67 : vector<16x512xf32> to vector<16x512xbf16>
    %69 = vector.extract_strided_slice %68 {offsets = [0, 0], sizes = [16, 128], strides = [1, 1]} : vector<16x512xbf16> to vector<16x128xbf16>
    %70 = vector.extract_strided_slice %68 {offsets = [0, 128], sizes = [16, 128], strides = [1, 1]} : vector<16x512xbf16> to vector<16x128xbf16>
    %71 = vector.extract_strided_slice %68 {offsets = [0, 256], sizes = [16, 128], strides = [1, 1]} : vector<16x512xbf16> to vector<16x128xbf16>
    %72 = vector.extract_strided_slice %68 {offsets = [0, 384], sizes = [16, 128], strides = [1, 1]} : vector<16x512xbf16> to vector<16x128xbf16>
    %73 = tpu.concatenate %69, %70, %71, %72 in 0 : vector<16x128xbf16>, vector<16x128xbf16>, vector<16x128xbf16>, vector<16x128xbf16> -> vector<64x128xbf16>
    %74 = vector.shape_cast %73 : vector<64x128xbf16> to vector<8x8x128xbf16>
    %75 = vector.extract_strided_slice %74 {offsets = [0, 0, 0], sizes = [8, 8, 32], strides = [1, 1, 1]} : vector<8x8x128xbf16> to vector<8x8x32xbf16>
    %76 = vector.extract_strided_slice %74 {offsets = [0, 0, 32], sizes = [8, 8, 32], strides = [1, 1, 1]} : vector<8x8x128xbf16> to vector<8x8x32xbf16>
    %77 = vector.extract_strided_slice %74 {offsets = [0, 0, 64], sizes = [8, 8, 32], strides = [1, 1, 1]} : vector<8x8x128xbf16> to vector<8x8x32xbf16>
    "tpu.trace_start"() <{level = 10 : i32, message = "bqd,bkd->bqk"}> : () -> ()
    %cst_44 = arith.constant dense<0.000000e+00> : vector<8x8x8xf32>
    %78 = tpu.matmul %75, %76, %cst_44 {dimension_numbers = #tpu.dot_dimension_numbers<[2], [2], [1], [1], [0, 0, 0, 1, 1, 1], [0], [0]>} : vector<8x8x32xbf16>, vector<8x8x32xbf16>, vector<8x8x8xf32> -> vector<8x8x8xf32>
    "tpu.trace_stop"() : () -> ()
    %cst_45 = arith.constant dense<0xFF800000> : vector<8x8xf32>
    %79 = vector.multi_reduction <maximumf>, %78, %cst_45 [2] : vector<8x8x8xf32> to vector<8x8xf32>
    %80 = vector.shape_cast %79 : vector<8x8xf32> to vector<8x8x1xf32>
    %81 = vector.broadcast %80 : vector<8x8x1xf32> to vector<8x8x8xf32>
    %82 = arith.subf %78, %81 : vector<8x8x8xf32>
    %83 = math.exp %82 : vector<8x8x8xf32>
    %cst_46 = arith.constant dense<0.000000e+00> : vector<8x8xf32>
    %84 = vector.multi_reduction <add>, %83, %cst_46 [2] : vector<8x8x8xf32> to vector<8x8xf32>
    %85 = vector.shape_cast %84 : vector<8x8xf32> to vector<8x8x1xf32>
    %86 = tpu.reciprocal %85 {approx = true} : vector<8x8x1xf32> -> vector<8x8x1xf32>
    %87 = vector.broadcast %86 : vector<8x8x1xf32> to vector<8x8x8xf32>
    %88 = arith.mulf %83, %87 : vector<8x8x8xf32>
    %89 = arith.truncf %88 : vector<8x8x8xf32> to vector<8x8x8xbf16>
    "tpu.trace_start"() <{level = 10 : i32, message = "bqk,bkd->bqd"}> : () -> ()
    %cst_47 = arith.constant dense<0.000000e+00> : vector<8x8x32xf32>
    %90 = tpu.matmul %89, %77, %cst_47 {dimension_numbers = #tpu.dot_dimension_numbers<[2], [1], [1], [2], [0, 0, 0, 1, 1, 2], [0], [0]>} : vector<8x8x8xbf16>, vector<8x8x32xbf16>, vector<8x8x32xf32> -> vector<8x8x32xf32>
    "tpu.trace_stop"() : () -> ()
    %91 = arith.truncf %90 : vector<8x8x32xf32> to vector<8x8x32xbf16>
    %92 = vector.shape_cast %91 : vector<8x8x32xbf16> to vector<4x2x8x32xbf16>
    %93 = vector.extract_strided_slice %92 {offsets = [0, 0, 0, 0], sizes = [1, 2, 8, 32], strides = [1, 1, 1, 1]} : vector<4x2x8x32xbf16> to vector<1x2x8x32xbf16>
    %94 = vector.shape_cast %93 : vector<1x2x8x32xbf16> to vector<2x8x32xbf16>
    %95 = vector.extract_strided_slice %92 {offsets = [1, 0, 0, 0], sizes = [1, 2, 8, 32], strides = [1, 1, 1, 1]} : vector<4x2x8x32xbf16> to vector<1x2x8x32xbf16>
    %96 = vector.shape_cast %95 : vector<1x2x8x32xbf16> to vector<2x8x32xbf16>
    %97 = vector.extract_strided_slice %92 {offsets = [2, 0, 0, 0], sizes = [1, 2, 8, 32], strides = [1, 1, 1, 1]} : vector<4x2x8x32xbf16> to vector<1x2x8x32xbf16>
    %98 = vector.shape_cast %97 : vector<1x2x8x32xbf16> to vector<2x8x32xbf16>
    %99 = vector.extract_strided_slice %92 {offsets = [3, 0, 0, 0], sizes = [1, 2, 8, 32], strides = [1, 1, 1, 1]} : vector<4x2x8x32xbf16> to vector<1x2x8x32xbf16>
    %100 = vector.shape_cast %99 : vector<1x2x8x32xbf16> to vector<2x8x32xbf16>
    %101 = tpu.concatenate %94, %96, %98, %100 in 2 : vector<2x8x32xbf16>, vector<2x8x32xbf16>, vector<2x8x32xbf16>, vector<2x8x32xbf16> -> vector<2x8x128xbf16>
    %102 = vector.shape_cast %101 : vector<2x8x128xbf16> to vector<16x128xbf16>
    %c0_48 = arith.constant 0 : index
    %c0_49 = arith.constant 0 : index
    %c0_50 = arith.constant 0 : index
    %103 = vector.load %arg17[%c0_48, %c0_49, %c0_50] : memref<2x128x128xbf16, #tpu.memory_space<vmem>>, vector<1x128x128xbf16>
    %104 = vector.shape_cast %103 : vector<1x128x128xbf16> to vector<128x128xbf16>
    %cst_51 = arith.constant dense<0.000000e+00> : vector<16x128xf32>
    %105 = tpu.matmul %102, %104, %cst_51 {dimension_numbers = #tpu.dot_dimension_numbers<[1], [0], [0], [1], [0, 0, 1, 1], [], []>} : vector<16x128xbf16>, vector<128x128xbf16>, vector<16x128xf32> -> vector<16x128xf32>
    %c0_52 = arith.constant 0 : index
    %c0_53 = arith.constant 0 : index
    %106 = vector.load %arg18[%c0_52, %c0_53] : memref<2x128xf32, #tpu.memory_space<vmem>>, vector<1x128xf32>
    %107 = vector.shape_cast %106 : vector<1x128xf32> to vector<128xf32>
    %108 = vector.shape_cast %107 : vector<128xf32> to vector<1x128xf32>
    %109 = vector.broadcast %108 : vector<1x128xf32> to vector<16x128xf32>
    %110 = arith.addf %105, %109 : vector<16x128xf32>
    %111 = arith.addf %58, %110 : vector<16x128xf32>
    %c0_54 = arith.constant 0 : index
    %c0_55 = arith.constant 0 : index
    %112 = vector.load %arg19[%c0_54, %c0_55] : memref<2x128xf32, #tpu.memory_space<vmem>>, vector<1x128xf32>
    %113 = vector.shape_cast %112 : vector<1x128xf32> to vector<128xf32>
    %c0_56 = arith.constant 0 : index
    %c0_57 = arith.constant 0 : index
    %114 = vector.load %arg20[%c0_56, %c0_57] : memref<2x128xf32, #tpu.memory_space<vmem>>, vector<1x128xf32>
    %115 = vector.shape_cast %114 : vector<1x128xf32> to vector<128xf32>
    %cst_58 = arith.constant dense<0.000000e+00> : vector<16xf32>
    %116 = vector.multi_reduction <add>, %111, %cst_58 [1] : vector<16x128xf32> to vector<16xf32>
    %117 = vector.shape_cast %116 : vector<16xf32> to vector<16x1xf32>
    %cst_59 = arith.constant 1.280000e+02 : f32
    %118 = vector.broadcast %cst_59 : f32 to vector<16x1xf32>
    %119 = arith.divf %117, %118 : vector<16x1xf32>
    %120 = vector.broadcast %119 : vector<16x1xf32> to vector<16x128xf32>
    %121 = arith.subf %111, %120 : vector<16x128xf32>
    %122 = arith.mulf %121, %121 : vector<16x128xf32>
    %cst_60 = arith.constant dense<0.000000e+00> : vector<16xf32>
    %123 = vector.multi_reduction <add>, %122, %cst_60 [1] : vector<16x128xf32> to vector<16xf32>
    %124 = vector.shape_cast %123 : vector<16xf32> to vector<16x1xf32>
    %cst_61 = arith.constant 1.280000e+02 : f32
    %125 = vector.broadcast %cst_61 : f32 to vector<16x1xf32>
    %126 = arith.divf %124, %125 : vector<16x1xf32>
    %127 = vector.broadcast %119 : vector<16x1xf32> to vector<16x128xf32>
    %128 = arith.subf %111, %127 : vector<16x128xf32>
    %cst_62 = arith.constant 9.99999974E-6 : f32
    %129 = vector.broadcast %cst_62 : f32 to vector<16x1xf32>
    %130 = arith.addf %126, %129 : vector<16x1xf32>
    %131 = math.rsqrt %130 : vector<16x1xf32>
    %132 = vector.broadcast %131 : vector<16x1xf32> to vector<16x128xf32>
    %133 = arith.mulf %128, %132 : vector<16x128xf32>
    %134 = vector.shape_cast %113 : vector<128xf32> to vector<1x128xf32>
    %135 = vector.broadcast %134 : vector<1x128xf32> to vector<16x128xf32>
    %136 = arith.mulf %133, %135 : vector<16x128xf32>
    %137 = vector.shape_cast %115 : vector<128xf32> to vector<1x128xf32>
    %138 = vector.broadcast %137 : vector<1x128xf32> to vector<16x128xf32>
    %139 = arith.addf %136, %138 : vector<16x128xf32>
    %140 = arith.truncf %139 : vector<16x128xf32> to vector<16x128xbf16>
    %c0_63 = arith.constant 0 : index
    %c0_64 = arith.constant 0 : index
    %c0_65 = arith.constant 0 : index
    %141 = vector.load %arg23[%c0_63, %c0_64, %c0_65] : memref<2x128x256xbf16, #tpu.memory_space<vmem>>, vector<1x128x256xbf16>
    %142 = vector.shape_cast %141 : vector<1x128x256xbf16> to vector<128x256xbf16>
    %cst_66 = arith.constant dense<0.000000e+00> : vector<16x256xf32>
    %143 = tpu.matmul %140, %142, %cst_66 {dimension_numbers = #tpu.dot_dimension_numbers<[1], [0], [0], [1], [0, 0, 1, 1], [], []>} : vector<16x128xbf16>, vector<128x256xbf16>, vector<16x256xf32> -> vector<16x256xf32>
    %c0_67 = arith.constant 0 : index
    %c0_68 = arith.constant 0 : index
    %144 = vector.load %arg24[%c0_67, %c0_68] : memref<2x256xf32, #tpu.memory_space<vmem>>, vector<1x256xf32>
    %145 = vector.shape_cast %144 : vector<1x256xf32> to vector<256xf32>
    %146 = vector.shape_cast %145 : vector<256xf32> to vector<1x256xf32>
    %147 = vector.broadcast %146 : vector<1x256xf32> to vector<16x256xf32>
    %148 = arith.addf %143, %147 : vector<16x256xf32>
    %cst_69 = arith.constant 0.000000e+00 : f32
    %149 = vector.broadcast %cst_69 : f32 to vector<16x256xf32>
    %150 = arith.maximumf %148, %149 : vector<16x256xf32>
    %151 = arith.truncf %150 : vector<16x256xf32> to vector<16x256xbf16>
    %c0_70 = arith.constant 0 : index
    %c0_71 = arith.constant 0 : index
    %c0_72 = arith.constant 0 : index
    %152 = vector.load %arg25[%c0_70, %c0_71, %c0_72] : memref<2x256x128xbf16, #tpu.memory_space<vmem>>, vector<1x256x128xbf16>
    %153 = vector.shape_cast %152 : vector<1x256x128xbf16> to vector<256x128xbf16>
    %cst_73 = arith.constant dense<0.000000e+00> : vector<16x128xf32>
    %154 = tpu.matmul %151, %153, %cst_73 {dimension_numbers = #tpu.dot_dimension_numbers<[1], [0], [0], [1], [0, 0, 1, 1], [], []>} : vector<16x256xbf16>, vector<256x128xbf16>, vector<16x128xf32> -> vector<16x128xf32>
    %c0_74 = arith.constant 0 : index
    %c0_75 = arith.constant 0 : index
    %155 = vector.load %arg26[%c0_74, %c0_75] : memref<2x128xf32, #tpu.memory_space<vmem>>, vector<1x128xf32>
    %156 = vector.shape_cast %155 : vector<1x128xf32> to vector<128xf32>
    %157 = vector.shape_cast %156 : vector<128xf32> to vector<1x128xf32>
    %158 = vector.broadcast %157 : vector<1x128xf32> to vector<16x128xf32>
    %159 = arith.addf %154, %158 : vector<16x128xf32>
    %160 = arith.addf %139, %159 : vector<16x128xf32>
    %c0_76 = arith.constant 0 : index
    %c0_77 = arith.constant 0 : index
    %161 = vector.load %arg21[%c0_76, %c0_77] : memref<2x128xf32, #tpu.memory_space<vmem>>, vector<1x128xf32>
    %162 = vector.shape_cast %161 : vector<1x128xf32> to vector<128xf32>
    %c0_78 = arith.constant 0 : index
    %c0_79 = arith.constant 0 : index
    %163 = vector.load %arg22[%c0_78, %c0_79] : memref<2x128xf32, #tpu.memory_space<vmem>>, vector<1x128xf32>
    %164 = vector.shape_cast %163 : vector<1x128xf32> to vector<128xf32>
    %cst_80 = arith.constant dense<0.000000e+00> : vector<16xf32>
    %165 = vector.multi_reduction <add>, %160, %cst_80 [1] : vector<16x128xf32> to vector<16xf32>
    %166 = vector.shape_cast %165 : vector<16xf32> to vector<16x1xf32>
    %cst_81 = arith.constant 1.280000e+02 : f32
    %167 = vector.broadcast %cst_81 : f32 to vector<16x1xf32>
    %168 = arith.divf %166, %167 : vector<16x1xf32>
    %169 = vector.broadcast %168 : vector<16x1xf32> to vector<16x128xf32>
    %170 = arith.subf %160, %169 : vector<16x128xf32>
    %171 = arith.mulf %170, %170 : vector<16x128xf32>
    %cst_82 = arith.constant dense<0.000000e+00> : vector<16xf32>
    %172 = vector.multi_reduction <add>, %171, %cst_82 [1] : vector<16x128xf32> to vector<16xf32>
    %173 = vector.shape_cast %172 : vector<16xf32> to vector<16x1xf32>
    %cst_83 = arith.constant 1.280000e+02 : f32
    %174 = vector.broadcast %cst_83 : f32 to vector<16x1xf32>
    %175 = arith.divf %173, %174 : vector<16x1xf32>
    %176 = vector.broadcast %168 : vector<16x1xf32> to vector<16x128xf32>
    %177 = arith.subf %160, %176 : vector<16x128xf32>
    %cst_84 = arith.constant 9.99999974E-6 : f32
    %178 = vector.broadcast %cst_84 : f32 to vector<16x1xf32>
    %179 = arith.addf %175, %178 : vector<16x1xf32>
    %180 = math.rsqrt %179 : vector<16x1xf32>
    %181 = vector.broadcast %180 : vector<16x1xf32> to vector<16x128xf32>
    %182 = arith.mulf %177, %181 : vector<16x128xf32>
    %183 = vector.shape_cast %162 : vector<128xf32> to vector<1x128xf32>
    %184 = vector.broadcast %183 : vector<1x128xf32> to vector<16x128xf32>
    %185 = arith.mulf %182, %184 : vector<16x128xf32>
    %186 = vector.shape_cast %164 : vector<128xf32> to vector<1x128xf32>
    %187 = vector.broadcast %186 : vector<1x128xf32> to vector<16x128xf32>
    %188 = arith.addf %185, %187 : vector<16x128xf32>
    %189 = arith.truncf %188 : vector<16x128xf32> to vector<16x128xbf16>
    %c1 = arith.constant 1 : index
    %c0_85 = arith.constant 0 : index
    %c0_86 = arith.constant 0 : index
    %190 = vector.load %arg15[%c1, %c0_85, %c0_86] : memref<2x128x512xbf16, #tpu.memory_space<vmem>>, vector<1x128x512xbf16>
    %191 = vector.shape_cast %190 : vector<1x128x512xbf16> to vector<128x512xbf16>
    %cst_87 = arith.constant dense<0.000000e+00> : vector<16x512xf32>
    %192 = tpu.matmul %189, %191, %cst_87 {dimension_numbers = #tpu.dot_dimension_numbers<[1], [0], [0], [1], [0, 0, 1, 1], [], []>} : vector<16x128xbf16>, vector<128x512xbf16>, vector<16x512xf32> -> vector<16x512xf32>
    %c1_88 = arith.constant 1 : index
    %c0_89 = arith.constant 0 : index
    %193 = vector.load %arg16[%c1_88, %c0_89] : memref<2x512xf32, #tpu.memory_space<vmem>>, vector<1x512xf32>
    %194 = vector.shape_cast %193 : vector<1x512xf32> to vector<512xf32>
    %195 = vector.shape_cast %194 : vector<512xf32> to vector<1x512xf32>
    %196 = vector.broadcast %195 : vector<1x512xf32> to vector<16x512xf32>
    %197 = arith.addf %192, %196 : vector<16x512xf32>
    %198 = arith.truncf %197 : vector<16x512xf32> to vector<16x512xbf16>
    %199 = vector.extract_strided_slice %198 {offsets = [0, 0], sizes = [16, 128], strides = [1, 1]} : vector<16x512xbf16> to vector<16x128xbf16>
    %200 = vector.extract_strided_slice %198 {offsets = [0, 128], sizes = [16, 128], strides = [1, 1]} : vector<16x512xbf16> to vector<16x128xbf16>
    %201 = vector.extract_strided_slice %198 {offsets = [0, 256], sizes = [16, 128], strides = [1, 1]} : vector<16x512xbf16> to vector<16x128xbf16>
    %202 = vector.extract_strided_slice %198 {offsets = [0, 384], sizes = [16, 128], strides = [1, 1]} : vector<16x512xbf16> to vector<16x128xbf16>
    %203 = tpu.concatenate %199, %200, %201, %202 in 0 : vector<16x128xbf16>, vector<16x128xbf16>, vector<16x128xbf16>, vector<16x128xbf16> -> vector<64x128xbf16>
    %204 = vector.shape_cast %203 : vector<64x128xbf16> to vector<8x8x128xbf16>
    %205 = vector.extract_strided_slice %204 {offsets = [0, 0, 0], sizes = [8, 8, 32], strides = [1, 1, 1]} : vector<8x8x128xbf16> to vector<8x8x32xbf16>
    %206 = vector.extract_strided_slice %204 {offsets = [0, 0, 32], sizes = [8, 8, 32], strides = [1, 1, 1]} : vector<8x8x128xbf16> to vector<8x8x32xbf16>
    %207 = vector.extract_strided_slice %204 {offsets = [0, 0, 64], sizes = [8, 8, 32], strides = [1, 1, 1]} : vector<8x8x128xbf16> to vector<8x8x32xbf16>
    "tpu.trace_start"() <{level = 10 : i32, message = "bqd,bkd->bqk"}> : () -> ()
    %cst_90 = arith.constant dense<0.000000e+00> : vector<8x8x8xf32>
    %208 = tpu.matmul %205, %206, %cst_90 {dimension_numbers = #tpu.dot_dimension_numbers<[2], [2], [1], [1], [0, 0, 0, 1, 1, 1], [0], [0]>} : vector<8x8x32xbf16>, vector<8x8x32xbf16>, vector<8x8x8xf32> -> vector<8x8x8xf32>
    "tpu.trace_stop"() : () -> ()
    %cst_91 = arith.constant dense<0xFF800000> : vector<8x8xf32>
    %209 = vector.multi_reduction <maximumf>, %208, %cst_91 [2] : vector<8x8x8xf32> to vector<8x8xf32>
    %210 = vector.shape_cast %209 : vector<8x8xf32> to vector<8x8x1xf32>
    %211 = vector.broadcast %210 : vector<8x8x1xf32> to vector<8x8x8xf32>
    %212 = arith.subf %208, %211 : vector<8x8x8xf32>
    %213 = math.exp %212 : vector<8x8x8xf32>
    %cst_92 = arith.constant dense<0.000000e+00> : vector<8x8xf32>
    %214 = vector.multi_reduction <add>, %213, %cst_92 [2] : vector<8x8x8xf32> to vector<8x8xf32>
    %215 = vector.shape_cast %214 : vector<8x8xf32> to vector<8x8x1xf32>
    %216 = tpu.reciprocal %215 {approx = true} : vector<8x8x1xf32> -> vector<8x8x1xf32>
    %217 = vector.broadcast %216 : vector<8x8x1xf32> to vector<8x8x8xf32>
    %218 = arith.mulf %213, %217 : vector<8x8x8xf32>
    %219 = arith.truncf %218 : vector<8x8x8xf32> to vector<8x8x8xbf16>
    "tpu.trace_start"() <{level = 10 : i32, message = "bqk,bkd->bqd"}> : () -> ()
    %cst_93 = arith.constant dense<0.000000e+00> : vector<8x8x32xf32>
    %220 = tpu.matmul %219, %207, %cst_93 {dimension_numbers = #tpu.dot_dimension_numbers<[2], [1], [1], [2], [0, 0, 0, 1, 1, 2], [0], [0]>} : vector<8x8x8xbf16>, vector<8x8x32xbf16>, vector<8x8x32xf32> -> vector<8x8x32xf32>
    "tpu.trace_stop"() : () -> ()
    %221 = arith.truncf %220 : vector<8x8x32xf32> to vector<8x8x32xbf16>
    %222 = vector.shape_cast %221 : vector<8x8x32xbf16> to vector<4x2x8x32xbf16>
    %223 = vector.extract_strided_slice %222 {offsets = [0, 0, 0, 0], sizes = [1, 2, 8, 32], strides = [1, 1, 1, 1]} : vector<4x2x8x32xbf16> to vector<1x2x8x32xbf16>
    %224 = vector.shape_cast %223 : vector<1x2x8x32xbf16> to vector<2x8x32xbf16>
    %225 = vector.extract_strided_slice %222 {offsets = [1, 0, 0, 0], sizes = [1, 2, 8, 32], strides = [1, 1, 1, 1]} : vector<4x2x8x32xbf16> to vector<1x2x8x32xbf16>
    %226 = vector.shape_cast %225 : vector<1x2x8x32xbf16> to vector<2x8x32xbf16>
    %227 = vector.extract_strided_slice %222 {offsets = [2, 0, 0, 0], sizes = [1, 2, 8, 32], strides = [1, 1, 1, 1]} : vector<4x2x8x32xbf16> to vector<1x2x8x32xbf16>
    %228 = vector.shape_cast %227 : vector<1x2x8x32xbf16> to vector<2x8x32xbf16>
    %229 = vector.extract_strided_slice %222 {offsets = [3, 0, 0, 0], sizes = [1, 2, 8, 32], strides = [1, 1, 1, 1]} : vector<4x2x8x32xbf16> to vector<1x2x8x32xbf16>
    %230 = vector.shape_cast %229 : vector<1x2x8x32xbf16> to vector<2x8x32xbf16>
    %231 = tpu.concatenate %224, %226, %228, %230 in 2 : vector<2x8x32xbf16>, vector<2x8x32xbf16>, vector<2x8x32xbf16>, vector<2x8x32xbf16> -> vector<2x8x128xbf16>
    %232 = vector.shape_cast %231 : vector<2x8x128xbf16> to vector<16x128xbf16>
    %c1_94 = arith.constant 1 : index
    %c0_95 = arith.constant 0 : index
    %c0_96 = arith.constant 0 : index
    %233 = vector.load %arg17[%c1_94, %c0_95, %c0_96] : memref<2x128x128xbf16, #tpu.memory_space<vmem>>, vector<1x128x128xbf16>
    %234 = vector.shape_cast %233 : vector<1x128x128xbf16> to vector<128x128xbf16>
    %cst_97 = arith.constant dense<0.000000e+00> : vector<16x128xf32>
    %235 = tpu.matmul %232, %234, %cst_97 {dimension_numbers = #tpu.dot_dimension_numbers<[1], [0], [0], [1], [0, 0, 1, 1], [], []>} : vector<16x128xbf16>, vector<128x128xbf16>, vector<16x128xf32> -> vector<16x128xf32>
    %c1_98 = arith.constant 1 : index
    %c0_99 = arith.constant 0 : index
    %236 = vector.load %arg18[%c1_98, %c0_99] : memref<2x128xf32, #tpu.memory_space<vmem>>, vector<1x128xf32>
    %237 = vector.shape_cast %236 : vector<1x128xf32> to vector<128xf32>
    %238 = vector.shape_cast %237 : vector<128xf32> to vector<1x128xf32>
    %239 = vector.broadcast %238 : vector<1x128xf32> to vector<16x128xf32>
    %240 = arith.addf %235, %239 : vector<16x128xf32>
    %241 = arith.addf %188, %240 : vector<16x128xf32>
    %c1_100 = arith.constant 1 : index
    %c0_101 = arith.constant 0 : index
    %242 = vector.load %arg19[%c1_100, %c0_101] : memref<2x128xf32, #tpu.memory_space<vmem>>, vector<1x128xf32>
    %243 = vector.shape_cast %242 : vector<1x128xf32> to vector<128xf32>
    %c1_102 = arith.constant 1 : index
    %c0_103 = arith.constant 0 : index
    %244 = vector.load %arg20[%c1_102, %c0_103] : memref<2x128xf32, #tpu.memory_space<vmem>>, vector<1x128xf32>
    %245 = vector.shape_cast %244 : vector<1x128xf32> to vector<128xf32>
    %cst_104 = arith.constant dense<0.000000e+00> : vector<16xf32>
    %246 = vector.multi_reduction <add>, %241, %cst_104 [1] : vector<16x128xf32> to vector<16xf32>
    %247 = vector.shape_cast %246 : vector<16xf32> to vector<16x1xf32>
    %cst_105 = arith.constant 1.280000e+02 : f32
    %248 = vector.broadcast %cst_105 : f32 to vector<16x1xf32>
    %249 = arith.divf %247, %248 : vector<16x1xf32>
    %250 = vector.broadcast %249 : vector<16x1xf32> to vector<16x128xf32>
    %251 = arith.subf %241, %250 : vector<16x128xf32>
    %252 = arith.mulf %251, %251 : vector<16x128xf32>
    %cst_106 = arith.constant dense<0.000000e+00> : vector<16xf32>
    %253 = vector.multi_reduction <add>, %252, %cst_106 [1] : vector<16x128xf32> to vector<16xf32>
    %254 = vector.shape_cast %253 : vector<16xf32> to vector<16x1xf32>
    %cst_107 = arith.constant 1.280000e+02 : f32
    %255 = vector.broadcast %cst_107 : f32 to vector<16x1xf32>
    %256 = arith.divf %254, %255 : vector<16x1xf32>
    %257 = vector.broadcast %249 : vector<16x1xf32> to vector<16x128xf32>
    %258 = arith.subf %241, %257 : vector<16x128xf32>
    %cst_108 = arith.constant 9.99999974E-6 : f32
    %259 = vector.broadcast %cst_108 : f32 to vector<16x1xf32>
    %260 = arith.addf %256, %259 : vector<16x1xf32>
    %261 = math.rsqrt %260 : vector<16x1xf32>
    %262 = vector.broadcast %261 : vector<16x1xf32> to vector<16x128xf32>
    %263 = arith.mulf %258, %262 : vector<16x128xf32>
    %264 = vector.shape_cast %243 : vector<128xf32> to vector<1x128xf32>
    %265 = vector.broadcast %264 : vector<1x128xf32> to vector<16x128xf32>
    %266 = arith.mulf %263, %265 : vector<16x128xf32>
    %267 = vector.shape_cast %245 : vector<128xf32> to vector<1x128xf32>
    %268 = vector.broadcast %267 : vector<1x128xf32> to vector<16x128xf32>
    %269 = arith.addf %266, %268 : vector<16x128xf32>
    %270 = arith.truncf %269 : vector<16x128xf32> to vector<16x128xbf16>
    %c1_109 = arith.constant 1 : index
    %c0_110 = arith.constant 0 : index
    %c0_111 = arith.constant 0 : index
    %271 = vector.load %arg23[%c1_109, %c0_110, %c0_111] : memref<2x128x256xbf16, #tpu.memory_space<vmem>>, vector<1x128x256xbf16>
    %272 = vector.shape_cast %271 : vector<1x128x256xbf16> to vector<128x256xbf16>
    %cst_112 = arith.constant dense<0.000000e+00> : vector<16x256xf32>
    %273 = tpu.matmul %270, %272, %cst_112 {dimension_numbers = #tpu.dot_dimension_numbers<[1], [0], [0], [1], [0, 0, 1, 1], [], []>} : vector<16x128xbf16>, vector<128x256xbf16>, vector<16x256xf32> -> vector<16x256xf32>
    %c1_113 = arith.constant 1 : index
    %c0_114 = arith.constant 0 : index
    %274 = vector.load %arg24[%c1_113, %c0_114] : memref<2x256xf32, #tpu.memory_space<vmem>>, vector<1x256xf32>
    %275 = vector.shape_cast %274 : vector<1x256xf32> to vector<256xf32>
    %276 = vector.shape_cast %275 : vector<256xf32> to vector<1x256xf32>
    %277 = vector.broadcast %276 : vector<1x256xf32> to vector<16x256xf32>
    %278 = arith.addf %273, %277 : vector<16x256xf32>
    %cst_115 = arith.constant 0.000000e+00 : f32
    %279 = vector.broadcast %cst_115 : f32 to vector<16x256xf32>
    %280 = arith.maximumf %278, %279 : vector<16x256xf32>
    %281 = arith.truncf %280 : vector<16x256xf32> to vector<16x256xbf16>
    %c1_116 = arith.constant 1 : index
    %c0_117 = arith.constant 0 : index
    %c0_118 = arith.constant 0 : index
    %282 = vector.load %arg25[%c1_116, %c0_117, %c0_118] : memref<2x256x128xbf16, #tpu.memory_space<vmem>>, vector<1x256x128xbf16>
    %283 = vector.shape_cast %282 : vector<1x256x128xbf16> to vector<256x128xbf16>
    %cst_119 = arith.constant dense<0.000000e+00> : vector<16x128xf32>
    %284 = tpu.matmul %281, %283, %cst_119 {dimension_numbers = #tpu.dot_dimension_numbers<[1], [0], [0], [1], [0, 0, 1, 1], [], []>} : vector<16x256xbf16>, vector<256x128xbf16>, vector<16x128xf32> -> vector<16x128xf32>
    %c1_120 = arith.constant 1 : index
    %c0_121 = arith.constant 0 : index
    %285 = vector.load %arg26[%c1_120, %c0_121] : memref<2x128xf32, #tpu.memory_space<vmem>>, vector<1x128xf32>
    %286 = vector.shape_cast %285 : vector<1x128xf32> to vector<128xf32>
    %287 = vector.shape_cast %286 : vector<128xf32> to vector<1x128xf32>
    %288 = vector.broadcast %287 : vector<1x128xf32> to vector<16x128xf32>
    %289 = arith.addf %284, %288 : vector<16x128xf32>
    %290 = arith.addf %269, %289 : vector<16x128xf32>
    %c1_122 = arith.constant 1 : index
    %c0_123 = arith.constant 0 : index
    %291 = vector.load %arg21[%c1_122, %c0_123] : memref<2x128xf32, #tpu.memory_space<vmem>>, vector<1x128xf32>
    %292 = vector.shape_cast %291 : vector<1x128xf32> to vector<128xf32>
    %c1_124 = arith.constant 1 : index
    %c0_125 = arith.constant 0 : index
    %293 = vector.load %arg22[%c1_124, %c0_125] : memref<2x128xf32, #tpu.memory_space<vmem>>, vector<1x128xf32>
    %294 = vector.shape_cast %293 : vector<1x128xf32> to vector<128xf32>
    %cst_126 = arith.constant dense<0.000000e+00> : vector<16xf32>
    %295 = vector.multi_reduction <add>, %290, %cst_126 [1] : vector<16x128xf32> to vector<16xf32>
    %296 = vector.shape_cast %295 : vector<16xf32> to vector<16x1xf32>
    %cst_127 = arith.constant 1.280000e+02 : f32
    %297 = vector.broadcast %cst_127 : f32 to vector<16x1xf32>
    %298 = arith.divf %296, %297 : vector<16x1xf32>
    %299 = vector.broadcast %298 : vector<16x1xf32> to vector<16x128xf32>
    %300 = arith.subf %290, %299 : vector<16x128xf32>
    %301 = arith.mulf %300, %300 : vector<16x128xf32>
    %cst_128 = arith.constant dense<0.000000e+00> : vector<16xf32>
    %302 = vector.multi_reduction <add>, %301, %cst_128 [1] : vector<16x128xf32> to vector<16xf32>
    %303 = vector.shape_cast %302 : vector<16xf32> to vector<16x1xf32>
    %cst_129 = arith.constant 1.280000e+02 : f32
    %304 = vector.broadcast %cst_129 : f32 to vector<16x1xf32>
    %305 = arith.divf %303, %304 : vector<16x1xf32>
    %306 = vector.broadcast %298 : vector<16x1xf32> to vector<16x128xf32>
    %307 = arith.subf %290, %306 : vector<16x128xf32>
    %cst_130 = arith.constant 9.99999974E-6 : f32
    %308 = vector.broadcast %cst_130 : f32 to vector<16x1xf32>
    %309 = arith.addf %305, %308 : vector<16x1xf32>
    %310 = math.rsqrt %309 : vector<16x1xf32>
    %311 = vector.broadcast %310 : vector<16x1xf32> to vector<16x128xf32>
    %312 = arith.mulf %307, %311 : vector<16x128xf32>
    %313 = vector.shape_cast %292 : vector<128xf32> to vector<1x128xf32>
    %314 = vector.broadcast %313 : vector<1x128xf32> to vector<16x128xf32>
    %315 = arith.mulf %312, %314 : vector<16x128xf32>
    %316 = vector.shape_cast %294 : vector<128xf32> to vector<1x128xf32>
    %317 = vector.broadcast %316 : vector<1x128xf32> to vector<16x128xf32>
    %318 = arith.addf %315, %317 : vector<16x128xf32>
    %319 = vector.shape_cast %318 : vector<16x128xf32> to vector<2x8x128xf32>
    %c0_131 = arith.constant 0 : index
    %c0_132 = arith.constant 0 : index
    %c0_133 = arith.constant 0 : index
    %320 = vector.load %arg27[%c0_131, %c0_132, %c0_133] : memref<2x8x128xf32, #tpu.memory_space<vmem>>, vector<2x8x128xf32>
    tpu.vector_store %arg27[%c0_131, %c0_132, %c0_133], %319 {strides = array<i32>} : memref<2x8x128xf32, #tpu.memory_space<vmem>>, vector<2x8x128xf32>,
    return
  }
  func.func @transform_0(%arg0: i32) -> (i32, i32, i32) {
    %c0_i32 = arith.constant 0 : i32
    %c0_i32_0 = arith.constant 0 : i32
    %c0_i32_1 = arith.constant 0 : i32
    return %arg0, %c0_i32, %c0_i32_0 : i32, i32, i32
  }
  func.func @transform_1(%arg0: i32) -> (i32, i32, i32) {
    %c0_i32 = arith.constant 0 : i32
    %c0_i32_0 = arith.constant 0 : i32
    %c0_i32_1 = arith.constant 0 : i32
    return %arg0, %c0_i32, %c0_i32_0 : i32, i32, i32
  }
  func.func @transform_2(%arg0: i32) -> (i32, i32, i32) {
    %c0_i32 = arith.constant 0 : i32
    %c0_i32_0 = arith.constant 0 : i32
    %c0_i32_1 = arith.constant 0 : i32
    return %arg0, %c0_i32, %c0_i32_0 : i32, i32, i32
  }
  func.func @transform_3(%arg0: i32) -> (i32, i32, i32) {
    %c0_i32 = arith.constant 0 : i32
    %c0_i32_0 = arith.constant 0 : i32
    %c0_i32_1 = arith.constant 0 : i32
    return %arg0, %c0_i32, %c0_i32_0 : i32, i32, i32
  }
  func.func @transform_4(%arg0: i32) -> (i32, i32) {
    %c0_i32 = arith.constant 0 : i32
    %c0_i32_0 = arith.constant 0 : i32
    %c0_i32_1 = arith.constant 0 : i32
    return %c0_i32, %c0_i32_0 : i32, i32
  }
  func.func @transform_5(%arg0: i32) -> (i32, i32) {
    %c0_i32 = arith.constant 0 : i32
    %c0_i32_0 = arith.constant 0 : i32
    %c0_i32_1 = arith.constant 0 : i32
    return %c0_i32, %c0_i32_0 : i32, i32
  }
  func.func @transform_6(%arg0: i32) -> (i32, i32) {
    %c0_i32 = arith.constant 0 : i32
    %c0_i32_0 = arith.constant 0 : i32
    %c0_i32_1 = arith.constant 0 : i32
    return %c0_i32, %c0_i32_0 : i32, i32
  }
  func.func @transform_7(%arg0: i32) -> (i32, i32) {
    %c0_i32 = arith.constant 0 : i32
    %c0_i32_0 = arith.constant 0 : i32
    %c0_i32_1 = arith.constant 0 : i32
    return %c0_i32, %c0_i32_0 : i32, i32
  }
  func.func @transform_8(%arg0: i32) -> (i32, i32) {
    %c0_i32 = arith.constant 0 : i32
    %c0_i32_0 = arith.constant 0 : i32
    %c0_i32_1 = arith.constant 0 : i32
    return %c0_i32, %c0_i32_0 : i32, i32
  }
  func.func @transform_9(%arg0: i32) -> (i32, i32) {
    %c0_i32 = arith.constant 0 : i32
    %c0_i32_0 = arith.constant 0 : i32
    %c0_i32_1 = arith.constant 0 : i32
    return %c0_i32, %c0_i32_0 : i32, i32
  }
  func.func @transform_10(%arg0: i32) -> (i32, i32) {
    %c0_i32 = arith.constant 0 : i32
    %c0_i32_0 = arith.constant 0 : i32
    %c0_i32_1 = arith.constant 0 : i32
    return %c0_i32, %c0_i32_0 : i32, i32
  }
  func.func @transform_11(%arg0: i32) -> (i32, i32) {
    %c0_i32 = arith.constant 0 : i32
    %c0_i32_0 = arith.constant 0 : i32
    %c0_i32_1 = arith.constant 0 : i32
    return %c0_i32, %c0_i32_0 : i32, i32
  }
  func.func @transform_12(%arg0: i32) -> (i32, i32) {
    %c0_i32 = arith.constant 0 : i32
    %c0_i32_0 = arith.constant 0 : i32
    %c0_i32_1 = arith.constant 0 : i32
    return %c0_i32, %c0_i32_0 : i32, i32
  }
  func.func @transform_13(%arg0: i32) -> (i32, i32) {
    %c0_i32 = arith.constant 0 : i32
    %c0_i32_0 = arith.constant 0 : i32
    %c0_i32_1 = arith.constant 0 : i32
    return %c0_i32, %c0_i32_0 : i32, i32
  }
  func.func @transform_14(%arg0: i32) -> (i32, i32, i32) {
    %c0_i32 = arith.constant 0 : i32
    %c0_i32_0 = arith.constant 0 : i32
    %c0_i32_1 = arith.constant 0 : i32
    %c0_i32_2 = arith.constant 0 : i32
    return %c0_i32, %c0_i32_0, %c0_i32_1 : i32, i32, i32
  }
  func.func @transform_15(%arg0: i32) -> (i32, i32) {
    %c0_i32 = arith.constant 0 : i32
    %c0_i32_0 = arith.constant 0 : i32
    %c0_i32_1 = arith.constant 0 : i32
    return %c0_i32, %c0_i32_0 : i32, i32
  }
  func.func @transform_16(%arg0: i32) -> (i32, i32, i32) {
    %c0_i32 = arith.constant 0 : i32
    %c0_i32_0 = arith.constant 0 : i32
    %c0_i32_1 = arith.constant 0 : i32
    %c0_i32_2 = arith.constant 0 : i32
    return %c0_i32, %c0_i32_0, %c0_i32_1 : i32, i32, i32
  }
  func.func @transform_17(%arg0: i32) -> (i32, i32) {
    %c0_i32 = arith.constant 0 : i32
    %c0_i32_0 = arith.constant 0 : i32
    %c0_i32_1 = arith.constant 0 : i32
    return %c0_i32, %c0_i32_0 : i32, i32
  }
  func.func @transform_18(%arg0: i32) -> (i32, i32) {
    %c0_i32 = arith.constant 0 : i32
    %c0_i32_0 = arith.constant 0 : i32
    %c0_i32_1 = arith.constant 0 : i32
    return %c0_i32, %c0_i32_0 : i32, i32
  }
  func.func @transform_19(%arg0: i32) -> (i32, i32) {
    %c0_i32 = arith.constant 0 : i32
    %c0_i32_0 = arith.constant 0 : i32
    %c0_i32_1 = arith.constant 0 : i32
    return %c0_i32, %c0_i32_0 : i32, i32
  }
  func.func @transform_20(%arg0: i32) -> (i32, i32) {
    %c0_i32 = arith.constant 0 : i32
    %c0_i32_0 = arith.constant 0 : i32
    %c0_i32_1 = arith.constant 0 : i32
    return %c0_i32, %c0_i32_0 : i32, i32
  }
  func.func @transform_21(%arg0: i32) -> (i32, i32) {
    %c0_i32 = arith.constant 0 : i32
    %c0_i32_0 = arith.constant 0 : i32
    %c0_i32_1 = arith.constant 0 : i32
    return %c0_i32, %c0_i32_0 : i32, i32
  }
  func.func @transform_22(%arg0: i32) -> (i32, i32, i32) {
    %c0_i32 = arith.constant 0 : i32
    %c0_i32_0 = arith.constant 0 : i32
    %c0_i32_1 = arith.constant 0 : i32
    %c0_i32_2 = arith.constant 0 : i32
    return %c0_i32, %c0_i32_0, %c0_i32_1 : i32, i32, i32
  }
  func.func @transform_23(%arg0: i32) -> (i32, i32) {
    %c0_i32 = arith.constant 0 : i32
    %c0_i32_0 = arith.constant 0 : i32
    %c0_i32_1 = arith.constant 0 : i32
    return %c0_i32, %c0_i32_0 : i32, i32
  }
  func.func @transform_24(%arg0: i32) -> (i32, i32, i32) {
    %c0_i32 = arith.constant 0 : i32
    %c0_i32_0 = arith.constant 0 : i32
    %c0_i32_1 = arith.constant 0 : i32
    %c0_i32_2 = arith.constant 0 : i32
    return %c0_i32, %c0_i32_0, %c0_i32_1 : i32, i32, i32
  }
  func.func @transform_25(%arg0: i32) -> (i32, i32) {
    %c0_i32 = arith.constant 0 : i32
    %c0_i32_0 = arith.constant 0 : i32
    %c0_i32_1 = arith.constant 0 : i32
    return %c0_i32, %c0_i32_0 : i32, i32
  }
  func.func @transform_26(%arg0: i32) -> (i32, i32, i32) {
    %c0_i32 = arith.constant 0 : i32
    %c0_i32_0 = arith.constant 0 : i32
    %c0_i32_1 = arith.constant 0 : i32
    return %arg0, %c0_i32, %c0_i32_0 : i32, i32, i32
  }
}

</mosaic_0001>

<bundles_post_ra>
// kernel: tpu_custom_call.1
= control target key start
LH: loop header
LB: loop body
LE: loop exit
PB: predicated region body
PF: predicated region fallthrough
CT: control target
= control target key end

     0   :  { %s7388_s0 = inlined_call_operand.hbm [shape: bf16[2,16,128], index: 0, kind: input, shape index: {}]   ;;  %s7389_s1 = inlined_call_operand.vmem [shape: bf16[2,1,128], index: 1, kind: input, shape index: {}]   ;;  %s7390_s2 = inlined_call_operand.hbm [shape: bf16[2,8,11], index: 2, kind: input, shape index: {}]   ;;  %s7391_s3 = inlined_call_operand.vmem [shape: s32[2,8,2], index: 3, kind: input, shape index: {}]   ;;  %s7392_s4 = inlined_call_operand.hbm [shape: bf16[128,128], index: 4, kind: input, shape index: {}]   ;;  %s7393_s5 = inlined_call_operand.hbm [shape: bf16[128,128], index: 5, kind: input, shape index: {}]   ;;  %s7394_s6 = inlined_call_operand.hbm [shape: f32[1,128], index: 6, kind: input, shape index: {}]   ;;  %s7395_s7 = inlined_call_operand.hbm [shape: bf16[11,128], index: 7, kind: input, shape index: {}]   ;;  %s7396_s8 = inlined_call_operand.hbm [shape: f32[1,128], index: 8, kind: input, shape index: {}]   ;;  %s7397_s9 = inlined_call_operand.hbm [shape: bf16[128,128], index: 9, kind: input, shape index: {}]   ;;  %s7398_s10 = inlined_call_operand.hbm [shape: f32[1,128], index: 10, kind: input, shape index: {}]   ;;  %s7399_s11 = inlined_call_operand.vmem [shape: bf16[128,128], index: 11, kind: input, shape index: {}]   ;;  %s7400_s12 = inlined_call_operand.hbm [shape: bf16[128,128], index: 12, kind: input, shape index: {}]   ;;  %s7401_s13 = inlined_call_operand.hbm [shape: f32[1,128], index: 13, kind: input, shape index: {}]   ;;  %s7402_s14 = inlined_call_operand.hbm [shape: bf16[2,128,512], index: 14, kind: input, shape index: {}]   ;;  %s7403_s15 = inlined_call_operand.vmem [shape: f32[2,512], index: 15, kind: input, shape index: {}]   ;;  %s7404_s16 = inlined_call_operand.hbm [shape: bf16[2,128,128], index: 16, kind: input, shape index: {}]   ;;  %s7405_s17 = inlined_call_operand.vmem [shape: f32[2,128], index: 17, kind: input, shape index: {}]   ;;  %s7406_s18 = inlined_call_operand.vmem [shape: f32[2,128], index: 18, kind: input, shape index: {}]   ;;  %s7407_s19 = inlined_call_operand.vmem [shape: f32[2,128], index: 19, kind: input, shape index: {}]   ;;  %s7408_s20 = inlined_call_operand.vmem [shape: f32[2,128], index: 20, kind: input, shape index: {}]   ;;  %s7409_s21 = inlined_call_operand.vmem [shape: f32[2,128], index: 21, kind: input, shape index: {}]   ;;  %s7410_s22 = inlined_call_operand.hbm [shape: bf16[2,128,256], index: 22, kind: input, shape index: {}]   ;;  %s7411_s23 = inlined_call_operand.vmem [shape: f32[2,256], index: 23, kind: input, shape index: {}]   ;;  %s7412_s24 = inlined_call_operand.hbm [shape: bf16[2,256,128], index: 24, kind: input, shape index: {}]   ;;  %s7413_s25 = inlined_call_operand.vmem [shape: f32[2,128], index: 25, kind: input, shape index: {}]   ;;  %s7414_s26 = inlined_call_operand.hbm [shape: f32[2,8,128], index: 26, kind: output, shape index: {}]  }
   0x1   :  { %7429 = sst [smem:[#allocation36_spill]] %s7388_s0 }
   0x2   :  { %7430 = sst [smem:[#allocation37_spill]] %s7389_s1 }
   0x3   :  { %7431 = sst [smem:[#allocation38_spill]] %s7390_s2 }
   0x4   :  { %7432 = sst [smem:[#allocation39_spill]] %s7391_s3 }
   0x5   :  { %7433 = sst [smem:[#allocation40_spill]] %s7392_s4 }
   0x6   :  { %7434 = sst [smem:[#allocation41_spill]] %s7393_s5 }
   0x7   :  { %7435 = sst [smem:[#allocation42_spill]] %s7394_s6 }
   0x8   :  { %7436 = sst [smem:[#allocation43_spill]] %s7395_s7 }
   0x9   :  { %7437 = sst [smem:[#allocation44_spill]] %s7396_s8 }
   0xa   :  { %7438 = sst [smem:[#allocation45_spill]] %s7397_s9 }
   0xb   :  { %7439 = sst [smem:[#allocation46_spill]] %s7398_s10 }
   0xc   :  { %7440 = sst [smem:[#allocation47_spill]] %s7408_s20 }
   0xd   :  { %7441 = sst [smem:[#allocation48_spill]] %s7409_s21 }
   0xe   :  { %7442 = sst [smem:[#allocation49_spill]] %s7414_s26 }
   0xf   :  { %31 = vsyncpa [#allocation3], 0 }
  0x10   :  { %32 = vsyncpa [#allocation6], 0 }
  0x11   :  { %33 = vsyncpa [#allocation9], 0 }
  0x12   :  { %34 = vsyncpa [#allocation12], 0 }
  0x13   :  { %35 = vsyncpa [#allocation15], 0 }
  0x14   :  { %36 = vsyncpa [#allocation18], 0 }
  0x15   :  { %37 = vsyncpa [#allocation21], 0 }
  0x16   :  { %38 = vsyncpa [#allocation24], 0 }
  0x17   :  { %39 = vsyncpa [#allocation4], 0  ;;  %s6303_s27 = smov [#allocation5]   ;;  %s6304_s7 = smov [#allocation8]  }
  0x18   :  { %s59_s3 = sshll.u32 %s6303_s27, 4  ;;  %s85_s28 = sshll.u32 %s6304_s7, 4  ;;  %s60_s3 = int_to_ptr.vmem [resolvable:$true] %s59_s3  ;;  %s6468_s28 = int_to_ptr.vmem [resolvable:$true] %s85_s28 }
  0x19   :  { %s7443_s29 = sld [smem:[#allocation38_spill]] }
  0x1f   :  { %s5933_s0 = scalar_lea.hbm %s7443_s29, 128 }
  0x20   :  { %p5934_p0 = scmp.ne.s32.totalorder %s7443_s29, %s5933_s0  ;;  %p5937_p1 = scmp.lt.u32.totalorder %s5933_s0, %s7443_s29 }
  0x22   :  { %p5939_p2 = pnand %p5937_p1, %p5934_p0 }
  0x24   :  { %5942 = shalt.err (!%p5939_p2)
}
  0x25   :  { %s5943_s10 = scalar_lea.vmem %s60_s3, 128  ;;  %p5948_p4 = scmp.lt.s32.totalorder %s60_s3, %s60_s3 }
  0x26   :  { %p5944_p3 = scmp.ne.s32.totalorder %s60_s3, %s5943_s10  ;;  %p5949_p5 = scmp.lt.s32.totalorder %s5943_s10, %s5943_s10 }
  0x28   :  { %p5950_p6 = por %p5949_p5, %p5948_p4 }
  0x2a   :  { %p5951_p7 = pnand %p5950_p6, %p5944_p3 }
  0x2c   :  { %5954 = shalt.err (!%p5951_p7)
}
  0x2d   :  { %s6305_s6 = smov 64   ;;  %s6306_s1 = smov 4  }
  0x2e   :  { %65 = dma.hbm_to_vmem [thread:$0]  %s7443_s29, 128, %s60_s3, [#allocation6], %s6305_s6, %s6305_s6, %s6306_s1  }
  0x2f   :  { %s7444_s0 = sld [smem:[#allocation41_spill]] }
  0x35   :  { %s5955_s9 = scalar_lea.hbm %s7444_s0, 1024 }
  0x36   :  { %p5956_p8 = scmp.ne.s32.totalorder %s7444_s0, %s5955_s9  ;;  %p5959_p9 = scmp.lt.u32.totalorder %s5955_s9, %s7444_s0 }
  0x38   :  { %p5961_p10 = pnand %p5959_p9, %p5956_p8 }
  0x3a   :  { %5964 = shalt.err (!%p5961_p10)
}
  0x3b   :  { %s5965_s26 = scalar_lea.vmem %s6468_s28, 1024  ;;  %p5970_p12 = scmp.lt.s32.totalorder %s6468_s28, %s6468_s28 }
  0x3c   :  { %p5966_p11 = scmp.ne.s32.totalorder %s6468_s28, %s5965_s26  ;;  %p5971_p13 = scmp.lt.s32.totalorder %s5965_s26, %s5965_s26 }
  0x3e   :  { %p5972_p0 = por %p5971_p13, %p5970_p12 }
  0x40   :  { %p5973_p1 = pnand %p5972_p0, %p5966_p11 }
  0x42   :  { %5976 = shalt.err (!%p5973_p1)
}
  0x43   :  { %91 = dma.hbm_to_vmem [thread:$0]  %s7444_s0, 1024, %s6468_s28, [#allocation9], %s6305_s6, %s6305_s6, %s6306_s1  }
  0x44   :  { %s6307_s27 = smov [#allocation11]   ;;  %s6308_s8 = smov [#allocation14]  }
  0x45   :  { %s107_s7 = sshll.u32 %s6307_s27, 4  ;;  %s129_s4 = sshll.u32 %s6308_s8, 4  ;;  %s108_s7 = int_to_ptr.vmem [resolvable:$true] %s107_s7  ;;  %s6505_s4 = int_to_ptr.vmem [resolvable:$true] %s129_s4 }
  0x46   :  { %s7445_s30 = sld [smem:[#allocation43_spill]] }
  0x4c   :  { %s5977_s2 = scalar_lea.hbm %s7445_s30, 128 }
  0x4d   :  { %p5978_p2 = scmp.ne.s32.totalorder %s7445_s30, %s5977_s2  ;;  %p5981_p3 = scmp.lt.u32.totalorder %s5977_s2, %s7445_s30 }
  0x4f   :  { %p5983_p4 = pnand %p5981_p3, %p5978_p2 }
  0x51   :  { %5986 = shalt.err (!%p5983_p4)
}
  0x52   :  { %s5987_s28 = scalar_lea.vmem %s108_s7, 128  ;;  %p5992_p6 = scmp.lt.s32.totalorder %s108_s7, %s108_s7 }
  0x53   :  { %p5988_p5 = scmp.ne.s32.totalorder %s108_s7, %s5987_s28  ;;  %p5993_p7 = scmp.lt.s32.totalorder %s5987_s28, %s5987_s28 }
  0x55   :  { %p5994_p8 = por %p5993_p7, %p5992_p6 }
  0x57   :  { %p5995_p9 = pnand %p5994_p8, %p5988_p5 }
  0x59   :  { %5998 = shalt.err (!%p5995_p9)
}
  0x5a   :  { %113 = dma.hbm_to_vmem [thread:$0]  %s7445_s30, 128, %s108_s7, [#allocation12], %s6305_s6, %s6305_s6, %s6306_s1  }
  0x5b   :  { %s7446_s20 = sld [smem:[#allocation45_spill]] }
  0x61   :  { %s5999_s21 = scalar_lea.hbm %s7446_s20, 1024 }
  0x62   :  { %p6000_p10 = scmp.ne.s32.totalorder %s7446_s20, %s5999_s21  ;;  %p6003_p11 = scmp.lt.u32.totalorder %s5999_s21, %s7446_s20 }
  0x64   :  { %p6005_p12 = pnand %p6003_p11, %p6000_p10 }
  0x66   :  { %6008 = shalt.err (!%p6005_p12)
}
  0x67   :  { %s6009_s5 = scalar_lea.vmem %s6505_s4, 1024  ;;  %p6014_p0 = scmp.lt.s32.totalorder %s6505_s4, %s6505_s4 }
  0x68   :  { %p6010_p13 = scmp.ne.s32.totalorder %s6505_s4, %s6009_s5  ;;  %p6015_p1 = scmp.lt.s32.totalorder %s6009_s5, %s6009_s5 }
  0x6a   :  { %p6016_p2 = por %p6015_p1, %p6014_p0 }
  0x6c   :  { %p6017_p3 = pnand %p6016_p2, %p6010_p13 }
  0x6e   :  { %6020 = shalt.err (!%p6017_p3)
}
  0x6f   :  { %135 = dma.hbm_to_vmem [thread:$0]  %s7446_s20, 1024, %s6505_s4, [#allocation15], %s6305_s6, %s6305_s6, %s6306_s1  }
  0x70   :  { %s6309_s10 = smov [#allocation17]   ;;  %s6310_s0 = smov [#allocation20]  }
  0x71   :  { %s153_s28 = sshll.u32 %s6309_s10, 4  ;;  %s175_s3 = sshll.u32 %s6310_s0, 4  ;;  %s154_s28 = int_to_ptr.vmem [resolvable:$true] %s153_s28  ;;  %s6542_s3 = int_to_ptr.vmem [resolvable:$true] %s175_s3 }
  0x72   :  { %s6021_s21 = scalar_lea.hbm %s7400_s12, 1024 }
  0x73   :  { %p6022_p4 = scmp.ne.s32.totalorder %s7400_s12, %s6021_s21  ;;  %p6025_p5 = scmp.lt.u32.totalorder %s6021_s21, %s7400_s12 }
  0x75   :  { %p6027_p6 = pnand %p6025_p5, %p6022_p4 }
  0x77   :  { %6030 = shalt.err (!%p6027_p6)
}
  0x78   :  { %s6031_s4 = scalar_lea.vmem %s154_s28, 1024  ;;  %p6036_p8 = scmp.lt.s32.totalorder %s154_s28, %s154_s28 }
  0x79   :  { %p6032_p7 = scmp.ne.s32.totalorder %s154_s28, %s6031_s4  ;;  %p6037_p9 = scmp.lt.s32.totalorder %s6031_s4, %s6031_s4 }
  0x7b   :  { %p6038_p10 = por %p6037_p9, %p6036_p8 }
  0x7d   :  { %p6039_p11 = pnand %p6038_p10, %p6032_p7 }
  0x7f   :  { %6042 = shalt.err (!%p6039_p11)
}
  0x80   :  { %159 = dma.hbm_to_vmem [thread:$0]  %s7400_s12, 1024, %s154_s28, [#allocation18], %s6305_s6, %s6305_s6, %s6306_s1  }
  0x81   :  { %s6043_s10 = scalar_lea.hbm %s7402_s14, 8192 }
  0x82   :  { %p6044_p12 = scmp.ne.s32.totalorder %s7402_s14, %s6043_s10  ;;  %p6047_p13 = scmp.lt.u32.totalorder %s6043_s10, %s7402_s14 }
  0x84   :  { %p6049_p0 = pnand %p6047_p13, %p6044_p12 }
  0x86   :  { %6052 = shalt.err (!%p6049_p0)
}
  0x87   :  { %s6053_s8 = scalar_lea.vmem %s6542_s3, 8192  ;;  %p6058_p2 = scmp.lt.s32.totalorder %s6542_s3, %s6542_s3 }
  0x88   :  { %p6054_p1 = scmp.ne.s32.totalorder %s6542_s3, %s6053_s8  ;;  %p6059_p3 = scmp.lt.s32.totalorder %s6053_s8, %s6053_s8 }
  0x8a   :  { %p6060_p4 = por %p6059_p3, %p6058_p2 }
  0x8c   :  { %p6061_p5 = pnand %p6060_p4, %p6054_p1 }
  0x8e   :  { %6064 = shalt.err (!%p6061_p5)
}
  0x8f   :  { %s6311_s12 = smov 256   ;;  %s6312_s28 = smov 16  }
  0x90   :  { %181 = dma.hbm_to_vmem [thread:$0]  %s7402_s14, 8192, %s6542_s3, [#allocation21], %s6311_s12, %s6311_s12, %s6312_s28  }
  0x91   :  { %s6313_s2 = smov [#allocation23]   ;;  %s6065_s7 = scalar_lea.hbm %s7410_s22, 4096 }
  0x92   :  { %s211_s4 = sshll.u32 %s6313_s2, 4  ;;  %p6066_p6 = scmp.ne.s32.totalorder %s7410_s22, %s6065_s7  ;;  %s212_s4 = int_to_ptr.vmem [resolvable:$true] %s211_s4 }
  0x93   :  { %p6069_p7 = scmp.lt.u32.totalorder %s6065_s7, %s7410_s22 }
  0x95   :  { %p6071_p8 = pnand %p6069_p7, %p6066_p6 }
  0x97   :  { %6074 = shalt.err (!%p6071_p8)
}
  0x98   :  { %s6075_s27 = scalar_lea.vmem %s212_s4, 4096  ;;  %p6080_p10 = scmp.lt.s32.totalorder %s212_s4, %s212_s4 }
  0x99   :  { %p6076_p9 = scmp.ne.s32.totalorder %s212_s4, %s6075_s27  ;;  %p6081_p11 = scmp.lt.s32.totalorder %s6075_s27, %s6075_s27 }
  0x9b   :  { %p6082_p12 = por %p6081_p11, %p6080_p10 }
  0x9d   :  { %p6083_p13 = pnand %p6082_p12, %p6076_p9 }
  0x9f   :  { %6086 = shalt.err (!%p6083_p13)
}
  0xa0   :  { %s6314_s14 = smov 128   ;;  %s6315_s3 = smov 8  }
  0xa1   :  { %217 = dma.hbm_to_vmem [thread:$0]  %s7410_s22, 4096, %s212_s4, [#allocation24], %s6314_s14, %s6314_s14, %s6315_s3  }
  0xa2   :  { %s6316_s12 = smov [#allocation2]   ;;  %s6317_s9 = smov [#allocation7]  }
  0xa3   :  { %s45_s28 = sshll.u32 %s6316_s12, 4  ;;  %s73_s26 = sshll.u32 %s6317_s9, 4  ;;  %s46_s28 = int_to_ptr.vmem [resolvable:$true] %s45_s28  ;;  %s74_s26 = int_to_ptr.vmem [resolvable:$true] %s73_s26 }
  0xa4   :  { %s7447_s5 = sld [smem:[#allocation36_spill]] }
  0xaa   :  { %s6087_s7 = scalar_lea.hbm %s7447_s5, 256 }
  0xab   :  { %p6088_p0 = scmp.ne.s32.totalorder %s7447_s5, %s6087_s7  ;;  %p6091_p1 = scmp.lt.u32.totalorder %s6087_s7, %s7447_s5 }
  0xad   :  { %p6093_p2 = pnand %p6091_p1, %p6088_p0 }
  0xaf   :  { %6096 = shalt.err (!%p6093_p2)
}
  0xb0   :  { %s6097_s22 = scalar_lea.vmem %s46_s28, 256  ;;  %p6102_p4 = scmp.lt.s32.totalorder %s46_s28, %s46_s28 }
  0xb1   :  { %p6098_p3 = scmp.ne.s32.totalorder %s46_s28, %s6097_s22  ;;  %p6103_p5 = scmp.lt.s32.totalorder %s6097_s22, %s6097_s22 }
  0xb3   :  { %p6104_p6 = por %p6103_p5, %p6102_p4 }
  0xb5   :  { %p6105_p7 = pnand %p6104_p6, %p6098_p3 }
  0xb7   :  { %6108 = shalt.err (!%p6105_p7)
}
  0xb8   :  { %51 = dma.hbm_to_vmem [thread:$0]  %s7447_s5, 256, %s46_s28, [#allocation3], %s6305_s6, %s6305_s6, %s6306_s1  }
  0xb9   :  { %s7448_s12 = sld [smem:[#allocation40_spill]] }
  0xbf   :  { %s6109_s9 = scalar_lea.hbm %s7448_s12, 1024 }
  0xc0   :  { %p6110_p8 = scmp.ne.s32.totalorder %s7448_s12, %s6109_s9  ;;  %p6113_p9 = scmp.lt.u32.totalorder %s6109_s9, %s7448_s12 }
  0xc2   :  { %p6115_p10 = pnand %p6113_p9, %p6110_p8 }
  0xc4   :  { %6118 = shalt.err (!%p6115_p10)
}
  0xc5   :  { %s6119_s10 = scalar_lea.vmem %s74_s26, 1024  ;;  %p6124_p12 = scmp.lt.s32.totalorder %s74_s26, %s74_s26 }
  0xc6   :  { %p6120_p11 = scmp.ne.s32.totalorder %s74_s26, %s6119_s10  ;;  %p6125_p13 = scmp.lt.s32.totalorder %s6119_s10, %s6119_s10 }
  0xc8   :  { %p6126_p0 = por %p6125_p13, %p6124_p12 }
  0xca   :  { %p6127_p1 = pnand %p6126_p0, %p6120_p11 }
  0xcc   :  { %6130 = shalt.err (!%p6127_p1)
}
  0xcd   :  { %79 = dma.hbm_to_vmem [thread:$0]  %s7448_s12, 1024, %s74_s26, [#allocation6], %s6305_s6, %s6305_s6, %s6306_s1  }
  0xce   :  { %s6318_s0 = smov [#allocation10]   ;;  %s6319_s22 = smov [#allocation13]  }
  0xcf   :  { %s98_s29 = sshll.u32 %s6318_s0, 4  ;;  %s120_s4 = sshll.u32 %s6319_s22, 4  ;;  %s99_s29 = int_to_ptr.vmem [resolvable:$true] %s98_s29  ;;  %s121_s4 = int_to_ptr.vmem [resolvable:$true] %s120_s4 }
  0xd0   :  { %s7449_s8 = sld [smem:[#allocation42_spill]] }
  0xd6   :  { %s6131_s9 = scalar_lea.hbm %s7449_s8, 16 }
  0xd7   :  { %p6132_p2 = scmp.ne.s32.totalorder %s7449_s8, %s6131_s9  ;;  %p6135_p3 = scmp.lt.u32.totalorder %s6131_s9, %s7449_s8 }
  0xd9   :  { %p6137_p4 = pnand %p6135_p3, %p6132_p2 }
  0xdb   :  { %6140 = shalt.err (!%p6137_p4)
}
  0xdc   :  { %s6141_s26 = scalar_lea.vmem %s99_s29, 16  ;;  %s6145_s12 = scalar_lea.vmem %s99_s29, 32 }
  0xdd   :  { %p6142_p5 = scmp.ne.s32.totalorder %s99_s29, %s6141_s26  ;;  %p6146_p6 = scmp.lt.s32.totalorder %s99_s29, %s99_s29 }
  0xde   :  { %p6147_p7 = scmp.lt.s32.totalorder %s6145_s12, %s6141_s26 }
  0xe0   :  { %p6148_p8 = por %p6147_p7, %p6146_p6 }
  0xe2   :  { %p6149_p9 = pnand %p6148_p8, %p6142_p5 }
  0xe4   :  { %6152 = shalt.err (!%p6149_p9)
}
  0xe5   :  { %101 = dma.hbm_to_vmem [thread:$0]  %s7449_s8, 16, %s99_s29, [#allocation9]  }
  0xe6   :  { %s7450_s22 = sld [smem:[#allocation44_spill]] }
  0xec   :  { %s6153_s27 = scalar_lea.hbm %s7450_s22, 16 }
  0xed   :  { %p6154_p10 = scmp.ne.s32.totalorder %s7450_s22, %s6153_s27  ;;  %p6157_p11 = scmp.lt.u32.totalorder %s6153_s27, %s7450_s22 }
  0xef   :  { %p6159_p12 = pnand %p6157_p11, %p6154_p10 }
  0xf1   :  { %6162 = shalt.err (!%p6159_p12)
}
  0xf2   :  { %s6163_s7 = scalar_lea.vmem %s121_s4, 16  ;;  %s6167_s30 = scalar_lea.vmem %s121_s4, 32 }
  0xf3   :  { %p6164_p13 = scmp.ne.s32.totalorder %s121_s4, %s6163_s7  ;;  %p6168_p0 = scmp.lt.s32.totalorder %s121_s4, %s121_s4 }
  0xf4   :  { %p6169_p1 = scmp.lt.s32.totalorder %s6167_s30, %s6163_s7 }
  0xf6   :  { %p6170_p2 = por %p6169_p1, %p6168_p0 }
  0xf8   :  { %p6171_p3 = pnand %p6170_p2, %p6164_p13 }
  0xfa   :  { %6174 = shalt.err (!%p6171_p3)
}
  0xfb   :  { %123 = dma.hbm_to_vmem [thread:$0]  %s7450_s22, 16, %s121_s4, [#allocation12]  }
  0xfc   :  { %s6320_s26 = smov [#allocation16]   ;;  %s6321_s10 = smov [#allocation19]  }
  0xfd   :  { %s142_s12 = sshll.u32 %s6320_s26, 4  ;;  %s166_s28 = sshll.u32 %s6321_s10, 4  ;;  %s143_s12 = int_to_ptr.vmem [resolvable:$true] %s142_s12  ;;  %s167_s28 = int_to_ptr.vmem [resolvable:$true] %s166_s28 }
  0xfe   :  { %s7451_s27 = sld [smem:[#allocation46_spill]] }
 0x104   :  { %s6175_s21 = scalar_lea.hbm %s7451_s27, 16 }
 0x105   :  { %p6176_p4 = scmp.ne.s32.totalorder %s7451_s27, %s6175_s21  ;;  %p6179_p5 = scmp.lt.u32.totalorder %s6175_s21, %s7451_s27 }
 0x107   :  { %p6181_p6 = pnand %p6179_p5, %p6176_p4 }
 0x109   :  { %6184 = shalt.err (!%p6181_p6)
}
 0x10a   :  { %s6185_s4 = scalar_lea.vmem %s143_s12, 16  ;;  %s6189_s22 = scalar_lea.vmem %s143_s12, 32 }
 0x10b   :  { %p6186_p7 = scmp.ne.s32.totalorder %s143_s12, %s6185_s4  ;;  %p6190_p8 = scmp.lt.s32.totalorder %s143_s12, %s143_s12 }
 0x10c   :  { %p6191_p9 = scmp.lt.s32.totalorder %s6189_s22, %s6185_s4 }
 0x10e   :  { %p6192_p10 = por %p6191_p9, %p6190_p8 }
 0x110   :  { %p6193_p11 = pnand %p6192_p10, %p6186_p7 }
 0x112   :  { %6196 = shalt.err (!%p6193_p11)
}
 0x113   :  { %145 = dma.hbm_to_vmem [thread:$0]  %s7451_s27, 16, %s143_s12, [#allocation15]  }
 0x114   :  { %s6197_s10 = scalar_lea.hbm %s7401_s13, 16 }
 0x115   :  { %p6198_p12 = scmp.ne.s32.totalorder %s7401_s13, %s6197_s10  ;;  %p6201_p13 = scmp.lt.u32.totalorder %s6197_s10, %s7401_s13 }
 0x117   :  { %p6203_p0 = pnand %p6201_p13, %p6198_p12 }
 0x119   :  { %6206 = shalt.err (!%p6203_p0)
}
 0x11a   :  { %s6207_s2 = scalar_lea.vmem %s167_s28, 16  ;;  %s6211_s20 = scalar_lea.vmem %s167_s28, 32 }
 0x11b   :  { %p6208_p1 = scmp.ne.s32.totalorder %s167_s28, %s6207_s2  ;;  %p6212_p2 = scmp.lt.s32.totalorder %s167_s28, %s167_s28 }
 0x11c   :  { %p6213_p3 = scmp.lt.s32.totalorder %s6211_s20, %s6207_s2 }
 0x11e   :  { %p6214_p4 = por %p6213_p3, %p6212_p2 }
 0x120   :  { %p6215_p5 = pnand %p6214_p4, %p6208_p1 }
 0x122   :  { %6218 = shalt.err (!%p6215_p5)
}
 0x123   :  { %169 = dma.hbm_to_vmem [thread:$0]  %s7401_s13, 16, %s167_s28, [#allocation18]  }
 0x124   :  { %s6322_s7 = smov [#allocation22]   ;;  %s6323_s22 = smov [#allocation25]  }
 0x125   :  { %s189_s4 = sshll.u32 %s6322_s7, 4  ;;  %s225_s30 = sshll.u32 %s6323_s22, 4  ;;  %s190_s4 = int_to_ptr.vmem [resolvable:$true] %s189_s4  ;;  %s226_s30 = int_to_ptr.vmem [resolvable:$true] %s225_s30 }
 0x126   :  { %s6219_s26 = scalar_lea.hbm %s7404_s16, 2048 }
 0x127   :  { %p6220_p6 = scmp.ne.s32.totalorder %s7404_s16, %s6219_s26  ;;  %p6223_p7 = scmp.lt.u32.totalorder %s6219_s26, %s7404_s16 }
 0x129   :  { %p6225_p8 = pnand %p6223_p7, %p6220_p6 }
 0x12b   :  { %6228 = shalt.err (!%p6225_p8)
}
 0x12c   :  { %s6229_s13 = scalar_lea.vmem %s190_s4, 2048  ;;  %p6234_p10 = scmp.lt.s32.totalorder %s190_s4, %s190_s4 }
 0x12d   :  { %p6230_p9 = scmp.ne.s32.totalorder %s190_s4, %s6229_s13  ;;  %p6235_p11 = scmp.lt.s32.totalorder %s6229_s13, %s6229_s13 }
 0x12f   :  { %p6236_p12 = por %p6235_p11, %p6234_p10 }
 0x131   :  { %p6237_p13 = pnand %p6236_p12, %p6230_p9 }
 0x133   :  { %6240 = shalt.err (!%p6237_p13)
}
 0x134   :  { %195 = dma.hbm_to_vmem [thread:$0]  %s7404_s16, 2048, %s190_s4, [#allocation21], %s6305_s6, %s6305_s6, %s6306_s1  }
 0x135   :  { %s6241_s12 = scalar_lea.hbm %s7412_s24, 4096 }
 0x136   :  { %p6242_p0 = scmp.ne.s32.totalorder %s7412_s24, %s6241_s12  ;;  %p6245_p1 = scmp.lt.u32.totalorder %s6241_s12, %s7412_s24 }
 0x138   :  { %p6247_p2 = pnand %p6245_p1, %p6242_p0 }
 0x13a   :  { %6250 = shalt.err (!%p6247_p2)
}
 0x13b   :  { %s6251_s8 = scalar_lea.vmem %s226_s30, 4096  ;;  %p6256_p4 = scmp.lt.s32.totalorder %s226_s30, %s226_s30 }
 0x13c   :  { %p6252_p3 = scmp.ne.s32.totalorder %s226_s30, %s6251_s8  ;;  %p6257_p5 = scmp.lt.s32.totalorder %s6251_s8, %s6251_s8 }
 0x13e   :  { %p6258_p6 = por %p6257_p5, %p6256_p4 }
 0x140   :  { %p6259_p7 = pnand %p6258_p6, %p6252_p3 }
 0x142   :  { %6262 = shalt.err (!%p6259_p7)
}
 0x143   :  { %231 = dma.hbm_to_vmem [thread:$0]  %s7412_s24, 4096, %s226_s30, [#allocation24], %s6305_s6, %s6305_s6, %s6306_s1  }
 0x144   :  { %6285 = dma.done.wait [#allocation3], 256  }
 0x145   :  { %6286 = vsyncadd [#allocation3], 4294967040 }
 0x146   :  { %6287 = dma.done.wait [#allocation6], 1152  }
 0x147   :  { %6288 = vsyncadd [#allocation6], 4294966144 }
 0x148   :  { %6289 = dma.done.wait [#allocation9], 1040  }
 0x149   :  { %6290 = vsyncadd [#allocation9], 4294966256 }
 0x14a   :  { %6291 = dma.done.wait [#allocation12], 144  }
 0x14b   :  { %6292 = vsyncadd [#allocation12], 4294967152 }
 0x14c   :  { %6293 = dma.done.wait [#allocation15], 1040  }
 0x14d   :  { %6294 = vsyncadd [#allocation15], 4294966256 }
 0x14e   :  { %6295 = dma.done.wait [#allocation18], 1040  }
 0x14f   :  { %6296 = vsyncadd [#allocation18], 4294966256 }
 0x150   :  { %6297 = dma.done.wait [#allocation21], 10240  }
 0x151   :  { %6298 = vsyncadd [#allocation21], 4294957056 }
 0x152   :  { %6299 = dma.done.wait [#allocation24], 8192  }
 0x153   :  { %6300 = vsyncadd [#allocation24], 4294959104  ;;  %v6324_v0 = vmov 0   ;;  %v6325_v1 = vmov 1   ;;  %v6326_v2 = vmov 0.0   ;;  %s7452_s30 = sld [smem:[#allocation39_spill]]  ;;  %v290_v7 = vlaneseq }
 0x154   :  { %5614 = vset.pattern.permute.xlu0 %v6324_v0  ;;  %5615 = vset.pattern.permute.xlu1 %v6325_v1  ;;  %v5617_v5 = vld [vmem:[#allocation2] sm:$0xff]   ;;  %vm6327_vm0 = vmmov 0   ;;  %v5618_v6 = vld [vmem:[#allocation2 + $0x8] sm:$0xff]   ;;  %vm326_vm2 = vcmask 130048   ;;  %v5619_v21 = vld [vmem:[#allocation8] sm:$0xff]   ;;  %s7453_s21 = sld [smem:[#allocation37_spill]] }
 0x155   :  { %5210 = vmatprep.subr.bf16.mxu0 %v6326_v2  ;;  %5228 = vmatprep.subr.bf16.mxu1 %v6326_v2  ;;  %v291_v8 = vand.u32 127, %v290_v7  ;;  %v5623_v16 = vld [vmem:[#allocation14] sm:$0xff]   ;;  %v5622_v25 = vld [vmem:[#allocation8 + $0x18] sm:$0xff]   ;;  %v5624_v26 = vld [vmem:[#allocation8 + $0x20] sm:$0xff]   ;;  %v6328_v32 = vmov 1966171168  }
 0x156   :  { %5211 = vmatpush3.bf16.msra.mxu0 %v5617_v5  ;;  %5212 = vmatprep.mubr.msk.bf16.mxu0 %vm6327_vm0, %v6326_v2  ;;  %v5620_v23 = vld [vmem:[#allocation8 + $0x8] sm:$0xff]   ;;  %v5621_v24 = vld [vmem:[#allocation8 + $0x10] sm:$0xff]   ;;  %v5627_v29 = vld [vmem:[#allocation14 + $0x10] sm:$0xff]   ;;  %v830_v33 = vunpack.c.l.s4 %v6328_v32  ;;  %v6745_v37 = vshrl.u32 %v290_v7, 7  ;;  %vm853_vm6 = vcmask 1041409   ;;  %vm749_vm7 = vcmask 1044480  }
 0x157   :  { %5216 = vmatprep.subr.bf16.mxu0 %v6326_v2  ;;  %5230 = vmatprep.mubr.msk.bf16.mxu1 %vm6327_vm0, %v6326_v2  ;;  %v5625_v27 = vld [vmem:[#allocation14 + $0x8] sm:$0xff]   ;;  %v5626_v28 = vld [vmem:[#allocation8 + $0x28] sm:$0xff]   ;;  %v5635_v41 = vld [vmem:[#allocation14 + $0x30] sm:$0xff]   ;;  %vm750_vm8 = vcmask 1045504   ;;  %vm745_vm9 = vcmask 89088   ;;  %s6330_s0 = smov 96  }
 0x158   :  { %5229 = vmatpush3.bf16.msra.mxu1 %v5618_v6  ;;  %v5628_v30 = vld [vmem:[#allocation8 + $0x30] sm:$0xff]   ;;  %v5629_v31 = vld [vmem:[#allocation14 + $0x18] sm:$0xff]   ;;  %v5630_v34 = vld [vmem:[#allocation8 + $0x38] sm:$0xff]   ;;  %v831_v36 = vunpack.c.0.s8 %v830_v33  ;;  %vm1529_vm10 = vcmask 261120   ;;  %vm1912_vm11 = vcmask 64512   ;;  %vm2014_vm12 = vcmask 1043456  }
 0x159   :  { %v288_v3 = vld [vmem:[%s7452_s30] sm:$0xff]  ;;  %v289_v4 = vld [vmem:[%s7452_s30 + $0x8] sm:$0xff]  ;;  %5280 = vmatprep.subr.bf16.mxu1 %v6326_v2  ;;  %v5647_v53 = vld [vmem:[%s7399_s11 + $0x10] sm:$0xff]   ;;  %vm2426_vm13 = vcmask 523264   ;;  %vm2431_vm14 = vcmask 785408   ;;  %s7454_s4 = sld [smem:[#allocation47_spill]] }
 0x15a   :  { %293 = vperm.xlu0 %5614, %v288_v3   ;;  %307 = vperm.xlu1 %5615, %v288_v3   ;;  %v5631_v35 = vld [vmem:[#allocation14 + $0x20] sm:$0xff]   ;;  %v6750_v38 = vsub.s32 %v831_v36, %v6745_v37  ;;  %v5633_v39 = vld [vmem:[#allocation14 + $0x28] sm:$0xff]   ;;  %v4779_v40 = vld.sshfl [vmem:[%s7453_s21 + $0x1] sm:$0x1 pattern:$0x75316420] }
 0x15b   :  { %v4778_v43 = vld.sshfl [vmem:[%s7453_s21] sm:$0x1 pattern:$0x75316420]  ;;  %v5646_v52 = vld [vmem:[%s7399_s11 + $0x8] sm:$0xff]   ;;  %v5648_v54 = vld [vmem:[%s7399_s11 + $0x18] sm:$0xff]  }
 0x15c   :  { %v849_v42 = vrot.slane %v4779_v40, %v6750_v38  ;;  %v835_v44 = vrot.slane %v4778_v43, %v6750_v38  ;;  %v5637_v46 = vld [vmem:[#allocation14 + $0x38] sm:$0xff]   ;;  %v5650_v56 = vld [vmem:[%s7399_s11 + $0x28] sm:$0xff]   ;;  %v5651_v57 = vld [vmem:[%s7399_s11 + $0x30] sm:$0xff]   ;;  %s6331_s21 = smov 32   ;;  %s7455_s30 = sld [smem:[#allocation48_spill]] }
 0x15d   :  { %v5645_v51 = vld [vmem:[%s7399_s11] sm:$0xff]   ;;  %v5652_v58 = vld [vmem:[%s7399_s11 + $0x38] sm:$0xff]   ;;  %v5658_v43 = vld [vmem:[#allocation17 + $0x28] sm:$0xff]   ;;  %s6332_s2 = smov [#allocation26]  }
 0x15e   :  { %296 = vperm.xlu0 %5614, %v289_v4   ;;  %310 = vperm.xlu1 %5615, %v289_v4   ;;  %v851_v45 = vunpack.c.l.b16 %v849_v42  ;;  %v850_v47 = vunpack.c.l.b16 %v835_v44  ;;  %v5649_v55 = vld [vmem:[%s7399_s11 + $0x20] sm:$0xff]   ;;  %v5655_v40 = vld [vmem:[#allocation17 + $0x10] sm:$0xff]   ;;  %s4727_s20 = sshll.u32 %s6332_s2, 4  ;;  %s4728_s20 = int_to_ptr.vmem [resolvable:$true] %s4727_s20 }
 0x15f   :  { %v5657_v42 = vld [vmem:[#allocation17 + $0x20] sm:$0xff]   ;;  %v5659_v44 = vld [vmem:[#allocation17 + $0x30] sm:$0xff]   ;;  %s6263_s12 = scalar_lea.vmem %s4728_s20, 256  ;;  %p6268_p9 = scmp.lt.s32.totalorder %s4728_s20, %s4728_s20 }
 0x160   :  { %v852_v48 = vrot.slane %v851_v45, 7  ;;  %v5660_v45 = vld [vmem:[#allocation17 + $0x38] sm:$0xff]   ;;  %p6264_p8 = scmp.ne.s32.totalorder %s4728_s20, %s6263_s12  ;;  %p6269_p10 = scmp.lt.s32.totalorder %s6263_s12, %s6263_s12 }
 0x162   :  { %5616 = vset.pattern.permute.xlu0 %v6325_v1  ;;  %v854_v49 = vsel %vm853_vm6, %v852_v48, %v850_v47  ;;  %v5663_v47 = vld [vmem:[#allocation20 + $0x4] ss:$16 sps:$4 sm:$0xff]   ;;  %v5666_v48 = vld [vmem:[#allocation20 + $0xc] ss:$16 sps:$4 sm:$0xff]   ;;  %p6270_p11 = por %p6269_p10, %p6268_p9 }
 0x163   :  { %v855_v50 = vpack.c.b16 %v854_v49, %v854_v49  ;;  %v5669_v49 = vld [vmem:[#allocation20 + $0x24] ss:$16 sps:$4 sm:$0xff]  }
 0x164   :  { %p6271_p12 = pnand %p6270_p11, %p6264_p8 }
 0x1d9   :  { %v294_v9 = vpop.permute.xlu0 %293  ;;  %v308_v10 = vpop.permute.xlu1 %307 }
 0x1da   :  { %vm298_vm1 = vcmp.eq.s32.totalorder %v291_v8, %v294_v9  ;;  %vm312_vm5 = vcmp.eq.s32.totalorder %v291_v8, %v308_v10 }
 0x1db   :  { %v4746_v11 = vsel %vm298_vm1, 1.0, %v6326_v2  ;;  %v4748_v20 = vsel %vm312_vm5, 1.0, %v6326_v2 }
 0x1dc   :  { %v304_v12 = vpack.c.bf16 %v4746_v11, %v4746_v11  ;;  %v318_v22 = vpack.c.bf16 %v4748_v20, %v4748_v20  ;;  %v5632_v11 = vld [vmem:[#allocation7] sm:$0xff]   ;;  %v5640_v20 = vld [vmem:[#allocation7 + $0x28] sm:$0xff]  }
 0x1dd   :  { %v297_v13 = vpop.permute.xlu0 %296  ;;  %v311_v14 = vpop.permute.xlu1 %310 }
 0x1de   :  { %vm299_vm3 = vcmp.eq.s32.totalorder %v291_v8, %v297_v13  ;;  %5213 = vmatmul.mubr.msk.bf16.vlgmr.msra.gmra.mrb[0].mxu0 %vm326_vm2, %v304_v12  ;;  %vm313_vm4 = vcmp.eq.s32.totalorder %v291_v8, %v311_v14 }
 0x1df   :  { %5217 = vmatpush3.bf16.msra.mxu0 %v5618_v6  ;;  %v4749_v15 = vsel %vm313_vm4, 1.0, %v6326_v2  ;;  %5218 = vmatprep.mubr.msk.bf16.mxu0 %vm6327_vm0, %v6326_v2  ;;  %v4747_v18 = vsel %vm299_vm3, 1.0, %v6326_v2 }
 0x1e0   :  { %v319_v17 = vpack.c.bf16 %v4749_v15, %v4749_v15  ;;  %5222 = vmatprep.subr.bf16.mxu0 %v6326_v2  ;;  %v305_v19 = vpack.c.bf16 %v4747_v18, %v4747_v18  ;;  %v5638_v18 = vld [vmem:[#allocation7 + $0x18] sm:$0xff]  }
 0x1e2   :  { %5231 = vmatmul.mubr.msk.bf16.vlgmr.msra.gmra.mrb[0].mxu1 %vm326_vm2, %v319_v17  ;;  %v5636_v17 = vld [vmem:[#allocation7 + $0x10] sm:$0xff]  }
 0x1e3   :  { %5281 = vmatpush3.bf16.msra.mxu1 %v5623_v16  ;;  %5296 = vmatprep.mubr.msk.bf16.mxu1 %vm6327_vm0, %v6326_v2  ;;  %v5634_v16 = vld [vmem:[#allocation7 + $0x8] sm:$0xff]  }
 0x1e4   :  { %5282 = vmatprep.subr.bf16.mxu1 %v6326_v2 }
 0x1e6   :  { %5219 = vmatmul.mubr.msk.bf16.vlgmr.msra.gmra.mrb[4].mxu0 %vm326_vm2, %v305_v19  ;;  %v5639_v19 = vld [vmem:[#allocation7 + $0x20] sm:$0xff]  }
 0x1e7   :  { %5223 = vmatpush3.bf16.msra.mxu0 %v5617_v5  ;;  %5224 = vmatprep.mubr.msk.bf16.mxu0 %vm6327_vm0, %v6326_v2 }
 0x1e8   :  { %5234 = vmatprep.subr.bf16.mxu0 %v6326_v2  ;;  %5283 = vmatpush3.bf16.msra.mxu1 %v5625_v27 }
 0x1e9   :  { %5284 = vmatprep.subr.bf16.mxu1 %v6326_v2 }
 0x1ec   :  { %5285 = vmatpush3.bf16.msra.mxu1 %v5627_v29  ;;  %v4777_v29 = vld [vmem:[#allocation16] ss:$0 sm:$0xff] }
 0x1ed   :  { %5286 = vmatprep.subr.bf16.mxu1 %v6326_v2 }
 0x1ee   :  { %5225 = vmatmul.mubr.msk.bf16.vlgmr.msra.gmra.mrb[8].mxu0 %vm326_vm2, %v318_v22  ;;  %v6329_v22 = vmov 65535  }
 0x1ef   :  { %5235 = vmatpush3.bf16.msra.mxu0 %v5619_v21  ;;  %5250 = vmatprep.mubr.msk.bf16.mxu0 %vm6327_vm0, %v6326_v2  ;;  %v5641_v21 = vld [vmem:[#allocation7 + $0x30] sm:$0xff]  }
 0x1f0   :  { %5236 = vmatprep.subr.bf16.mxu0 %v6326_v2  ;;  %5287 = vmatpush3.bf16.msra.mxu1 %v5629_v31 }
 0x1f1   :  { %5288 = vmatprep.subr.bf16.mxu1 %v6326_v2 }
 0x1f3   :  { %5237 = vmatpush3.bf16.msra.mxu0 %v5620_v23  ;;  %v751_v23 = vsel %vm749_vm7, 4294967295, %v6329_v22  ;;  %v5699_v22 = vld [vmem:[#allocation20 + $0xc4] ss:$16 sps:$4 sm:$0xff]  }
 0x1f4   :  { %5238 = vmatprep.subr.bf16.mxu0 %v6326_v2  ;;  %5289 = vmatpush3.bf16.msra.mxu1 %v5631_v35 }
 0x1f5   :  { %5290 = vmatprep.subr.bf16.mxu1 %v6326_v2 }
 0x1f7   :  { %5239 = vmatpush3.bf16.msra.mxu0 %v5621_v24  ;;  %v5642_v24 = vld [vmem:[#allocation7 + $0x38] sm:$0xff]  }
 0x1f8   :  { %5240 = vmatprep.subr.bf16.mxu0 %v6326_v2  ;;  %5291 = vmatpush3.bf16.msra.mxu1 %v5633_v39  ;;  %v5654_v39 = vld [vmem:[#allocation17 + $0x8] sm:$0xff]  }
 0x1f9   :  { %5292 = vmatprep.subr.bf16.mxu1 %v6326_v2 }
 0x1fb   :  { %5241 = vmatpush3.bf16.msra.mxu0 %v5622_v25  ;;  %v5643_v25 = vld [vmem:[#allocation11] sm:$0x3f]  }
 0x1fc   :  { %5242 = vmatprep.subr.bf16.mxu0 %v6326_v2  ;;  %5293 = vmatpush3.bf16.msra.mxu1 %v5635_v41  ;;  %v5656_v41 = vld [vmem:[#allocation17 + $0x18] sm:$0xff]  }
 0x1fd   :  { %5294 = vmatprep.subr.bf16.mxu1 %v6326_v2 }
 0x1ff   :  { %5243 = vmatpush3.bf16.msra.mxu0 %v5624_v26  ;;  %v752_v26 = vsel %vm750_vm8, %v751_v23, 0  ;;  %v5702_v23 = vld [vmem:[#allocation20 + $0xcc] ss:$16 sps:$4 sm:$0xff]  }
 0x200   :  { %5244 = vmatprep.subr.bf16.mxu0 %v6326_v2  ;;  %5295 = vmatpush3.bf16.msra.mxu1 %v5637_v46  ;;  %v754_v27 = vand.u32 %v5643_v25, %v752_v26  ;;  %v5661_v46 = vld [vmem:[#allocation20] ss:$16 sps:$4 sm:$0xff]   ;;  %v5700_v25 = vld [vmem:[#allocation20 + $0xc8] ss:$16 sps:$4 sm:$0xff]   ;;  %v5705_v26 = vld [vmem:[#allocation20 + $0xe4] ss:$16 sps:$4 sm:$0xff]  }
 0x201   :  { %5300 = vmatprep.subr.bf16.mxu1 %v6326_v2 }
 0x203   :  { %5245 = vmatpush3.bf16.msra.mxu0 %v5626_v28  ;;  %5297 = vmatmul.mubr.bf16.vlgmr.msra.gmra.mrb[4].mxu1 %v855_v50  ;;  %v5644_v28 = vld [vmem:[#allocation5] sm:$0xff]   ;;  %v5667_v50 = vld [vmem:[#allocation20 + $0x20] ss:$16 sps:$4 sm:$0xff]  }
 0x204   :  { %5246 = vmatprep.subr.bf16.mxu0 %v6326_v2  ;;  %5316 = vmatprep.mubr.msk.bf16.mxu1 %vm6327_vm0, %v6326_v2 }
 0x205   :  { %5301 = vmatpush3.bf16.msra.mxu1 %v5645_v51  ;;  %v5675_v51 = vld [vmem:[#allocation20 + $0x44] ss:$16 sps:$4 sm:$0xff]  }
 0x206   :  { %5302 = vmatprep.subr.bf16.mxu1 %v6326_v2 }
 0x207   :  { %5247 = vmatpush3.bf16.msra.mxu0 %v5628_v30 }
 0x208   :  { %5248 = vmatprep.subr.bf16.mxu0 %v6326_v2 }
 0x209   :  { %5303 = vmatpush3.bf16.msra.mxu1 %v5646_v52  ;;  %v5673_v52 = vld [vmem:[#allocation20 + $0x40] ss:$16 sps:$4 sm:$0xff]  }
 0x20a   :  { %5304 = vmatprep.subr.bf16.mxu1 %v6326_v2 }
 0x20b   :  { %5249 = vmatpush3.bf16.msra.mxu0 %v5630_v34  ;;  %v5653_v34 = vld [vmem:[#allocation17] sm:$0xff]  }
 0x20c   :  { %5254 = vmatprep.subr.bf16.mxu0 %v6326_v2 }
 0x20d   :  { %5305 = vmatpush3.bf16.msra.mxu1 %v5647_v53  ;;  %v5681_v53 = vld [vmem:[#allocation20 + $0x64] ss:$16 sps:$4 sm:$0xff]  }
 0x20e   :  { %5306 = vmatprep.subr.bf16.mxu1 %v6326_v2 }
 0x211   :  { %5307 = vmatpush3.bf16.msra.mxu1 %v5648_v54  ;;  %v5679_v54 = vld [vmem:[#allocation20 + $0x60] ss:$16 sps:$4 sm:$0xff]  }
 0x212   :  { %5308 = vmatprep.subr.bf16.mxu1 %v6326_v2 }
 0x215   :  { %5309 = vmatpush3.bf16.msra.mxu1 %v5649_v55  ;;  %v5687_v55 = vld [vmem:[#allocation20 + $0x84] ss:$16 sps:$4 sm:$0xff]  }
 0x216   :  { %5310 = vmatprep.subr.bf16.mxu1 %v6326_v2 }
 0x219   :  { %5311 = vmatpush3.bf16.msra.mxu1 %v5650_v56  ;;  %v5685_v56 = vld [vmem:[#allocation20 + $0x80] ss:$16 sps:$4 sm:$0xff]  }
 0x21a   :  { %5312 = vmatprep.subr.bf16.mxu1 %v6326_v2 }
 0x21d   :  { %5313 = vmatpush3.bf16.msra.mxu1 %v5651_v57  ;;  %v5693_v57 = vld [vmem:[#allocation20 + $0xa4] ss:$16 sps:$4 sm:$0xff]  }
 0x21e   :  { %5314 = vmatprep.subr.bf16.mxu1 %v6326_v2 }
 0x221   :  { %5315 = vmatpush3.bf16.msra.mxu1 %v5652_v58  ;;  %v5691_v58 = vld [vmem:[#allocation20 + $0xa0] ss:$16 sps:$4 sm:$0xff]  }
 0x222   :  { %5320 = vmatprep.subr.bf16.mxu1 %v6326_v2 }
 0x2b1   :  { %v364_v59 = vpop.f32.mrb[0].mxu0 }
 0x2b2   :  { %v5214_v60 = vpop.f32.mrb[1].mxu0 }
 0x2b3   :  { %v367_v61 = vpop.f32.mrb[2].mxu0  ;;  %v4773_v60 = vld [vmem:[#allocation13] ss:$0 sm:$0xff] }
 0x2b4   :  { %v5215_v62 = vpop.f32.mrb[3].mxu0 }
 0x2b5   :  { %v499_v63 = vpop.f32.mrb[0].mxu1 }
 0x2b6   :  { %v5232_v1 = vpop.f32.mrb[1].mxu1 }
 0x2b7   :  { %v502_v3 = vpop.f32.mrb[2].mxu1 }
 0x2b8   :  { %v5233_v4 = vpop.f32.mrb[3].mxu1 }
 0x2b9   :  { %v413_v5 = vpop.f32.mrb[4].mxu0 }
 0x2ba   :  { %v505_v6 = vpack.c.bf16 %v413_v5, %v364_v59  ;;  %v5220_v7 = vpop.f32.mrb[5].mxu0  ;;  %v4772_v59 = vld [vmem:[#allocation10] ss:$0 sm:$0xff] }
 0x2bb   :  { %v416_v8 = vpop.f32.mrb[6].mxu0  ;;  %v5572_v61 = vadd.f32 %v4773_v60, %v4772_v59 }
 0x2bc   :  { %v5221_v9 = vpop.f32.mrb[7].mxu0  ;;  %v5672_v8 = vld [vmem:[#allocation20 + $0x2c] ss:$16 sps:$4 sm:$0xff]  }
 0x2bd   :  { %v5670_v9 = vld [vmem:[#allocation20 + $0x28] ss:$16 sps:$4 sm:$0xff]  }
 0x2c1   :  { %v456_v10 = vpop.f32.mrb[8].mxu0 }
 0x2c2   :  { %v522_v12 = vpack.c.bf16 %v499_v63, %v456_v10  ;;  %v5226_v13 = vpop.f32.mrb[9].mxu0  ;;  %v5678_v10 = vld [vmem:[#allocation20 + $0x4c] ss:$16 sps:$4 sm:$0xff]  }
 0x2c3   :  { %v459_v14 = vpop.f32.mrb[10].mxu0  ;;  %v5682_v13 = vld [vmem:[#allocation20 + $0x68] ss:$16 sps:$4 sm:$0xff]  }
 0x2c4   :  { %v5227_v15 = vpop.f32.mrb[11].mxu0  ;;  %5251 = vmatmul.mubr.bf16.vlgmr.msra.gmra.mrb[12].mxu0 %v522_v12  ;;  %v5684_v12 = vld [vmem:[#allocation20 + $0x6c] ss:$16 sps:$4 sm:$0xff]  }
 0x2c5   :  { %5255 = vmatpush3.bf16.msra.mxu0 %v5632_v11  ;;  %5270 = vmatprep.mubr.msk.bf16.mxu0 %vm6327_vm0, %v6326_v2  ;;  %v5676_v11 = vld [vmem:[#allocation20 + $0x48] ss:$16 sps:$4 sm:$0xff]   ;;  %v5690_v14 = vld [vmem:[#allocation20 + $0x8c] ss:$16 sps:$4 sm:$0xff]  }
 0x2c6   :  { %5256 = vmatprep.subr.bf16.mxu0 %v6326_v2  ;;  %v5688_v15 = vld [vmem:[#allocation20 + $0x88] ss:$16 sps:$4 sm:$0xff]  }
 0x2c9   :  { %5257 = vmatpush3.bf16.msra.mxu0 %v5634_v16  ;;  %v5696_v16 = vld [vmem:[#allocation20 + $0xac] ss:$16 sps:$4 sm:$0xff]  }
 0x2ca   :  { %5258 = vmatprep.subr.bf16.mxu0 %v6326_v2 }
 0x2cd   :  { %5259 = vmatpush3.bf16.msra.mxu0 %v5636_v17  ;;  %v5694_v17 = vld [vmem:[#allocation20 + $0xa8] ss:$16 sps:$4 sm:$0xff]  }
 0x2ce   :  { %5260 = vmatprep.subr.bf16.mxu0 %v6326_v2 }
 0x2d1   :  { %5261 = vmatpush3.bf16.msra.mxu0 %v5638_v18 }
 0x2d2   :  { %5262 = vmatprep.subr.bf16.mxu0 %v6326_v2 }
 0x2d5   :  { %5263 = vmatpush3.bf16.msra.mxu0 %v5639_v19 }
 0x2d6   :  { %5264 = vmatprep.subr.bf16.mxu0 %v6326_v2  ;;  %v939_v30 = vpop.f32.mrb[4].mxu1 }
 0x2d7   :  { %v940_v31 = vadd.f32 %v4777_v29, %v939_v30  ;;  %v5298_v32 = vpop.f32.mrb[5].mxu1  ;;  %v5706_v29 = vld [vmem:[#allocation20 + $0xe8] ss:$16 sps:$4 sm:$0xff]  }
 0x2d8   :  { %v942_v33 = vpop.f32.mrb[6].mxu1 }
 0x2d9   :  { %5265 = vmatpush3.bf16.msra.mxu0 %v5640_v20  ;;  %v945_v35 = vpack.c.bf16 %v940_v31, %v940_v31  ;;  %v5299_v36 = vpop.f32.mrb[7].mxu1  ;;  %v6825_v33 = vsub.s32 0, %v6745_v37 }
 0x2da   :  { %5266 = vmatprep.subr.bf16.mxu0 %v6326_v2 }
 0x2db   :  { %5317 = vmatmul.mubr.bf16.vlgmr.msra.gmra.mrb[8].mxu1 %v945_v35 }
 0x2dc   :  { %5321 = vmatpush3.bf16.msra.mxu1 %v5653_v34  ;;  %5336 = vmatprep.mubr.msk.bf16.mxu1 %vm6327_vm0, %v6326_v2 }
 0x2dd   :  { %5267 = vmatpush3.bf16.msra.mxu0 %v5641_v21  ;;  %5322 = vmatprep.subr.bf16.mxu1 %v6326_v2 }
 0x2de   :  { %5268 = vmatprep.subr.bf16.mxu0 %v6326_v2 }
 0x2e0   :  { %5323 = vmatpush3.bf16.msra.mxu1 %v5654_v39 }
 0x2e1   :  { %5269 = vmatpush3.bf16.msra.mxu0 %v5642_v24  ;;  %5324 = vmatprep.subr.bf16.mxu1 %v6326_v2  ;;  %v5697_v24 = vld [vmem:[#allocation20 + $0xc0] ss:$16 sps:$4 sm:$0xff]  }
 0x2e2   :  { %5274 = vmatprep.subr.bf16.mxu0 %v6326_v2 }
 0x2e4   :  { %5271 = vmatmul.mubr.bf16.vlgmr.msra.gmra.mrb[12].mxu0 %v505_v6  ;;  %5325 = vmatpush3.bf16.msra.mxu1 %v5655_v40  ;;  %v5664_v6 = vld [vmem:[#allocation20 + $0x8] ss:$16 sps:$4 sm:$0xff]  }
 0x2e5   :  { %5275 = vmatpush3.bf16.msra.mxu0 %v754_v27  ;;  %5276 = vmatprep.mubr.msk.bf16.mxu0 %vm6327_vm0, %v6326_v2  ;;  %v5708_v27 = vld [vmem:[#allocation20 + $0xec] ss:$16 sps:$4 sm:$0xff]  }
 0x2e6   :  { %5326 = vmatprep.subr.bf16.mxu1 %v6326_v2  ;;  %1417 = vmatprep.subr.bf16.mxu0 %v5663_v47 }
 0x2e8   :  { %5327 = vmatpush3.bf16.msra.mxu1 %v5656_v41 }
 0x2e9   :  { %5328 = vmatprep.subr.bf16.mxu1 %v6326_v2 }
 0x2ec   :  { %5329 = vmatpush3.bf16.msra.mxu1 %v5657_v42  ;;  %v4804_v42 = vld [vmem:[#allocation19] ss:$0 sm:$0xff] }
 0x2ed   :  { %5330 = vmatprep.subr.bf16.mxu1 %v6326_v2 }
 0x2f0   :  { %5277 = vmatmul.mubr.msk.bf16.vlgmr.msra.gmra.mrb[12].mxu0 %vm745_vm9, %v5644_v28  ;;  %5331 = vmatpush3.bf16.msra.mxu1 %v5658_v43  ;;  %v5703_v28 = vld [vmem:[#allocation20 + $0xe0] ss:$16 sps:$4 sm:$0xff]  }
 0x2f1   :  { %1449 = vmatprep.mubr.bf16.mxu0 %v6324_v0  ;;  %5332 = vmatprep.subr.bf16.mxu1 %v6326_v2 }
 0x2f2   :  { %1418 = vmatpush1.bf16.msra.mxu0 %v5661_v46 }
 0x2f3   :  { %1419 = vmatprep.subr.bf16.mxu0 %v5669_v49  ;;  %v6844_v49 = vsub.s32 1, %v6745_v37 }
 0x2f4   :  { %5333 = vmatpush3.bf16.msra.mxu1 %v5659_v44 }
 0x2f5   :  { %5334 = vmatprep.subr.bf16.mxu1 %v6326_v2 }
 0x2f6   :  { %1420 = vmatpush1.bf16.msra.mxu0 %v5667_v50 }
 0x2f7   :  { %1421 = vmatprep.subr.bf16.mxu0 %v5675_v51  ;;  %v1247_v51 = vsub.s32 2, %v6745_v37 }
 0x2f8   :  { %5335 = vmatpush3.bf16.msra.mxu1 %v5660_v45 }
 0x2f9   :  { %1460 = vmatprep.subr.bf16.mxu1 %v5666_v48 }
 0x2fa   :  { %1422 = vmatpush1.bf16.msra.mxu0 %v5673_v52 }
 0x2fb   :  { %1423 = vmatprep.subr.bf16.mxu0 %v5681_v53 }
 0x2fe   :  { %1424 = vmatpush1.bf16.msra.mxu0 %v5679_v54 }
 0x2ff   :  { %1425 = vmatprep.subr.bf16.mxu0 %v5687_v55 }
 0x302   :  { %1426 = vmatpush1.bf16.msra.mxu0 %v5685_v56 }
 0x303   :  { %1427 = vmatprep.subr.bf16.mxu0 %v5693_v57 }
 0x306   :  { %1428 = vmatpush1.bf16.msra.mxu0 %v5691_v58  ;;  %v1251_v58 = vsub.s32 3, %v6745_v37 }
 0x307   :  { %1429 = vmatprep.subr.bf16.mxu0 %v5699_v22 }
 0x30a   :  { %1430 = vmatpush1.bf16.msra.mxu0 %v5697_v24 }
 0x30b   :  { %1431 = vmatprep.subr.bf16.mxu0 %v5705_v26 }
 0x30e   :  { %1432 = vmatpush1.bf16.msra.mxu0 %v5703_v28 }
 0x30f   :  { %5340 = vmatprep.subr.bf16.mxu0 %v6326_v2 }
 0x3ae   :  { %v1044_v18 = vpop.f32.mrb[8].mxu1 }
 0x3af   :  { %v5318_v19 = vpop.f32.mrb[9].mxu1  ;;  %v1165_v30 = vrot.slane %v1044_v18, %v6750_v38 }
 0x3b0   :  { %v1047_v20 = vpop.f32.mrb[10].mxu1 }
 0x3b1   :  { %v5319_v21 = vpop.f32.mrb[11].mxu1  ;;  %v1166_v31 = vcombine.high %v1165_v30, %v1165_v30  ;;  %v1173_v32 = vrot.slane %v1165_v30, %v6750_v38 }
 0x3b3   :  { %v1180_v34 = vrot.slane %v1166_v31, %v6750_v38  ;;  %v1184_v35 = vrot.slane %v1173_v32, %v6825_v33  ;;  %v1235_v38 = vld [vmem:[%s7403_s15] ss:$2 sm:$0xf] }
 0x3b4   :  { %v1240_v50 = vrot.slane %v1235_v38, %v6825_v33  ;;  %v1244_v52 = vrot.slane %v1235_v38, %v6844_v49 }
 0x3b5   :  { %v1188_v41 = vrot.slane %v1180_v34, %v6825_v33 }
 0x3c3   :  { %v790_v62 = vpop.f32.mrb[12].mxu0 }
 0x3c4   :  { %v5278_v63 = vpop.f32.mrb[13].mxu0  ;;  %v5573_v3 = vadd.f32 %v5572_v61, %v790_v62  ;;  %v1248_v62 = vrot.slane %v1235_v38, %v1247_v51 }
 0x3c5   :  { %v793_v1 = vpop.f32.mrb[14].mxu0 }
 0x3c6   :  { %v5575_v4 = vadd.f32 %v5572_v61, %v793_v1  ;;  %v5279_v5 = vpop.f32.mrb[15].mxu0 }
 0x3c8   :  { %v1052_v7 = vpack.c.bf16 %v5575_v4, %v5573_v3 }
 0x3ca   :  { %5337 = vmatmul.mubr.bf16.vlgmr.msra.gmra.mrb[12].mxu1 %v1052_v7 }
 0x3cb   :  { %1461 = vmatpush1.bf16.msra.mxu1 %v5664_v6  ;;  %1492 = vmatprep.mubr.bf16.mxu1 %v6324_v0 }
 0x3cc   :  { %1462 = vmatprep.subr.bf16.mxu1 %v5672_v8 }
 0x3cf   :  { %1463 = vmatpush1.bf16.msra.mxu1 %v5670_v9  ;;  %v1252_v9 = vrot.slane %v1235_v38, %v1251_v58 }
 0x3d0   :  { %1464 = vmatprep.subr.bf16.mxu1 %v5678_v10 }
 0x3d3   :  { %1465 = vmatpush1.bf16.msra.mxu1 %v5676_v11 }
 0x3d4   :  { %1466 = vmatprep.subr.bf16.mxu1 %v5684_v12 }
 0x3d7   :  { %1467 = vmatpush1.bf16.msra.mxu1 %v5682_v13 }
 0x3d8   :  { %1468 = vmatprep.subr.bf16.mxu1 %v5690_v14 }
 0x3db   :  { %1469 = vmatpush1.bf16.msra.mxu1 %v5688_v15 }
 0x3dc   :  { %1470 = vmatprep.subr.bf16.mxu1 %v5696_v16 }
 0x3df   :  { %1471 = vmatpush1.bf16.msra.mxu1 %v5694_v17 }
 0x3e0   :  { %1472 = vmatprep.subr.bf16.mxu1 %v5702_v23 }
 0x3e3   :  { %1473 = vmatpush1.bf16.msra.mxu1 %v5700_v25 }
 0x3e4   :  { %1474 = vmatprep.subr.bf16.mxu1 %v5708_v27 }
 0x3e7   :  { %1475 = vmatpush1.bf16.msra.mxu1 %v5706_v29 }
 0x3e8   :  { %5364 = vmatprep.subr.bf16.mxu1 %v6326_v2 }
 0x49d   :  { %v1151_v36 = vpop.f32.mrb[12].mxu1 }
 0x49e   :  { %v1191_v39 = vadd.f32 %v1184_v35, %v1151_v36  ;;  %v5338_v40 = vpop.f32.mrb[13].mxu1 }
 0x49f   :  { %v1154_v43 = vpop.f32.mrb[14].mxu1 }
 0x4a0   :  { %v1192_v44 = vadd.f32 %v1188_v41, %v1154_v43  ;;  %v5339_v45 = vpop.f32.mrb[15].mxu1  ;;  %v6830_v46 = vadd.f32 %v4804_v42, %v1191_v39 }
 0x4a2   :  { %v6832_v47 = vadd.f32 %v4804_v42, %v1192_v44 }
 0x4a4   :  { %v1202_v48 = vpack.c.bf16 %v6832_v47, %v6830_v46 }
 0x4a6   :  { %1450 = vmatmul.mubr.bf16.vlgmr.msra.gmra.mrb[16].mxu0 %v1202_v48  ;;  %1493 = vmatmul.mubr.bf16.vlgmr.msra.gmra.mrb[16].mxu1 %v1202_v48 }
 0x4a7   :  { %5342 = vmatprep.mubr.msk.bf16.mxu0 %vm6327_vm0, %v6326_v2  ;;  %5366 = vmatprep.mubr.msk.bf16.mxu1 %vm6327_vm0, %v6326_v2 }
 0x579   :  { %v1451_v53 = vpop.f32.mrb[16].mxu0  ;;  %v1494_v54 = vpop.f32.mrb[16].mxu1 }
 0x57a   :  { %v1452_v55 = vadd.f32 %v1451_v53, %v1240_v50  ;;  %v1453_v56 = vpop.f32.mrb[17].mxu0  ;;  %v1496_v57 = vpop.f32.mrb[17].mxu1  ;;  %v1495_v7 = vadd.f32 %v1494_v54, %v1248_v62 }
 0x57b   :  { %v1455_v59 = vpop.f32.mrb[18].mxu0  ;;  %v1498_v60 = vpop.f32.mrb[18].mxu1  ;;  %v1454_v63 = vadd.f32 %v1453_v56, %v1244_v52  ;;  %v1497_v13 = vadd.f32 %v1496_v57, %v1252_v9 }
 0x57c   :  { %v6850_v61 = vpack.c.bf16 %v1452_v55, %v1452_v55  ;;  %v1456_v1 = vadd.f32 %v1455_v59, %v1240_v50  ;;  %v1457_v3 = vpop.f32.mrb[19].mxu0  ;;  %v1500_v4 = vpop.f32.mrb[19].mxu1  ;;  %v1499_v10 = vadd.f32 %v1498_v60, %v1248_v62  ;;  %v6868_v12 = vpack.c.bf16 %v1495_v7, %v1495_v7 }
 0x57d   :  { %v1458_v6 = vadd.f32 %v1457_v3, %v1244_v52  ;;  %v6858_v8 = vpack.c.bf16 %v1454_v63, %v1454_v63  ;;  %v1501_v15 = vadd.f32 %v1500_v4, %v1252_v9  ;;  %v6876_v16 = vpack.c.bf16 %v1497_v13, %v1497_v13 }
 0x57e   :  { %v6854_v5 = vpack.c.bf16 %v1456_v1, %v1456_v1  ;;  %1527 = vrot.lane.b32.xlu0 %v6850_v61, %s6330_s0  ;;  %v6872_v14 = vpack.c.bf16 %v1499_v10, %v1499_v10 }
 0x57f   :  { %v6864_v11 = vpack.c.bf16 %v1458_v6, %v1458_v6  ;;  %v6880_v17 = vpack.c.bf16 %v1501_v15, %v1501_v15 }
 0x580   :  { %1576 = vrot.lane.b32.xlu1 %v6854_v5, %s6330_s0 }
 0x582   :  { %1624 = vrot.lane.b32.xlu0 %v6858_v8, %s6330_s0 }
 0x584   :  { %1672 = vrot.lane.b32.xlu1 %v6864_v11, %s6330_s0 }
 0x586   :  { %1720 = vrot.lane.b32.xlu0 %v6868_v12, %s6330_s0 }
 0x588   :  { %1768 = vrot.lane.b32.xlu1 %v6872_v14, %s6330_s0 }
 0x58a   :  { %1816 = vrot.lane.b32.xlu0 %v6876_v16, %s6330_s0 }
 0x58c   :  { %1864 = vrot.lane.b32.xlu1 %v6880_v17, %s6330_s0 }
 0x5f0   :  { %v1528_v18 = vpop.permute.xlu0 %1527 }
 0x5f1   :  { %v1534_v19 = vsel %vm1529_vm10, %v1528_v18, 0 }
 0x5f2   :  { %5341 = vmatpush3.bf16.xpose.msra.mxu0 %v1534_v19  ;;  %v1577_v21 = vpop.permute.xlu1 %1576 }
 0x5f3   :  { %5346 = vmatprep.subr.bf16.mxu0 %v6326_v2  ;;  %v1582_v23 = vsel %vm1529_vm10, %v1577_v21, 0 }
 0x5f4   :  { %v1625_v20 = vpop.permute.xlu0 %1624 }
 0x5f5   :  { %v1630_v26 = vsel %vm1529_vm10, %v1625_v20, 0 }
 0x5f6   :  { %v1673_v28 = vpop.permute.xlu1 %1672 }
 0x5f7   :  { %v1678_v29 = vsel %vm1529_vm10, %v1673_v28, 0 }
 0x5f8   :  { %v1721_v22 = vpop.permute.xlu0 %1720 }
 0x5f9   :  { %v1726_v24 = vsel %vm1529_vm10, %v1721_v22, 0  ;;  %5343 = vmatmul.mubr.msk.bf16.vlgmr.msra.gmra.mrb[20].mxu0 %vm1529_vm10, %v6850_v61 }
 0x5fa   :  { %5347 = vmatpush3.bf16.xpose.msra.mxu0 %v1582_v23  ;;  %5365 = vmatpush3.bf16.xpose.msra.mxu1 %v1726_v24  ;;  %v1769_v30 = vpop.permute.xlu1 %1768 }
 0x5fb   :  { %5348 = vmatprep.mubr.msk.bf16.mxu0 %vm6327_vm0, %v6326_v2  ;;  %5352 = vmatprep.subr.bf16.mxu0 %v6326_v2  ;;  %v1774_v31 = vsel %vm1529_vm10, %v1769_v30, 0 }
 0x5fc   :  { %5376 = vmatprep.subr.bf16.mxu1 %v6326_v2  ;;  %v1817_v25 = vpop.permute.xlu0 %1816 }
 0x5fd   :  { %v1822_v27 = vsel %vm1529_vm10, %v1817_v25, 0 }
 0x5fe   :  { %v1865_v32 = vpop.permute.xlu1 %1864 }
 0x5ff   :  { %v1870_v34 = vsel %vm1529_vm10, %v1865_v32, 0 }
 0x601   :  { %5349 = vmatmul.mubr.msk.bf16.vlgmr.msra.gmra.mrb[24].mxu0 %vm1529_vm10, %v6854_v5  ;;  %5367 = vmatmul.mubr.msk.bf16.vlgmr.msra.gmra.mrb[20].mxu1 %vm1529_vm10, %v6868_v12 }
 0x602   :  { %5353 = vmatpush3.bf16.xpose.msra.mxu0 %v1630_v26  ;;  %5377 = vmatpush3.bf16.xpose.msra.mxu1 %v1822_v27 }
 0x603   :  { %5354 = vmatprep.mubr.msk.bf16.mxu0 %vm6327_vm0, %v6326_v2  ;;  %5378 = vmatprep.mubr.msk.bf16.mxu1 %vm6327_vm0, %v6326_v2 }
 0x604   :  { %5358 = vmatprep.subr.bf16.mxu0 %v6326_v2  ;;  %5388 = vmatprep.subr.bf16.mxu1 %v6326_v2 }
 0x609   :  { %5355 = vmatmul.mubr.msk.bf16.vlgmr.msra.gmra.mrb[28].mxu0 %vm1529_vm10, %v6858_v8  ;;  %5379 = vmatmul.mubr.msk.bf16.vlgmr.msra.gmra.mrb[24].mxu1 %vm1529_vm10, %v6876_v16 }
 0x60a   :  { %5359 = vmatpush3.bf16.xpose.msra.mxu0 %v1678_v29  ;;  %5360 = vmatprep.mubr.msk.bf16.mxu0 %vm6327_vm0, %v6326_v2 }
 0x60b   :  { %5370 = vmatprep.subr.bf16.mxu0 %v6326_v2  ;;  %5390 = vmatprep.mubr.msk.bf16.mxu1 %vm6327_vm0, %v6326_v2 }
 0x611   :  { %5361 = vmatmul.mubr.msk.bf16.vlgmr.msra.gmra.mrb[32].mxu0 %vm1529_vm10, %v6864_v11 }
 0x612   :  { %5371 = vmatpush3.bf16.xpose.msra.mxu0 %v1774_v31  ;;  %5372 = vmatprep.mubr.msk.bf16.mxu0 %vm6327_vm0, %v6326_v2 }
 0x613   :  { %5382 = vmatprep.subr.bf16.mxu0 %v6326_v2 }
 0x619   :  { %5373 = vmatmul.mubr.msk.bf16.vlgmr.msra.gmra.mrb[36].mxu0 %vm1529_vm10, %v6872_v14 }
 0x61a   :  { %5383 = vmatpush3.bf16.xpose.msra.mxu0 %v1870_v34  ;;  %5384 = vmatprep.mubr.msk.bf16.mxu0 %vm6327_vm0, %v6326_v2 }
 0x61b   :  { %5394 = vmatprep.subr.bf16.mxu0 %v6326_v2 }
 0x621   :  { %5385 = vmatmul.mubr.msk.bf16.vlgmr.msra.gmra.mrb[40].mxu0 %vm1529_vm10, %v6880_v17 }
 0x622   :  { %5396 = vmatprep.mubr.msk.bf16.mxu0 %vm6327_vm0, %v6326_v2 }
 0x6cc   :  { %v1570_v35 = vpop.f32.mrb[20].mxu0 }
 0x6cd   :  { %v5344_v36 = vpop.f32.mrb[21].mxu0  ;;  %v1913_v39 = vsel %vm1912_vm11, %v1570_v35, -inf }
 0x6ce   :  { %1914 = vmax.xlane.f32.xlu0 %v1913_v39  ;;  %v1573_v40 = vpop.f32.mrb[22].mxu0 }
 0x6cf   :  { %v5345_v41 = vpop.f32.mrb[23].mxu0 }
 0x6d4   :  { %v1618_v42 = vpop.f32.mrb[24].mxu0  ;;  %v1762_v43 = vpop.f32.mrb[20].mxu1 }
 0x6d5   :  { %v5350_v44 = vpop.f32.mrb[25].mxu0  ;;  %v5368_v45 = vpop.f32.mrb[21].mxu1  ;;  %v1925_v48 = vsel %vm1912_vm11, %v1762_v43, -inf  ;;  %v1916_v54 = vsel %vm1912_vm11, %v1618_v42, -inf }
 0x6d6   :  { %v1621_v38 = vpop.f32.mrb[26].mxu0  ;;  %1926 = vmax.xlane.f32.xlu1 %v1925_v48  ;;  %v1765_v50 = vpop.f32.mrb[22].mxu1 }
 0x6d7   :  { %v5351_v52 = vpop.f32.mrb[27].mxu0  ;;  %v5369_v53 = vpop.f32.mrb[23].mxu1 }
 0x6da   :  { %1917 = vmax.xlane.f32.xlu1 %v1916_v54 }
 0x6dc   :  { %v6937_v55 = vpop.f32.mrb[28].mxu0  ;;  %v6939_v56 = vpop.f32.mrb[24].mxu1 }
 0x6dd   :  { %v5356_v57 = vpop.f32.mrb[29].mxu0  ;;  %v5380_v59 = vpop.f32.mrb[25].mxu1  ;;  %v1919_v60 = vsel %vm1912_vm11, %v6937_v55, -inf }
 0x6de   :  { %1920 = vmax.xlane.f32.xlu0 %v1919_v60  ;;  %v1669_v62 = vpop.f32.mrb[30].mxu0  ;;  %v1861_v63 = vpop.f32.mrb[26].mxu1 }
 0x6df   :  { %v5357_v1 = vpop.f32.mrb[31].mxu0  ;;  %v5381_v3 = vpop.f32.mrb[27].mxu1 }
 0x6e4   :  { %v1714_v4 = vpop.f32.mrb[32].mxu0 }
 0x6e5   :  { %v5362_v6 = vpop.f32.mrb[33].mxu0  ;;  %v1922_v7 = vsel %vm1912_vm11, %v1714_v4, -inf }
 0x6e6   :  { %1923 = vmax.xlane.f32.xlu0 %v1922_v7  ;;  %v1717_v9 = vpop.f32.mrb[34].mxu0 }
 0x6e7   :  { %v5363_v10 = vpop.f32.mrb[35].mxu0 }
 0x6eb   :  { %2009 = vrot.lane.b32.xlu1 %v6850_v61, %s6305_s6  ;;  %v1931_v61 = vsel %vm1912_vm11, %v6939_v56, -inf }
 0x6ec   :  { %v6946_v13 = vpop.f32.mrb[36].mxu0 }
 0x6ed   :  { %v5374_v15 = vpop.f32.mrb[37].mxu0  ;;  %v1928_v18 = vsel %vm1912_vm11, %v6946_v13, -inf }
 0x6ee   :  { %1929 = vmax.xlane.f32.xlu0 %v1928_v18  ;;  %v1813_v19 = vpop.f32.mrb[38].mxu0 }
 0x6ef   :  { %v5375_v20 = vpop.f32.mrb[39].mxu0 }
 0x6f4   :  { %v6950_v21 = vpop.f32.mrb[40].mxu0 }
 0x6f5   :  { %v5386_v22 = vpop.f32.mrb[41].mxu0  ;;  %v1934_v23 = vsel %vm1912_vm11, %v6950_v21, -inf }
 0x6f6   :  { %1935 = vmax.xlane.f32.xlu0 %v1934_v23  ;;  %v1909_v24 = vpop.f32.mrb[42].mxu0 }
 0x6f7   :  { %v5387_v25 = vpop.f32.mrb[43].mxu0 }
 0x70c   :  { %2058 = vrot.lane.b32.xlu0 %v6854_v5, %s6305_s6 }
 0x70f   :  { %1932 = vmax.xlane.f32.xlu1 %v1931_v61 }
 0x720   :  { %2106 = vrot.lane.b32.xlu1 %v6858_v8, %s6305_s6 }
 0x724   :  { %2154 = vrot.lane.b32.xlu1 %v6864_v11, %s6305_s6 }
 0x75b   :  { %v1915_v26 = vpop.xlane.xlu0 %1914 }
 0x75c   :  { %v1937_v27 = vsub.f32 %v1570_v35, %v1915_v26 }
 0x75e   :  { %v1945_v28 = vmul.f32 1.442695, %v1937_v27 }
 0x760   :  { %5853 = vpow2.f32 %v1945_v28 }
 0x763   :  { %v1927_v29 = vpop.xlane.xlu1 %1926 }
 0x764   :  { %v1941_v30 = vsub.f32 %v1762_v43, %v1927_v29 }
 0x766   :  { %v1953_v31 = vmul.f32 1.442695, %v1941_v30 }
 0x767   :  { %v1918_v32 = vpop.xlane.xlu1 %1917 }
 0x768   :  { %5855 = vpow2.f32 %v1953_v31  ;;  %v1938_v5 = vsub.f32 %v1618_v42, %v1918_v32 }
 0x76a   :  { %v6962_v34 = vpop.eup %5853  ;;  %v1947_v36 = vmul.f32 1.442695, %v1938_v5 }
 0x76b   :  { %v2010_v39 = vpop.permute.xlu1 %2009  ;;  %v1961_v8 = vsel %vm1912_vm11, %v6962_v34, 0.0  ;;  %v1921_v35 = vpop.xlane.xlu0 %1920 }
 0x76c   :  { %5857 = vpow2.f32 %v1947_v36  ;;  %v2016_v11 = vsel %vm2014_vm12, %v2010_v39, 0  ;;  %1962 = vadd.xlane.f32.xlu1 %v1961_v8  ;;  %v1939_v59 = vsub.f32 %v6937_v55, %v1921_v35 }
 0x76d   :  { %5389 = vmatpush3.bf16.msra.mxu1 %v2016_v11 }
 0x76e   :  { %5400 = vmatprep.subr.bf16.mxu1 %v6326_v2  ;;  %v1949_v63 = vmul.f32 1.442695, %v1939_v59 }
 0x772   :  { %v6968_v40 = vpop.eup %5855 }
 0x773   :  { %v1924_v41 = vpop.xlane.xlu0 %1923  ;;  %v1973_v42 = vsel %vm1912_vm11, %v6968_v40, 0.0 }
 0x774   :  { %v1940_v43 = vsub.f32 %v1714_v4, %v1924_v41  ;;  %1974 = vadd.xlane.f32.xlu1 %v1973_v42 }
 0x776   :  { %v5858_v44 = vpop.eup %5857  ;;  %v1951_v45 = vmul.f32 1.442695, %v1940_v43 }
 0x777   :  { %v1964_v48 = vsel %vm1912_vm11, %v5858_v44, 0.0 }
 0x778   :  { %5859 = vpow2.f32 %v1951_v45  ;;  %1965 = vadd.xlane.f32.xlu0 %v1964_v48 }
 0x77b   :  { %v1930_v38 = vpop.xlane.xlu0 %1929 }
 0x77c   :  { %v1942_v3 = vsub.f32 %v6946_v13, %v1930_v38 }
 0x77e   :  { %v1955_v4 = vmul.f32 1.442695, %v1942_v3 }
 0x782   :  { %v5860_v50 = vpop.eup %5859 }
 0x783   :  { %v1936_v52 = vpop.xlane.xlu0 %1935  ;;  %v1970_v53 = vsel %vm1912_vm11, %v5860_v50, 0.0 }
 0x784   :  { %1971 = vadd.xlane.f32.xlu0 %v1970_v53  ;;  %v1944_v6 = vsub.f32 %v6950_v21, %v1936_v52 }
 0x786   :  { %v1959_v9 = vmul.f32 1.442695, %v1944_v6 }
 0x787   :  { %v2059_v54 = vpop.permute.xlu0 %2058 }
 0x788   :  { %v2064_v57 = vsel %vm2014_vm12, %v2059_v54, 0 }
 0x789   :  { %5395 = vmatpush3.bf16.msra.mxu0 %v2064_v57 }
 0x78a   :  { %5406 = vmatprep.subr.bf16.mxu0 %v6326_v2 }
 0x79a   :  { %2202 = vrot.lane.b32.xlu0 %v6868_v12, %s6305_s6 }
 0x79c   :  { %v1933_v60 = vpop.xlane.xlu1 %1932 }
 0x79d   :  { %v1943_v62 = vsub.f32 %v6939_v56, %v1933_v60 }
 0x79f   :  { %v1957_v1 = vmul.f32 1.442695, %v1943_v62 }
 0x7a0   :  { %v2107_v19 = vpop.permute.xlu1 %2106 }
 0x7a1   :  { %5861 = vpow2.f32 %v1957_v1  ;;  %v2112_v61 = vsel %vm2014_vm12, %v2107_v19, 0 }
 0x7a2   :  { %5863 = vpow2.f32 %v1949_v63 }
 0x7a3   :  { %5865 = vpow2.f32 %v1955_v4 }
 0x7a4   :  { %5867 = vpow2.f32 %v1959_v9  ;;  %v2155_v20 = vpop.permute.xlu1 %2154 }
 0x7a5   :  { %v2160_v27 = vsel %vm2014_vm12, %v2155_v20, 0 }
 0x7ab   :  { %v6982_v7 = vpop.eup %5861 }
 0x7ac   :  { %v1979_v12 = vsel %vm1912_vm11, %v6982_v7, 0.0  ;;  %v5864_v55 = vpop.eup %5863 }
 0x7ad   :  { %1980 = vadd.xlane.f32.xlu1 %v1979_v12  ;;  %v1967_v56 = vsel %vm1912_vm11, %v5864_v55, 0.0  ;;  %v6987_v10 = vpop.eup %5865 }
 0x7ae   :  { %v1976_v13 = vsel %vm1912_vm11, %v6987_v10, 0.0  ;;  %v6991_v15 = vpop.eup %5867 }
 0x7af   :  { %v1982_v18 = vsel %vm1912_vm11, %v6991_v15, 0.0 }
 0x7b1   :  { %1968 = vadd.xlane.f32.xlu1 %v1967_v56 }
 0x7b9   :  { %1977 = vadd.xlane.f32.xlu0 %v1976_v13 }
 0x7bd   :  { %1983 = vadd.xlane.f32.xlu0 %v1982_v18  ;;  %v5711_v18 = vld [vmem:[#allocation22 + $0x10] sm:$0xff]  }
 0x7c2   :  { %2250 = vrot.lane.b32.xlu1 %v6872_v14, %s6305_s6 }
 0x7c6   :  { %2346 = vrot.lane.b32.xlu1 %v6880_v17, %s6305_s6 }
 0x7d3   :  { %2298 = vrot.lane.b32.xlu0 %v6876_v16, %s6305_s6 }
 0x7f9   :  { %v1963_v21 = vpop.xlane.xlu1 %1962 }
 0x7fa   :  { %5869 = vrcp.f32 %v1963_v21 }
 0x801   :  { %v1975_v31 = vpop.xlane.xlu1 %1974 }
 0x804   :  { %v5870_v22 = vpop.eup %5869 }
 0x805   :  { %v1993_v23 = vmul.f32 %v5870_v22, %v6962_v34  ;;  %v1966_v24 = vpop.xlane.xlu0 %1965 }
 0x806   :  { %5871 = vrcp.f32 %v1966_v24  ;;  %v5712_v24 = vld [vmem:[#allocation22 + $0x18] sm:$0xff]  }
 0x807   :  { %v2001_v25 = vpack.c.bf16 %v1993_v23, %v1993_v23 }
 0x809   :  { %5391 = vmatmul.mubr.msk.bf16.vlgmr.msra.gmra.mrb[28].mxu1 %vm1912_vm11, %v2001_v25  ;;  %v5713_v25 = vld [vmem:[#allocation22 + $0x20] sm:$0xff]  }
 0x80a   :  { %5401 = vmatpush3.bf16.msra.mxu1 %v2112_v61  ;;  %5402 = vmatprep.mubr.msk.bf16.mxu1 %vm6327_vm0, %v6326_v2  ;;  %v5714_v61 = vld [vmem:[#allocation22 + $0x28] sm:$0xff]  }
 0x80b   :  { %5412 = vmatprep.subr.bf16.mxu1 %v6326_v2 }
 0x810   :  { %v5872_v14 = vpop.eup %5871 }
 0x811   :  { %v1994_v16 = vmul.f32 %v5872_v14, %v5858_v44  ;;  %v1972_v17 = vpop.xlane.xlu0 %1971  ;;  %v5715_v14 = vld [vmem:[#allocation22 + $0x30] sm:$0xff]  }
 0x812   :  { %5873 = vrcp.f32 %v1972_v17 }
 0x813   :  { %v2002_v26 = vpack.c.bf16 %v1994_v16, %v1994_v16 }
 0x815   :  { %5397 = vmatmul.mubr.msk.bf16.vlgmr.msra.gmra.mrb[44].mxu0 %vm1912_vm11, %v2002_v26  ;;  %v2203_v34 = vpop.permute.xlu0 %2202 }
 0x816   :  { %5407 = vmatpush3.bf16.msra.mxu0 %v2160_v27  ;;  %5408 = vmatprep.mubr.msk.bf16.mxu0 %vm6327_vm0, %v6326_v2  ;;  %v2208_v44 = vsel %vm2014_vm12, %v2203_v34, 0 }
 0x817   :  { %5418 = vmatprep.subr.bf16.mxu0 %v6326_v2 }
 0x81c   :  { %v5874_v28 = vpop.eup %5873 }
 0x81d   :  { %v1996_v29 = vmul.f32 %v5874_v28, %v5860_v50 }
 0x81f   :  { %v2004_v30 = vpack.c.bf16 %v1996_v29, %v1996_v29  ;;  %v5716_v29 = vld [vmem:[#allocation22 + $0x38] sm:$0xff]  }
 0x821   :  { %5409 = vmatmul.mubr.msk.bf16.vlgmr.msra.gmra.mrb[48].mxu0 %vm1912_vm11, %v2004_v30 }
 0x822   :  { %5420 = vmatprep.mubr.msk.bf16.mxu0 %vm6327_vm0, %v6326_v2 }
 0x83a   :  { %v1981_v32 = vpop.xlane.xlu1 %1980 }
 0x83e   :  { %v1969_v5 = vpop.xlane.xlu1 %1968 }
 0x83f   :  { %5875 = vrcp.f32 %v1969_v5 }
 0x840   :  { %5877 = vrcp.f32 %v1975_v31 }
 0x842   :  { %v2251_v36 = vpop.permute.xlu1 %2250 }
 0x843   :  { %v2256_v39 = vsel %vm2014_vm12, %v2251_v36, 0 }
 0x844   :  { %5419 = vmatpush3.bf16.msra.mxu0 %v2256_v39 }
 0x845   :  { %5430 = vmatprep.subr.bf16.mxu0 %v6326_v2 }
 0x846   :  { %v1978_v8 = vpop.xlane.xlu0 %1977  ;;  %v2347_v50 = vpop.permute.xlu1 %2346 }
 0x847   :  { %5879 = vrcp.f32 %v1978_v8  ;;  %v2352_v60 = vsel %vm2014_vm12, %v2347_v50, 0 }
 0x848   :  { %5881 = vrcp.f32 %v1981_v32 }
 0x849   :  { %v5876_v11 = vpop.eup %5875 }
 0x84a   :  { %v1995_v35 = vmul.f32 %v5876_v11, %v5864_v55  ;;  %v1984_v41 = vpop.xlane.xlu0 %1983  ;;  %v5878_v43 = vpop.eup %5877 }
 0x84b   :  { %5883 = vrcp.f32 %v1984_v41  ;;  %v1997_v45 = vmul.f32 %v5878_v43, %v6968_v40 }
 0x84c   :  { %v2003_v42 = vpack.c.bf16 %v1995_v35, %v1995_v35 }
 0x84d   :  { %v2005_v54 = vpack.c.bf16 %v1997_v45, %v1997_v45 }
 0x84e   :  { %5403 = vmatmul.mubr.msk.bf16.vlgmr.msra.gmra.mrb[32].mxu1 %vm1912_vm11, %v2003_v42  ;;  %v2299_v52 = vpop.permute.xlu0 %2298 }
 0x84f   :  { %5413 = vmatpush3.bf16.msra.mxu1 %v2208_v44  ;;  %5414 = vmatprep.mubr.msk.bf16.mxu1 %vm6327_vm0, %v6326_v2  ;;  %v2304_v62 = vsel %vm2014_vm12, %v2299_v52, 0 }
 0x850   :  { %5424 = vmatprep.subr.bf16.mxu1 %v6326_v2 }
 0x851   :  { %v5880_v48 = vpop.eup %5879 }
 0x852   :  { %v1998_v38 = vmul.f32 %v5880_v48, %v6987_v10  ;;  %v5882_v53 = vpop.eup %5881  ;;  %v5709_v10 = vld [vmem:[#allocation22] sm:$0xff]  }
 0x853   :  { %v1999_v40 = vmul.f32 %v5882_v53, %v6982_v7 }
 0x854   :  { %v2006_v57 = vpack.c.bf16 %v1998_v38, %v1998_v38 }
 0x855   :  { %v5884_v59 = vpop.eup %5883  ;;  %v2007_v1 = vpack.c.bf16 %v1999_v40, %v1999_v40 }
 0x856   :  { %5415 = vmatmul.mubr.msk.bf16.vlgmr.msra.gmra.mrb[36].mxu1 %vm1912_vm11, %v2005_v54  ;;  %5421 = vmatmul.mubr.msk.bf16.vlgmr.msra.gmra.mrb[52].mxu0 %vm1912_vm11, %v2006_v57  ;;  %v2000_v63 = vmul.f32 %v5884_v59, %v6991_v15  ;;  %v5710_v15 = vld [vmem:[#allocation22 + $0x8] sm:$0xff]  }
 0x857   :  { %5425 = vmatpush3.bf16.msra.mxu1 %v2304_v62  ;;  %5431 = vmatpush3.bf16.msra.mxu0 %v2352_v60 }
 0x858   :  { %5426 = vmatprep.mubr.msk.bf16.mxu1 %vm6327_vm0, %v6326_v2  ;;  %5432 = vmatprep.mubr.msk.bf16.mxu0 %vm6327_vm0, %v6326_v2  ;;  %v2008_v3 = vpack.c.bf16 %v2000_v63, %v2000_v63 }
 0x859   :  { %5436 = vmatprep.subr.bf16.mxu1 %v6326_v2 }
 0x85e   :  { %5427 = vmatmul.mubr.msk.bf16.vlgmr.msra.gmra.mrb[40].mxu1 %vm1912_vm11, %v2007_v1  ;;  %5433 = vmatmul.mubr.msk.bf16.vlgmr.msra.gmra.mrb[56].mxu0 %vm1912_vm11, %v2008_v3 }
 0x85f   :  { %5452 = vmatprep.mubr.msk.bf16.mxu1 %vm6327_vm0, %v6326_v2  ;;  %2732 = vmatprep.mubr.bf16.mxu0 %v6324_v0 }
 0x860   :  { %5437 = vmatpush3.bf16.msra.mxu1 %v5709_v10 }
 0x861   :  { %5438 = vmatprep.subr.bf16.mxu1 %v6326_v2 }
 0x864   :  { %5439 = vmatpush3.bf16.msra.mxu1 %v5710_v15 }
 0x865   :  { %5440 = vmatprep.subr.bf16.mxu1 %v6326_v2 }
 0x868   :  { %5441 = vmatpush3.bf16.msra.mxu1 %v5711_v18 }
 0x869   :  { %5442 = vmatprep.subr.bf16.mxu1 %v6326_v2 }
 0x86c   :  { %5443 = vmatpush3.bf16.msra.mxu1 %v5712_v24  ;;  %v5719_v24 = vld [vmem:[#allocation23 + $0x4] ss:$8 sps:$4 sm:$0xff]  }
 0x86d   :  { %5444 = vmatprep.subr.bf16.mxu1 %v6326_v2  ;;  %2700 = vmatprep.subr.bf16.mxu0 %v5719_v24 }
 0x870   :  { %5445 = vmatpush3.bf16.msra.mxu1 %v5713_v25  ;;  %v5722_v25 = vld [vmem:[#allocation23 + $0x14] ss:$8 sps:$4 sm:$0xff]  }
 0x871   :  { %5446 = vmatprep.subr.bf16.mxu1 %v6326_v2 }
 0x874   :  { %5447 = vmatpush3.bf16.msra.mxu1 %v5714_v61  ;;  %v5720_v61 = vld [vmem:[#allocation23 + $0x10] ss:$8 sps:$4 sm:$0xff]  }
 0x875   :  { %5448 = vmatprep.subr.bf16.mxu1 %v6326_v2 }
 0x878   :  { %5449 = vmatpush3.bf16.msra.mxu1 %v5715_v14 }
 0x879   :  { %5450 = vmatprep.subr.bf16.mxu1 %v6326_v2 }
 0x87c   :  { %5451 = vmatpush3.bf16.msra.mxu1 %v5716_v29  ;;  %v5725_v29 = vld [vmem:[#allocation23 + $0x24] ss:$8 sps:$4 sm:$0xff]  }
 0x8dc   :  { %v7040_v4 = vpop.f32.mrb[28].mxu1 }
 0x8dd   :  { %v5392_v6 = vpop.f32.mrb[29].mxu1  ;;  %v2394_v62 = vpack.c.bf16 %v7040_v4, %v7040_v4 }
 0x8de   :  { %v2055_v7 = vpop.f32.mrb[30].mxu1 }
 0x8df   :  { %v5393_v9 = vpop.f32.mrb[31].mxu1 }
 0x8e8   :  { %v7042_v12 = vpop.f32.mrb[44].mxu0 }
 0x8e9   :  { %v5398_v55 = vpop.f32.mrb[45].mxu0  ;;  %v2395_v40 = vpack.c.bf16 %v7042_v12, %v7042_v12  ;;  %v4861_v12 = vld [vmem:[%s7405_s17] ss:$0 sm:$0xff] }
 0x8ea   :  { %v2103_v56 = vpop.f32.mrb[46].mxu0 }
 0x8eb   :  { %v5399_v13 = vpop.f32.mrb[47].mxu0 }
 0x8f4   :  { %v2196_v19 = vpop.f32.mrb[48].mxu0 }
 0x8f5   :  { %v2397_v20 = vpack.c.bf16 %v2196_v19, %v2196_v19  ;;  %v5410_v21 = vpop.f32.mrb[49].mxu0 }
 0x8f6   :  { %v2199_v22 = vpop.f32.mrb[50].mxu0 }
 0x8f7   :  { %2406 = vrot.lane.b32.xlu1 %v2397_v20, %s6331_s21  ;;  %v5411_v23 = vpop.f32.mrb[51].mxu0 }
 0x8f8   :  { %v5717_v23 = vld [vmem:[#allocation23] ss:$8 sps:$4 sm:$0xff]  }
 0x8f9   :  { %2701 = vmatpush1.bf16.msra.mxu0 %v5717_v23  ;;  %v2608_v23 = vld [vmem:[%s7411_s23] ss:$2 sm:$0x3] }
 0x8fa   :  { %2702 = vmatprep.subr.bf16.mxu0 %v5722_v25  ;;  %v2613_v24 = vrot.slane %v2608_v23, %v6825_v33  ;;  %v2617_v25 = vrot.slane %v2608_v23, %v6844_v49  ;;  %v5792_v23 = vld [vmem:[#allocation20 + $0x1ac] ss:$16 sps:$4 sm:$0xff]  }
 0x8fd   :  { %2703 = vmatpush1.bf16.msra.mxu0 %v5720_v61 }
 0x8fe   :  { %2704 = vmatprep.subr.bf16.mxu0 %v5725_v29 }
 0x921   :  { %v2148_v16 = vpop.f32.mrb[32].mxu1 }
 0x922   :  { %v2396_v17 = vpack.c.bf16 %v2148_v16, %v2148_v16  ;;  %v5404_v26 = vpop.f32.mrb[33].mxu1 }
 0x923   :  { %v2151_v27 = vpop.f32.mrb[34].mxu1 }
 0x924   :  { %v5405_v28 = vpop.f32.mrb[35].mxu1  ;;  %2404 = vrot.lane.b32.xlu0 %v2396_v17, %s6331_s21 }
 0x929   :  { %v2244_v30 = vpop.f32.mrb[36].mxu1  ;;  %v2292_v31 = vpop.f32.mrb[52].mxu0 }
 0x92a   :  { %v2398_v32 = vpack.c.bf16 %v2244_v30, %v2244_v30  ;;  %v2399_v5 = vpack.c.bf16 %v2292_v31, %v2292_v31  ;;  %v5416_v34 = vpop.f32.mrb[37].mxu1  ;;  %v5422_v36 = vpop.f32.mrb[53].mxu0  ;;  %v5723_v30 = vld [vmem:[#allocation23 + $0x20] ss:$8 sps:$4 sm:$0xff]   ;;  %v5728_v31 = vld [vmem:[#allocation23 + $0x34] ss:$8 sps:$4 sm:$0xff]  }
 0x92b   :  { %v2247_v39 = vpop.f32.mrb[38].mxu1  ;;  %v2295_v8 = vpop.f32.mrb[54].mxu0  ;;  %2705 = vmatpush1.bf16.msra.mxu0 %v5723_v30  ;;  %v5729_v34 = vld [vmem:[#allocation23 + $0x40] ss:$8 sps:$4 sm:$0xff]   ;;  %v5734_v36 = vld [vmem:[#allocation23 + $0x54] ss:$8 sps:$4 sm:$0xff]  }
 0x92c   :  { %2410 = vrot.lane.b32.xlu0 %v2398_v32, %s6305_s6  ;;  %v5417_v11 = vpop.f32.mrb[39].mxu1  ;;  %2412 = vrot.lane.b32.xlu1 %v2399_v5, %s6305_s6  ;;  %v5423_v35 = vpop.f32.mrb[55].mxu0  ;;  %v5726_v32 = vld [vmem:[#allocation23 + $0x30] ss:$8 sps:$4 sm:$0xff]   ;;  %v5731_v5 = vld [vmem:[#allocation23 + $0x44] ss:$8 sps:$4 sm:$0xff]  }
 0x92d   :  { %2706 = vmatprep.subr.bf16.mxu0 %v5728_v31  ;;  %v5732_v39 = vld [vmem:[#allocation23 + $0x50] ss:$8 sps:$4 sm:$0xff]   ;;  %v5737_v8 = vld [vmem:[#allocation23 + $0x64] ss:$8 sps:$4 sm:$0xff]   ;;  %v5735_v11 = vld [vmem:[#allocation23 + $0x60] ss:$8 sps:$4 sm:$0xff]  }
 0x92e   :  { %v5740_v35 = vld [vmem:[#allocation23 + $0x74] ss:$8 sps:$4 sm:$0xff]  }
 0x92f   :  { %2707 = vmatpush1.bf16.msra.mxu0 %v5726_v32 }
 0x930   :  { %2708 = vmatprep.subr.bf16.mxu0 %v5731_v5 }
 0x931   :  { %v2340_v41 = vpop.f32.mrb[40].mxu1  ;;  %v2388_v42 = vpop.f32.mrb[56].mxu0 }
 0x932   :  { %v2400_v43 = vpack.c.bf16 %v2340_v41, %v2340_v41  ;;  %v2401_v44 = vpack.c.bf16 %v2388_v42, %v2388_v42  ;;  %v5428_v45 = vpop.f32.mrb[41].mxu1  ;;  %v5434_v48 = vpop.f32.mrb[57].mxu0  ;;  %v5738_v41 = vld [vmem:[#allocation23 + $0x70] ss:$8 sps:$4 sm:$0xff]   ;;  %v5741_v42 = vld [vmem:[#allocation25 + $0x40] sm:$0xff]  }
 0x933   :  { %v2343_v38 = vpop.f32.mrb[42].mxu1  ;;  %v2391_v50 = vpop.f32.mrb[58].mxu0  ;;  %2709 = vmatpush1.bf16.msra.mxu0 %v5729_v34  ;;  %5125 = vmatprep.subr.bf16.mxu1 %v5741_v42  ;;  %v5744_v45 = vld [vmem:[#allocation25 + $0x8] sm:$0xff]   ;;  %v5745_v48 = vld [vmem:[#allocation25 + $0x50] sm:$0xff]  }
 0x934   :  { %2418 = vrot.lane.b32.xlu1 %v2401_v44, %s6330_s0  ;;  %v5435_v52 = vpop.f32.mrb[59].mxu0  ;;  %2416 = vrot.lane.b32.xlu0 %v2400_v43, %s6330_s0  ;;  %v5429_v53 = vpop.f32.mrb[43].mxu1  ;;  %v5742_v43 = vld [vmem:[#allocation25] sm:$0xff]   ;;  %v5743_v44 = vld [vmem:[#allocation25 + $0x48] sm:$0xff]   ;;  %v5746_v38 = vld [vmem:[#allocation25 + $0x10] sm:$0xff]  }
 0x935   :  { %2710 = vmatprep.subr.bf16.mxu0 %v5734_v36  ;;  %v5747_v50 = vld [vmem:[#allocation25 + $0x58] sm:$0xff]   ;;  %v5749_v53 = vld [vmem:[#allocation25 + $0x60] sm:$0xff]  }
 0x936   :  { %v5748_v52 = vld [vmem:[#allocation25 + $0x18] sm:$0xff]  }
 0x937   :  { %2711 = vmatpush1.bf16.msra.mxu0 %v5732_v39  ;;  %v4889_v36 = vld [vmem:[%s7413_s25] ss:$0 sm:$0xff] }
 0x938   :  { %2712 = vmatprep.subr.bf16.mxu0 %v5737_v8 }
 0x93b   :  { %2713 = vmatpush1.bf16.msra.mxu0 %v5735_v11 }
 0x93c   :  { %2714 = vmatprep.subr.bf16.mxu0 %v5740_v35 }
 0x93f   :  { %2715 = vmatpush1.bf16.msra.mxu0 %v5738_v41 }
 0x969   :  { %v2407_v54 = vpop.permute.xlu1 %2406 }
 0x96a   :  { %v2425_v63 = vsel %vm1529_vm10, %v2395_v40, %v2407_v54  ;;  %v5750_v54 = vld [vmem:[#allocation25 + $0x20] sm:$0xff]  }
 0x996   :  { %v2405_v57 = vpop.permute.xlu0 %2404 }
 0x997   :  { %v2422_v1 = vsel %vm1529_vm10, %v2394_v62, %v2405_v57  ;;  %v5751_v57 = vld [vmem:[#allocation25 + $0x68] sm:$0xff]  }
 0x99e   :  { %v2413_v59 = vpop.permute.xlu1 %2412  ;;  %v2411_v60 = vpop.permute.xlu0 %2410 }
 0x99f   :  { %v2430_v3 = vsel %vm2426_vm13, %v2425_v63, %v2413_v59  ;;  %v2428_v6 = vsel %vm2426_vm13, %v2422_v1, %v2411_v60 }
 0x9a6   :  { %v2419_v7 = vpop.permute.xlu1 %2418  ;;  %v2417_v9 = vpop.permute.xlu0 %2416 }
 0x9a7   :  { %v2435_v55 = vsel %vm2431_vm14, %v2430_v3, %v2419_v7  ;;  %v2433_v56 = vsel %vm2431_vm14, %v2428_v6, %v2417_v9  ;;  %v4871_v7 = vld [vmem:[%s7406_s18] ss:$0 sm:$0xff] }
 0x9a8   :  { %v4862_v4 = vcombine.low %v2433_v56, %v2435_v55 }
 0x9aa   :  { %5453 = vmatmul.mubr.bf16.vlgmr.msra.gmra.mrb[44].mxu1 %v4862_v4  ;;  %v4872_v4 = vld [vmem:[%s7407_s19] ss:$0 sm:$0xff] }
 0x9ab   :  { %5126 = vmatpush3.bf16.msra.mxu1 %v5742_v43 }
 0x9ac   :  { %5127 = vmatprep.subr.bf16.mxu1 %v5743_v44 }
 0x9af   :  { %5128 = vmatpush3.bf16.msra.mxu1 %v5744_v45 }
 0x9b0   :  { %5129 = vmatprep.subr.bf16.mxu1 %v5745_v48  ;;  %v5757_v48 = vld [vmem:[#allocation20 + $0x100] ss:$16 sps:$4 sm:$0xff]  }
 0x9b3   :  { %5130 = vmatpush3.bf16.msra.mxu1 %v5746_v38  ;;  %v5759_v38 = vld [vmem:[#allocation20 + $0x104] ss:$16 sps:$4 sm:$0xff]  }
 0x9b4   :  { %5131 = vmatprep.subr.bf16.mxu1 %v5747_v50  ;;  %v5760_v50 = vld [vmem:[#allocation20 + $0x108] ss:$16 sps:$4 sm:$0xff]   ;;  %3178 = vmatprep.subr.bf16.mxu0 %v5759_v38 }
 0x9b7   :  { %5132 = vmatpush3.bf16.msra.mxu1 %v5748_v52  ;;  %v5762_v52 = vld [vmem:[#allocation20 + $0x10c] ss:$16 sps:$4 sm:$0xff]  }
 0x9b8   :  { %5133 = vmatprep.subr.bf16.mxu1 %v5749_v53  ;;  %v5765_v53 = vld [vmem:[#allocation20 + $0x124] ss:$16 sps:$4 sm:$0xff]  }
 0x9bb   :  { %5134 = vmatpush3.bf16.msra.mxu1 %v5750_v54  ;;  %v5768_v54 = vld [vmem:[#allocation20 + $0x12c] ss:$16 sps:$4 sm:$0xff]  }
 0x9bc   :  { %5135 = vmatprep.subr.bf16.mxu1 %v5751_v57  ;;  %v5763_v57 = vld [vmem:[#allocation20 + $0x120] ss:$16 sps:$4 sm:$0xff]  }
 0xa7d   :  { %v2545_v10 = vpop.f32.mrb[44].mxu1 }
 0xa7e   :  { %v2546_v13 = vadd.f32 %v4861_v12, %v2545_v10  ;;  %v5454_v15 = vpop.f32.mrb[45].mxu1 }
 0xa7f   :  { %v2548_v18 = vpop.f32.mrb[46].mxu1 }
 0xa80   :  { %v2549_v19 = vadd.f32 %v4861_v12, %v2548_v18  ;;  %v5455_v20 = vpop.f32.mrb[47].mxu1  ;;  %v2552_v21 = vadd.f32 %v2546_v13, %v6830_v46  ;;  %v5752_v18 = vld [vmem:[#allocation25 + $0x28] sm:$0xff]  }
 0xa81   :  { %5136 = vmatpush3.bf16.msra.mxu1 %v5752_v18  ;;  %v5754_v20 = vld [vmem:[#allocation25 + $0x30] sm:$0xff]  }
 0xa82   :  { %2556 = vadd.xlane.f32.xlu0 %v2552_v21  ;;  %v2553_v22 = vadd.f32 %v2549_v19, %v6832_v47  ;;  %v5753_v19 = vld [vmem:[#allocation25 + $0x70] sm:$0xff]  }
 0xa83   :  { %5137 = vmatprep.subr.bf16.mxu1 %v5753_v19  ;;  %v5783_v18 = vld [vmem:[#allocation20 + $0x184] ss:$16 sps:$4 sm:$0xff]   ;;  %v5786_v19 = vld [vmem:[#allocation20 + $0x18c] ss:$16 sps:$4 sm:$0xff]  }
 0xa84   :  { %2558 = vadd.xlane.f32.xlu1 %v2553_v22 }
 0xa85   :  { %5138 = vmatpush3.bf16.msra.mxu1 %v5754_v20  ;;  %v5781_v20 = vld [vmem:[#allocation20 + $0x180] ss:$16 sps:$4 sm:$0xff]  }
 0xb0f   :  { %v2557_v14 = vpop.xlane.xlu0 %2556 }
 0xb10   :  { %v2561_v16 = vmul.f32 0.0078125, %v2557_v14 }
 0xb11   :  { %v2559_v17 = vpop.xlane.xlu1 %2558 }
 0xb12   :  { %v2563_v26 = vsub.f32 %v2552_v21, %v2561_v16  ;;  %v2562_v27 = vmul.f32 0.0078125, %v2559_v17  ;;  %v5755_v21 = vld [vmem:[#allocation25 + $0x78] sm:$0xff]  }
 0xb13   :  { %5139 = vmatprep.subr.bf16.mxu1 %v5755_v21  ;;  %v5784_v21 = vld [vmem:[#allocation20 + $0x188] ss:$16 sps:$4 sm:$0xff]  }
 0xb14   :  { %v7072_v28 = vsub.f32 %v2553_v22, %v2562_v27  ;;  %v2565_v46 = vmul.f32 %v2563_v26, %v2563_v26  ;;  %v5756_v22 = vld [vmem:[#allocation25 + $0x38] sm:$0xff]  }
 0xb15   :  { %5140 = vmatpush3.bf16.msra.mxu1 %v5756_v22  ;;  %v5789_v22 = vld [vmem:[#allocation20 + $0x1a4] ss:$16 sps:$4 sm:$0xff]  }
 0xb16   :  { %2567 = vadd.xlane.f32.xlu0 %v2565_v46  ;;  %v2566_v47 = vmul.f32 %v7072_v28, %v7072_v28  ;;  %3221 = vmatprep.subr.bf16.mxu1 %v5762_v52 }
 0xb1a   :  { %2569 = vadd.xlane.f32.xlu0 %v2566_v47 }
 0xba3   :  { %v2568_v59 = vpop.xlane.xlu0 %2567 }
 0xba4   :  { %v2571_v60 = vmul.f32 0.0078125, %v2568_v59  ;;  %v5766_v59 = vld [vmem:[#allocation20 + $0x128] ss:$16 sps:$4 sm:$0xff]  }
 0xba6   :  { %v2573_v62 = vadd.f32 1e-05, %v2571_v60 }
 0xba7   :  { %v2570_v40 = vpop.xlane.xlu0 %2569 }
 0xba8   :  { %5885 = vrsqrt.f32 %v2573_v62  ;;  %v2572_v63 = vmul.f32 0.0078125, %v2570_v40 }
 0xbaa   :  { %v2574_v1 = vadd.f32 1e-05, %v2572_v63 }
 0xbac   :  { %5887 = vrsqrt.f32 %v2574_v1 }
 0xbb2   :  { %v5886_v3 = vpop.eup %5885 }
 0xbb3   :  { %v2577_v6 = vmul.f32 %v5886_v3, %v2563_v26 }
 0xbb5   :  { %v2583_v56 = vmul.f32 %v4871_v7, %v2577_v6 }
 0xbb6   :  { %v5888_v9 = vpop.eup %5887 }
 0xbb7   :  { %v2578_v55 = vmul.f32 %v5888_v9, %v7072_v28  ;;  %v2589_v10 = vadd.f32 %v4872_v4, %v2583_v56  ;;  %v5771_v9 = vld [vmem:[#allocation20 + $0x144] ss:$16 sps:$4 sm:$0xff]   ;;  %v5769_v56 = vld [vmem:[#allocation20 + $0x140] ss:$16 sps:$4 sm:$0xff]  }
 0xbb9   :  { %v2584_v12 = vmul.f32 %v4871_v7, %v2578_v55  ;;  %v5774_v55 = vld [vmem:[#allocation20 + $0x14c] ss:$16 sps:$4 sm:$0xff]  }
 0xbbb   :  { %v2590_v13 = vadd.f32 %v4872_v4, %v2584_v12  ;;  %v5772_v4 = vld [vmem:[#allocation20 + $0x148] ss:$16 sps:$4 sm:$0xff]   ;;  %v5777_v12 = vld [vmem:[#allocation20 + $0x164] ss:$16 sps:$4 sm:$0xff]  }
 0xbbd   :  { %v2591_v15 = vpack.c.bf16 %v2590_v13, %v2589_v10 }
 0xbbf   :  { %2733 = vmatmul.mubr.bf16.vlgmr.msra.gmra.mrb[60].mxu0 %v2591_v15  ;;  %v5778_v15 = vld [vmem:[#allocation20 + $0x168] ss:$16 sps:$4 sm:$0xff]  }
 0xbc0   :  { %3210 = vmatprep.mubr.bf16.mxu0 %v6324_v0  ;;  %3179 = vmatpush1.bf16.msra.mxu0 %v5757_v48  ;;  %v4908_v48 = vld [vmem:[%s7403_s15 + $0x1] ss:$2 sm:$0xf] }
 0xbc1   :  { %3180 = vmatprep.subr.bf16.mxu0 %v5765_v53  ;;  %v3001_v38 = vrot.slane %v4908_v48, %v6825_v33 }
 0xbc4   :  { %3181 = vmatpush1.bf16.msra.mxu0 %v5763_v57  ;;  %v3009_v57 = vrot.slane %v4908_v48, %v1247_v51 }
 0xbc5   :  { %3182 = vmatprep.subr.bf16.mxu0 %v5771_v9 }
 0xbc8   :  { %3183 = vmatpush1.bf16.msra.mxu0 %v5769_v56 }
 0xbc9   :  { %3184 = vmatprep.subr.bf16.mxu0 %v5777_v12 }
 0xc92   :  { %v2734_v61 = vpop.f32.mrb[60].mxu0 }
 0xc93   :  { %v2735_v14 = vadd.f32 %v2734_v61, %v2613_v24  ;;  %v2736_v16 = vpop.f32.mrb[61].mxu0  ;;  %v5795_v61 = vld [vmem:[#allocation20 + $0x1c4] ss:$16 sps:$4 sm:$0xff]  }
 0xc94   :  { %v2737_v17 = vadd.f32 %v2736_v16, %v2617_v25  ;;  %v2738_v26 = vpop.f32.mrb[62].mxu0  ;;  %v5793_v16 = vld [vmem:[#allocation20 + $0x1c0] ss:$16 sps:$4 sm:$0xff]  }
 0xc95   :  { %v2739_v27 = vadd.f32 %v2738_v26, %v2613_v24  ;;  %v2740_v28 = vpop.f32.mrb[63].mxu0  ;;  %v2743_v47 = vmax.f32 %v2735_v14, 0.0  ;;  %v5787_v24 = vld [vmem:[#allocation20 + $0x1a0] ss:$16 sps:$4 sm:$0xff]   ;;  %v5798_v14 = vld [vmem:[#allocation20 + $0x1cc] ss:$16 sps:$4 sm:$0xff]  }
 0xc96   :  { %v2741_v46 = vadd.f32 %v2740_v28, %v2617_v25  ;;  %v2744_v30 = vmax.f32 %v2737_v17, 0.0  ;;  %v5790_v25 = vld [vmem:[#allocation20 + $0x1a8] ss:$16 sps:$4 sm:$0xff]   ;;  %v5801_v26 = vld [vmem:[#allocation20 + $0x1e4] ss:$16 sps:$4 sm:$0xff]  }
 0xc97   :  { %v2745_v29 = vmax.f32 %v2739_v27, 0.0  ;;  %v5796_v17 = vld [vmem:[#allocation20 + $0x1c8] ss:$16 sps:$4 sm:$0xff]   ;;  %v5804_v27 = vld [vmem:[#allocation20 + $0x1ec] ss:$16 sps:$4 sm:$0xff]  }
 0xc98   :  { %v2746_v31 = vmax.f32 %v2741_v46, 0.0  ;;  %v5799_v28 = vld [vmem:[#allocation20 + $0x1e0] ss:$16 sps:$4 sm:$0xff]   ;;  %v5802_v46 = vld [vmem:[#allocation20 + $0x1e8] ss:$16 sps:$4 sm:$0xff]  }
 0xc99   :  { %v2747_v32 = vpack.c.bf16 %v2745_v29, %v2743_v47 }
 0xc9a   :  { %v2748_v5 = vpack.c.bf16 %v2746_v31, %v2744_v30 }
 0xc9c   :  { %2914 = vmatprep.mubr.bf16.mxu1 %v2748_v5 }
 0xc9d   :  { %2915 = vmatmul.mubr.bf16.vlgmr.msra.gmra.mrb[48].mxu1 %v2747_v32 }
 0xc9e   :  { %3253 = vmatprep.mubr.bf16.mxu1 %v6324_v0  ;;  %3222 = vmatpush1.bf16.msra.mxu1 %v5760_v50  ;;  %v3005_v50 = vrot.slane %v4908_v48, %v6844_v49 }
 0xc9f   :  { %3223 = vmatprep.subr.bf16.mxu1 %v5768_v54 }
 0xca2   :  { %3224 = vmatpush1.bf16.msra.mxu1 %v5766_v59 }
 0xca3   :  { %3225 = vmatprep.subr.bf16.mxu1 %v5774_v55  ;;  %v3013_v55 = vrot.slane %v4908_v48, %v1251_v58 }
 0xca6   :  { %3226 = vmatpush1.bf16.msra.mxu1 %v5772_v4 }
 0xd70   :  { %v5141_v34 = vpop.f32.mrb[48].mxu1 }
 0xd71   :  { %v5142_v39 = vpop.f32.mrb[49].mxu1 }
 0xd72   :  { %v5143_v8 = vadd.f32 %v5142_v39, %v5141_v34  ;;  %v5144_v11 = vpop.f32.mrb[50].mxu1 }
 0xd73   :  { %v5145_v35 = vpop.f32.mrb[51].mxu1 }
 0xd74   :  { %v2917_v41 = vadd.f32 %v5143_v8, %v4889_v36  ;;  %v5146_v42 = vadd.f32 %v5145_v35, %v5144_v11 }
 0xd76   :  { %v2920_v43 = vadd.f32 %v5146_v42, %v4889_v36  ;;  %v2923_v44 = vadd.f32 %v2917_v41, %v2589_v10  ;;  %v5780_v10 = vld [vmem:[#allocation20 + $0x16c] ss:$16 sps:$4 sm:$0xff]   ;;  %v4906_v36 = vld [vmem:[%s7454_s4] ss:$0 sm:$0xff] }
 0xd77   :  { %3227 = vmatprep.subr.bf16.mxu1 %v5780_v10  ;;  %v4907_v41 = vld [vmem:[%s7455_s30] ss:$0 sm:$0xff] }
 0xd78   :  { %2927 = vadd.xlane.f32.xlu1 %v2923_v44  ;;  %v2924_v45 = vadd.f32 %v2920_v43, %v2590_v13  ;;  %v5775_v13 = vld [vmem:[#allocation20 + $0x160] ss:$16 sps:$4 sm:$0xff]   ;;  %3228 = vmatpush1.bf16.msra.mxu1 %v5778_v15 }
 0xd79   :  { %3185 = vmatpush1.bf16.msra.mxu0 %v5775_v13  ;;  %3229 = vmatprep.subr.bf16.mxu1 %v5786_v19 }
 0xd7a   :  { %2929 = vadd.xlane.f32.xlu0 %v2924_v45  ;;  %3186 = vmatprep.subr.bf16.mxu0 %v5783_v18 }
 0xd7c   :  { %3230 = vmatpush1.bf16.msra.mxu1 %v5784_v21 }
 0xd7d   :  { %3187 = vmatpush1.bf16.msra.mxu0 %v5781_v20  ;;  %3231 = vmatprep.subr.bf16.mxu1 %v5792_v23 }
 0xd7e   :  { %3188 = vmatprep.subr.bf16.mxu0 %v5789_v22 }
 0xd80   :  { %3232 = vmatpush1.bf16.msra.mxu1 %v5790_v25 }
 0xd81   :  { %3189 = vmatpush1.bf16.msra.mxu0 %v5787_v24  ;;  %3233 = vmatprep.subr.bf16.mxu1 %v5798_v14 }
 0xd82   :  { %3190 = vmatprep.subr.bf16.mxu0 %v5795_v61 }
 0xd84   :  { %3234 = vmatpush1.bf16.msra.mxu1 %v5796_v17 }
 0xd85   :  { %3191 = vmatpush1.bf16.msra.mxu0 %v5793_v16  ;;  %3235 = vmatprep.subr.bf16.mxu1 %v5804_v27 }
 0xd86   :  { %3192 = vmatprep.subr.bf16.mxu0 %v5801_v26 }
 0xd88   :  { %3236 = vmatpush1.bf16.msra.mxu1 %v5802_v46 }
 0xd89   :  { %3193 = vmatpush1.bf16.msra.mxu0 %v5799_v28  ;;  %5480 = vmatprep.subr.bf16.mxu1 %v6326_v2 }
 0xd8a   :  { %5456 = vmatprep.subr.bf16.mxu0 %v6326_v2 }
 0xe05   :  { %v2928_v60 = vpop.xlane.xlu1 %2927 }
 0xe06   :  { %v2931_v62 = vmul.f32 0.0078125, %v2928_v60 }
 0xe07   :  { %v2930_v40 = vpop.xlane.xlu0 %2929 }
 0xe08   :  { %v7093_v63 = vsub.f32 %v2923_v44, %v2931_v62  ;;  %v2932_v1 = vmul.f32 0.0078125, %v2930_v40 }
 0xe0a   :  { %v7095_v3 = vsub.f32 %v2924_v45, %v2932_v1  ;;  %v2935_v6 = vmul.f32 %v7093_v63, %v7093_v63 }
 0xe0c   :  { %2937 = vadd.xlane.f32.xlu1 %v2935_v6  ;;  %v2936_v7 = vmul.f32 %v7095_v3, %v7095_v3 }
 0xe0e   :  { %2939 = vadd.xlane.f32.xlu0 %v2936_v7 }
 0xe99   :  { %v2938_v47 = vpop.xlane.xlu1 %2937 }
 0xe9a   :  { %v2941_v29 = vmul.f32 0.0078125, %v2938_v47 }
 0xe9b   :  { %v2940_v30 = vpop.xlane.xlu0 %2939 }
 0xe9c   :  { %v2943_v31 = vadd.f32 1e-05, %v2941_v29  ;;  %v2942_v32 = vmul.f32 0.0078125, %v2940_v30 }
 0xe9e   :  { %5889 = vrsqrt.f32 %v2943_v31  ;;  %v2944_v5 = vadd.f32 1e-05, %v2942_v32 }
 0xea0   :  { %5891 = vrsqrt.f32 %v2944_v5 }
 0xea8   :  { %v5890_v34 = vpop.eup %5889 }
 0xea9   :  { %v2947_v39 = vmul.f32 %v5890_v34, %v7093_v63 }
 0xeaa   :  { %v5892_v8 = vpop.eup %5891 }
 0xeab   :  { %v2948_v11 = vmul.f32 %v5892_v8, %v7095_v3  ;;  %v2953_v35 = vmul.f32 %v4906_v36, %v2947_v39 }
 0xead   :  { %v2954_v42 = vmul.f32 %v4906_v36, %v2948_v11  ;;  %v7111_v43 = vadd.f32 %v4907_v41, %v2953_v35 }
 0xeaf   :  { %v7113_v44 = vadd.f32 %v4907_v41, %v2954_v42 }
 0xeb1   :  { %v2961_v45 = vpack.c.bf16 %v7113_v44, %v7111_v43 }
 0xeb3   :  { %3211 = vmatmul.mubr.bf16.vlgmr.msra.gmra.mrb[64].mxu0 %v2961_v45  ;;  %3254 = vmatmul.mubr.bf16.vlgmr.msra.gmra.mrb[52].mxu1 %v2961_v45 }
 0xeb4   :  { %5458 = vmatprep.mubr.msk.bf16.mxu0 %vm6327_vm0, %v6326_v2  ;;  %5482 = vmatprep.mubr.msk.bf16.mxu1 %vm6327_vm0, %v6326_v2 }
 0xf86   :  { %v3212_v52 = vpop.f32.mrb[64].mxu0  ;;  %v3255_v53 = vpop.f32.mrb[52].mxu1 }
 0xf87   :  { %v3213_v54 = vadd.f32 %v3212_v52, %v3001_v38  ;;  %v3214_v59 = vpop.f32.mrb[65].mxu0  ;;  %v3257_v60 = vpop.f32.mrb[53].mxu1  ;;  %v3256_v9 = vadd.f32 %v3255_v53, %v3009_v57 }
 0xf88   :  { %v3216_v62 = vpop.f32.mrb[66].mxu0  ;;  %v3259_v40 = vpop.f32.mrb[54].mxu1  ;;  %v3215_v1 = vadd.f32 %v3214_v59, %v3005_v50  ;;  %v3258_v10 = vadd.f32 %v3257_v60, %v3013_v55 }
 0xf89   :  { %v7128_v63 = vpack.c.bf16 %v3213_v54, %v3213_v54  ;;  %v3217_v3 = vadd.f32 %v3216_v62, %v3001_v38  ;;  %v3218_v6 = vpop.f32.mrb[67].mxu0  ;;  %v3261_v7 = vpop.f32.mrb[55].mxu1  ;;  %v7140_v12 = vpack.c.bf16 %v3256_v9, %v3256_v9  ;;  %v3260_v13 = vadd.f32 %v3259_v40, %v3009_v57 }
 0xf8a   :  { %v7136_v51 = vpack.c.bf16 %v3215_v1, %v3215_v1  ;;  %v3219_v4 = vadd.f32 %v3218_v6, %v3005_v50  ;;  %v7148_v58 = vpack.c.bf16 %v3258_v10, %v3258_v10  ;;  %v3262_v18 = vadd.f32 %v3261_v7, %v3013_v55 }
 0xf8b   :  { %v7132_v56 = vpack.c.bf16 %v3217_v3, %v3217_v3  ;;  %3288 = vrot.lane.b32.xlu1 %v7128_v63, %s6330_s0  ;;  %v7152_v15 = vpack.c.bf16 %v3260_v13, %v3260_v13 }
 0xf8c   :  { %v7144_v37 = vpack.c.bf16 %v3219_v4, %v3219_v4  ;;  %v7158_v19 = vpack.c.bf16 %v3262_v18, %v3262_v18 }
 0xf8d   :  { %3336 = vrot.lane.b32.xlu0 %v7132_v56, %s6330_s0 }
 0xf8f   :  { %3384 = vrot.lane.b32.xlu1 %v7136_v51, %s6330_s0 }
 0xf91   :  { %3480 = vrot.lane.b32.xlu0 %v7140_v12, %s6330_s0 }
 0xf93   :  { %3432 = vrot.lane.b32.xlu1 %v7144_v37, %s6330_s0 }
 0xf95   :  { %3576 = vrot.lane.b32.xlu0 %v7148_v58, %s6330_s0 }
 0xf97   :  { %3528 = vrot.lane.b32.xlu1 %v7152_v15, %s6330_s0 }
 0xf9b   :  { %3624 = vrot.lane.b32.xlu1 %v7158_v19, %s6330_s0 }
 0xffd   :  { %v3289_v20 = vpop.permute.xlu1 %3288 }
 0xffe   :  { %v3294_v21 = vsel %vm1529_vm10, %v3289_v20, 0 }
 0xfff   :  { %v3337_v22 = vpop.permute.xlu0 %3336  ;;  %5457 = vmatpush3.bf16.xpose.msra.mxu0 %v3294_v21 }
0x1000   :  { %5462 = vmatprep.subr.bf16.mxu0 %v6326_v2  ;;  %v3342_v25 = vsel %vm1529_vm10, %v3337_v22, 0 }
0x1001   :  { %v3385_v14 = vpop.permute.xlu1 %3384 }
0x1002   :  { %v3390_v17 = vsel %vm1529_vm10, %v3385_v14, 0 }
0x1003   :  { %v3481_v23 = vpop.permute.xlu0 %3480 }
0x1004   :  { %v3486_v24 = vsel %vm1529_vm10, %v3481_v23, 0 }
0x1005   :  { %5481 = vmatpush3.bf16.xpose.msra.mxu1 %v3486_v24  ;;  %v3433_v26 = vpop.permute.xlu1 %3432 }
0x1006   :  { %5459 = vmatmul.mubr.msk.bf16.vlgmr.msra.gmra.mrb[68].mxu0 %vm1529_vm10, %v7128_v63  ;;  %5492 = vmatprep.subr.bf16.mxu1 %v6326_v2  ;;  %v3438_v27 = vsel %vm1529_vm10, %v3433_v26, 0 }
0x1007   :  { %5463 = vmatpush3.bf16.xpose.msra.mxu0 %v3342_v25  ;;  %5464 = vmatprep.mubr.msk.bf16.mxu0 %vm6327_vm0, %v6326_v2  ;;  %v3577_v61 = vpop.permute.xlu0 %3576 }
0x1008   :  { %5468 = vmatprep.subr.bf16.mxu0 %v6326_v2  ;;  %v3582_v16 = vsel %vm1529_vm10, %v3577_v61, 0 }
0x1009   :  { %v3529_v28 = vpop.permute.xlu1 %3528 }
0x100a   :  { %v3534_v46 = vsel %vm1529_vm10, %v3529_v28, 0 }
0x100c   :  { %5483 = vmatmul.mubr.msk.bf16.vlgmr.msra.gmra.mrb[56].mxu1 %vm1529_vm10, %v7140_v12 }
0x100d   :  { %5493 = vmatpush3.bf16.xpose.msra.mxu1 %v3582_v16  ;;  %5494 = vmatprep.mubr.msk.bf16.mxu1 %vm6327_vm0, %v6326_v2  ;;  %v3625_v47 = vpop.permute.xlu1 %3624 }
0x100e   :  { %5465 = vmatmul.mubr.msk.bf16.vlgmr.msra.gmra.mrb[72].mxu0 %vm1529_vm10, %v7132_v56  ;;  %5504 = vmatprep.subr.bf16.mxu1 %v6326_v2  ;;  %v3630_v29 = vsel %vm1529_vm10, %v3625_v47, 0 }
0x100f   :  { %5469 = vmatpush3.bf16.xpose.msra.mxu0 %v3390_v17  ;;  %5470 = vmatprep.mubr.msk.bf16.mxu0 %vm6327_vm0, %v6326_v2 }
0x1010   :  { %5474 = vmatprep.subr.bf16.mxu0 %v6326_v2 }
0x1014   :  { %5495 = vmatmul.mubr.msk.bf16.vlgmr.msra.gmra.mrb[60].mxu1 %vm1529_vm10, %v7148_v58 }
0x1015   :  { %5506 = vmatprep.mubr.msk.bf16.mxu1 %vm6327_vm0, %v6326_v2 }
0x1016   :  { %5471 = vmatmul.mubr.msk.bf16.vlgmr.msra.gmra.mrb[76].mxu0 %vm1529_vm10, %v7136_v51 }
0x1017   :  { %5475 = vmatpush3.bf16.xpose.msra.mxu0 %v3438_v27  ;;  %5476 = vmatprep.mubr.msk.bf16.mxu0 %vm6327_vm0, %v6326_v2 }
0x1018   :  { %5486 = vmatprep.subr.bf16.mxu0 %v6326_v2 }
0x101e   :  { %5477 = vmatmul.mubr.msk.bf16.vlgmr.msra.gmra.mrb[80].mxu0 %vm1529_vm10, %v7144_v37 }
0x101f   :  { %5487 = vmatpush3.bf16.xpose.msra.mxu0 %v3534_v46  ;;  %5488 = vmatprep.mubr.msk.bf16.mxu0 %vm6327_vm0, %v6326_v2 }
0x1020   :  { %5498 = vmatprep.subr.bf16.mxu0 %v6326_v2 }
0x1026   :  { %5489 = vmatmul.mubr.msk.bf16.vlgmr.msra.gmra.mrb[84].mxu0 %vm1529_vm10, %v7152_v15 }
0x1027   :  { %5499 = vmatpush3.bf16.xpose.msra.mxu0 %v3630_v29  ;;  %5500 = vmatprep.mubr.msk.bf16.mxu0 %vm6327_vm0, %v6326_v2 }
0x1028   :  { %5510 = vmatprep.subr.bf16.mxu0 %v6326_v2 }
0x102e   :  { %5501 = vmatmul.mubr.msk.bf16.vlgmr.msra.gmra.mrb[88].mxu0 %vm1529_vm10, %v7158_v19 }
0x102f   :  { %5512 = vmatprep.mubr.msk.bf16.mxu0 %vm6327_vm0, %v6326_v2 }
0x10d9   :  { %v3330_v30 = vpop.f32.mrb[68].mxu0 }
0x10da   :  { %v5460_v31 = vpop.f32.mrb[69].mxu0  ;;  %v3672_v32 = vsel %vm1912_vm11, %v3330_v30, -inf }
0x10db   :  { %3673 = vmax.xlane.f32.xlu0 %v3672_v32  ;;  %v3333_v5 = vpop.f32.mrb[70].mxu0 }
0x10dc   :  { %v5461_v34 = vpop.f32.mrb[71].mxu0 }
0x10df   :  { %v3522_v36 = vpop.f32.mrb[56].mxu1 }
0x10e0   :  { %v5484_v39 = vpop.f32.mrb[57].mxu1  ;;  %v3684_v8 = vsel %vm1912_vm11, %v3522_v36, -inf }
0x10e1   :  { %v3525_v11 = vpop.f32.mrb[58].mxu1  ;;  %3685 = vmax.xlane.f32.xlu1 %v3684_v8  ;;  %v3378_v35 = vpop.f32.mrb[72].mxu0 }
0x10e2   :  { %v5466_v41 = vpop.f32.mrb[73].mxu0  ;;  %v5485_v42 = vpop.f32.mrb[59].mxu1  ;;  %v3675_v38 = vsel %vm1912_vm11, %v3378_v35, -inf }
0x10e3   :  { %v3381_v45 = vpop.f32.mrb[74].mxu0 }
0x10e4   :  { %v5467_v48 = vpop.f32.mrb[75].mxu0 }
0x10e5   :  { %3676 = vmax.xlane.f32.xlu1 %v3675_v38 }
0x10e7   :  { %v7213_v50 = vpop.f32.mrb[60].mxu1 }
0x10e8   :  { %v5496_v52 = vpop.f32.mrb[61].mxu1 }
0x10e9   :  { %v7215_v53 = vpop.f32.mrb[76].mxu0  ;;  %v3621_v54 = vpop.f32.mrb[62].mxu1 }
0x10ea   :  { %v5472_v57 = vpop.f32.mrb[77].mxu0  ;;  %v5497_v59 = vpop.f32.mrb[63].mxu1  ;;  %v3678_v60 = vsel %vm1912_vm11, %v7215_v53, -inf }
0x10eb   :  { %3679 = vmax.xlane.f32.xlu0 %v3678_v60  ;;  %v3429_v62 = vpop.f32.mrb[78].mxu0 }
0x10ec   :  { %v5473_v40 = vpop.f32.mrb[79].mxu0 }
0x10f1   :  { %v3474_v1 = vpop.f32.mrb[80].mxu0 }
0x10f2   :  { %v5478_v3 = vpop.f32.mrb[81].mxu0  ;;  %v3681_v6 = vsel %vm1912_vm11, %v3474_v1, -inf }
0x10f3   :  { %3682 = vmax.xlane.f32.xlu0 %v3681_v6  ;;  %v3477_v7 = vpop.f32.mrb[82].mxu0 }
0x10f4   :  { %v5479_v9 = vpop.f32.mrb[83].mxu0 }
0x10f6   :  { %3768 = vrot.lane.b32.xlu1 %v7128_v63, %s6305_s6  ;;  %v3690_v63 = vsel %vm1912_vm11, %v7213_v50, -inf }
0x10f9   :  { %v7222_v55 = vpop.f32.mrb[84].mxu0 }
0x10fa   :  { %v5490_v4 = vpop.f32.mrb[85].mxu0  ;;  %v3687_v10 = vsel %vm1912_vm11, %v7222_v55, -inf }
0x10fb   :  { %3688 = vmax.xlane.f32.xlu0 %v3687_v10  ;;  %v3573_v13 = vpop.f32.mrb[86].mxu0 }
0x10fc   :  { %v5491_v18 = vpop.f32.mrb[87].mxu0 }
0x1101   :  { %v7226_v20 = vpop.f32.mrb[88].mxu0 }
0x1102   :  { %v5502_v21 = vpop.f32.mrb[89].mxu0  ;;  %v3693_v22 = vsel %vm1912_vm11, %v7226_v20, -inf }
0x1103   :  { %3694 = vmax.xlane.f32.xlu0 %v3693_v22  ;;  %v3669_v23 = vpop.f32.mrb[90].mxu0 }
0x1104   :  { %v5503_v24 = vpop.f32.mrb[91].mxu0 }
0x1119   :  { %3816 = vrot.lane.b32.xlu0 %v7132_v56, %s6305_s6 }
0x111a   :  { %3691 = vmax.xlane.f32.xlu1 %v3690_v63 }
0x112b   :  { %3864 = vrot.lane.b32.xlu1 %v7136_v51, %s6305_s6 }
0x112f   :  { %3912 = vrot.lane.b32.xlu1 %v7144_v37, %s6305_s6 }
0x1168   :  { %v3674_v25 = vpop.xlane.xlu0 %3673 }
0x1169   :  { %v3696_v61 = vsub.f32 %v3330_v30, %v3674_v25 }
0x116b   :  { %v3704_v14 = vmul.f32 1.442695, %v3696_v61 }
0x116d   :  { %5893 = vpow2.f32 %v3704_v14 }
0x116e   :  { %v3686_v16 = vpop.xlane.xlu1 %3685 }
0x116f   :  { %v3700_v17 = vsub.f32 %v3522_v36, %v3686_v16 }
0x1171   :  { %v3712_v26 = vmul.f32 1.442695, %v3700_v17 }
0x1172   :  { %v3677_v27 = vpop.xlane.xlu1 %3676 }
0x1173   :  { %5895 = vpow2.f32 %v3712_v26  ;;  %v3697_v56 = vsub.f32 %v3378_v35, %v3677_v27 }
0x1175   :  { %v3706_v28 = vmul.f32 1.442695, %v3697_v56 }
0x1176   :  { %v3769_v46 = vpop.permute.xlu1 %3768 }
0x1177   :  { %v7238_v47 = vpop.eup %5893  ;;  %5897 = vpow2.f32 %v3706_v28  ;;  %v3774_v51 = vsel %vm2014_vm12, %v3769_v46, 0 }
0x1178   :  { %5505 = vmatpush3.bf16.msra.mxu1 %v3774_v51  ;;  %v3720_v37 = vsel %vm1912_vm11, %v7238_v47, 0.0  ;;  %v3680_v29 = vpop.xlane.xlu0 %3679 }
0x1179   :  { %3721 = vadd.xlane.f32.xlu1 %v3720_v37  ;;  %5516 = vmatprep.subr.bf16.mxu1 %v6326_v2  ;;  %v3698_v48 = vsub.f32 %v7215_v53, %v3680_v29 }
0x117b   :  { %v3708_v54 = vmul.f32 1.442695, %v3698_v48 }
0x117d   :  { %v7244_v30 = vpop.eup %5895 }
0x117e   :  { %v3732_v31 = vsel %vm1912_vm11, %v7244_v30, 0.0 }
0x117f   :  { %3733 = vadd.xlane.f32.xlu1 %v3732_v31 }
0x1180   :  { %v3683_v32 = vpop.xlane.xlu0 %3682 }
0x1181   :  { %v5898_v5 = vpop.eup %5897  ;;  %v3699_v34 = vsub.f32 %v3474_v1, %v3683_v32 }
0x1182   :  { %v3723_v36 = vsel %vm1912_vm11, %v5898_v5, 0.0 }
0x1183   :  { %v3710_v39 = vmul.f32 1.442695, %v3699_v34  ;;  %3724 = vadd.xlane.f32.xlu0 %v3723_v36 }
0x1185   :  { %5899 = vpow2.f32 %v3710_v39 }
0x1188   :  { %v3689_v8 = vpop.xlane.xlu0 %3688 }
0x1189   :  { %v3701_v59 = vsub.f32 %v7222_v55, %v3689_v8 }
0x118b   :  { %v3714_v60 = vmul.f32 1.442695, %v3701_v59 }
0x118f   :  { %v5900_v11 = vpop.eup %5899 }
0x1190   :  { %v3695_v35 = vpop.xlane.xlu0 %3694  ;;  %v3729_v41 = vsel %vm1912_vm11, %v5900_v11, 0.0 }
0x1191   :  { %3730 = vadd.xlane.f32.xlu0 %v3729_v41  ;;  %v3703_v62 = vsub.f32 %v7226_v20, %v3695_v35 }
0x1194   :  { %v3817_v42 = vpop.permute.xlu0 %3816 }
0x1195   :  { %v3822_v45 = vsel %vm2014_vm12, %v3817_v42, 0 }
0x1196   :  { %5511 = vmatpush3.bf16.msra.mxu0 %v3822_v45 }
0x1197   :  { %5522 = vmatprep.subr.bf16.mxu0 %v6326_v2 }
0x11a7   :  { %3960 = vrot.lane.b32.xlu0 %v7140_v12, %s6305_s6  ;;  %v3692_v38 = vpop.xlane.xlu1 %3691  ;;  %v3718_v12 = vmul.f32 1.442695, %v3703_v62 }
0x11a8   :  { %v3702_v52 = vsub.f32 %v7213_v50, %v3692_v38 }
0x11aa   :  { %v3716_v57 = vmul.f32 1.442695, %v3702_v52 }
0x11ab   :  { %v3865_v55 = vpop.permute.xlu1 %3864 }
0x11ac   :  { %5901 = vpow2.f32 %v3716_v57  ;;  %v3870_v22 = vsel %vm2014_vm12, %v3865_v55, 0 }
0x11ad   :  { %5903 = vpow2.f32 %v3708_v54 }
0x11ae   :  { %5905 = vpow2.f32 %v3714_v60 }
0x11af   :  { %5907 = vpow2.f32 %v3718_v12  ;;  %v3913_v4 = vpop.permute.xlu1 %3912  ;;  %v5805_v12 = vld [vmem:[#allocation22 + $0x40] sm:$0xff]  }
0x11b0   :  { %v3918_v24 = vsel %vm2014_vm12, %v3913_v4, 0  ;;  %v5808_v4 = vld [vmem:[#allocation22 + $0x58] sm:$0xff]  }
0x11b6   :  { %v7258_v40 = vpop.eup %5901 }
0x11b7   :  { %v3738_v53 = vsel %vm1912_vm11, %v7258_v40, 0.0  ;;  %v5904_v1 = vpop.eup %5903 }
0x11b8   :  { %3739 = vadd.xlane.f32.xlu1 %v3738_v53  ;;  %v3726_v50 = vsel %vm1912_vm11, %v5904_v1, 0.0  ;;  %v7263_v3 = vpop.eup %5905 }
0x11b9   :  { %v3735_v6 = vsel %vm1912_vm11, %v7263_v3, 0.0  ;;  %v7267_v7 = vpop.eup %5907 }
0x11ba   :  { %v3741_v9 = vsel %vm1912_vm11, %v7267_v7, 0.0 }
0x11bc   :  { %3727 = vadd.xlane.f32.xlu1 %v3726_v50  ;;  %v5806_v50 = vld [vmem:[#allocation22 + $0x48] sm:$0xff]  }
0x11c6   :  { %3736 = vadd.xlane.f32.xlu0 %v3735_v6 }
0x11ca   :  { %3742 = vadd.xlane.f32.xlu0 %v3741_v9 }
0x11cd   :  { %4008 = vrot.lane.b32.xlu1 %v7152_v15, %s6305_s6 }
0x11d1   :  { %4104 = vrot.lane.b32.xlu1 %v7158_v19, %s6305_s6 }
0x11e0   :  { %4056 = vrot.lane.b32.xlu0 %v7148_v58, %s6305_s6 }
0x1206   :  { %v3722_v10 = vpop.xlane.xlu1 %3721 }
0x1207   :  { %5909 = vrcp.f32 %v3722_v10  ;;  %v5809_v10 = vld [vmem:[#allocation22 + $0x60] sm:$0xff]  }
0x120c   :  { %v3734_v14 = vpop.xlane.xlu1 %3733 }
0x1210   :  { %v3725_v13 = vpop.xlane.xlu0 %3724 }
0x1211   :  { %v5910_v18 = vpop.eup %5909  ;;  %5911 = vrcp.f32 %v3725_v13  ;;  %v5810_v13 = vld [vmem:[#allocation22 + $0x68] sm:$0xff]  }
0x1212   :  { %v3752_v20 = vmul.f32 %v5910_v18, %v7238_v47 }
0x1214   :  { %v3760_v21 = vpack.c.bf16 %v3752_v20, %v3752_v20 }
0x1216   :  { %5507 = vmatmul.mubr.msk.bf16.vlgmr.msra.gmra.mrb[64].mxu1 %vm1912_vm11, %v3760_v21 }
0x1217   :  { %5517 = vmatpush3.bf16.msra.mxu1 %v3870_v22  ;;  %5518 = vmatprep.mubr.msk.bf16.mxu1 %vm6327_vm0, %v6326_v2  ;;  %v5811_v22 = vld [vmem:[#allocation22 + $0x70] sm:$0xff]  }
0x1218   :  { %5528 = vmatprep.subr.bf16.mxu1 %v6326_v2 }
0x121b   :  { %v5912_v58 = vpop.eup %5911 }
0x121c   :  { %v3753_v15 = vmul.f32 %v5912_v58, %v5898_v5 }
0x121e   :  { %v3731_v19 = vpop.xlane.xlu0 %3730  ;;  %v3761_v23 = vpack.c.bf16 %v3753_v15, %v3753_v15 }
0x121f   :  { %5913 = vrcp.f32 %v3731_v19  ;;  %v5812_v19 = vld [vmem:[#allocation22 + $0x78] sm:$0xff]  }
0x1220   :  { %5513 = vmatmul.mubr.msk.bf16.vlgmr.msra.gmra.mrb[92].mxu0 %vm1912_vm11, %v3761_v23 }
0x1221   :  { %5523 = vmatpush3.bf16.msra.mxu0 %v3918_v24  ;;  %5524 = vmatprep.mubr.msk.bf16.mxu0 %vm6327_vm0, %v6326_v2 }
0x1222   :  { %5534 = vmatprep.subr.bf16.mxu0 %v6326_v2  ;;  %v3961_v56 = vpop.permute.xlu0 %3960 }
0x1223   :  { %v3966_v31 = vsel %vm2014_vm12, %v3961_v56, 0 }
0x1229   :  { %v5914_v63 = vpop.eup %5913 }
0x122a   :  { %v3755_v25 = vmul.f32 %v5914_v63, %v5900_v11 }
0x122c   :  { %v3763_v61 = vpack.c.bf16 %v3755_v25, %v3755_v25 }
0x122e   :  { %5525 = vmatmul.mubr.msk.bf16.vlgmr.msra.gmra.mrb[96].mxu0 %vm1912_vm11, %v3763_v61 }
0x122f   :  { %5536 = vmatprep.mubr.msk.bf16.mxu0 %vm6327_vm0, %v6326_v2 }
0x1245   :  { %v3740_v16 = vpop.xlane.xlu1 %3739 }
0x1249   :  { %v3728_v17 = vpop.xlane.xlu1 %3727 }
0x124a   :  { %5915 = vrcp.f32 %v3728_v17 }
0x124b   :  { %5917 = vrcp.f32 %v3734_v14 }
0x124d   :  { %v4009_v26 = vpop.permute.xlu1 %4008 }
0x124e   :  { %v4014_v27 = vsel %vm2014_vm12, %v4009_v26, 0 }
0x124f   :  { %5535 = vmatpush3.bf16.msra.mxu0 %v4014_v27 }
0x1250   :  { %5546 = vmatprep.subr.bf16.mxu0 %v6326_v2 }
0x1251   :  { %v4105_v11 = vpop.permute.xlu1 %4104 }
0x1252   :  { %v4110_v45 = vsel %vm2014_vm12, %v4105_v11, 0 }
0x1253   :  { %v3737_v28 = vpop.xlane.xlu0 %3736 }
0x1254   :  { %v5916_v46 = vpop.eup %5915  ;;  %5919 = vrcp.f32 %v3737_v28 }
0x1255   :  { %v3754_v47 = vmul.f32 %v5916_v46, %v5904_v1  ;;  %5921 = vrcp.f32 %v3740_v16  ;;  %v5918_v29 = vpop.eup %5917 }
0x1256   :  { %v3756_v32 = vmul.f32 %v5918_v29, %v7244_v30 }
0x1257   :  { %v3743_v51 = vpop.xlane.xlu0 %3742  ;;  %v3762_v37 = vpack.c.bf16 %v3754_v47, %v3754_v47 }
0x1258   :  { %5923 = vrcp.f32 %v3743_v51  ;;  %v3764_v39 = vpack.c.bf16 %v3756_v32, %v3756_v32 }
0x1259   :  { %5519 = vmatmul.mubr.msk.bf16.vlgmr.msra.gmra.mrb[68].mxu1 %vm1912_vm11, %v3762_v37 }
0x125a   :  { %5529 = vmatpush3.bf16.msra.mxu1 %v3966_v31  ;;  %5530 = vmatprep.mubr.msk.bf16.mxu1 %vm6327_vm0, %v6326_v2 }
0x125b   :  { %5540 = vmatprep.subr.bf16.mxu1 %v6326_v2  ;;  %v4057_v34 = vpop.permute.xlu0 %4056 }
0x125c   :  { %v4062_v35 = vsel %vm2014_vm12, %v4057_v34, 0 }
0x125e   :  { %v5920_v5 = vpop.eup %5919 }
0x125f   :  { %v3757_v36 = vmul.f32 %v5920_v5, %v7263_v3  ;;  %v5922_v8 = vpop.eup %5921  ;;  %v5807_v3 = vld [vmem:[#allocation22 + $0x50] sm:$0xff]  }
0x1260   :  { %v3758_v30 = vmul.f32 %v5922_v8, %v7258_v40 }
0x1261   :  { %5531 = vmatmul.mubr.msk.bf16.vlgmr.msra.gmra.mrb[72].mxu1 %vm1912_vm11, %v3764_v39  ;;  %v3765_v41 = vpack.c.bf16 %v3757_v36, %v3757_v36 }
0x1262   :  { %v5924_v42 = vpop.eup %5923  ;;  %5541 = vmatpush3.bf16.msra.mxu1 %v4062_v35  ;;  %5542 = vmatprep.mubr.msk.bf16.mxu1 %vm6327_vm0, %v6326_v2  ;;  %v3766_v38 = vpack.c.bf16 %v3758_v30, %v3758_v30 }
0x1263   :  { %5537 = vmatmul.mubr.msk.bf16.vlgmr.msra.gmra.mrb[100].mxu0 %vm1912_vm11, %v3765_v41  ;;  %5552 = vmatprep.subr.bf16.mxu1 %v6326_v2  ;;  %v3759_v48 = vmul.f32 %v5924_v42, %v7267_v7 }
0x1264   :  { %5547 = vmatpush3.bf16.msra.mxu0 %v4110_v45  ;;  %5548 = vmatprep.mubr.msk.bf16.mxu0 %vm6327_vm0, %v6326_v2 }
0x1265   :  { %v3767_v52 = vpack.c.bf16 %v3759_v48, %v3759_v48 }
0x1269   :  { %5543 = vmatmul.mubr.msk.bf16.vlgmr.msra.gmra.mrb[76].mxu1 %vm1912_vm11, %v3766_v38 }
0x126a   :  { %5568 = vmatprep.mubr.msk.bf16.mxu1 %vm6327_vm0, %v6326_v2  ;;  %5553 = vmatpush3.bf16.msra.mxu1 %v5805_v12 }
0x126b   :  { %5549 = vmatmul.mubr.msk.bf16.vlgmr.msra.gmra.mrb[104].mxu0 %vm1912_vm11, %v3767_v52  ;;  %5554 = vmatprep.subr.bf16.mxu1 %v6326_v2 }
0x126c   :  { %4490 = vmatprep.mubr.bf16.mxu0 %v6324_v0 }
0x126e   :  { %5555 = vmatpush3.bf16.msra.mxu1 %v5806_v50 }
0x126f   :  { %5556 = vmatprep.subr.bf16.mxu1 %v6326_v2 }
0x1272   :  { %5557 = vmatpush3.bf16.msra.mxu1 %v5807_v3  ;;  %v5813_v3 = vld [vmem:[#allocation23 + $0x80] ss:$8 sps:$4 sm:$0xff]  }
0x1273   :  { %5558 = vmatprep.subr.bf16.mxu1 %v6326_v2 }
0x1276   :  { %5559 = vmatpush3.bf16.msra.mxu1 %v5808_v4 }
0x1277   :  { %5560 = vmatprep.subr.bf16.mxu1 %v6326_v2 }
0x127a   :  { %5561 = vmatpush3.bf16.msra.mxu1 %v5809_v10 }
0x127b   :  { %5562 = vmatprep.subr.bf16.mxu1 %v6326_v2 }
0x127e   :  { %5563 = vmatpush3.bf16.msra.mxu1 %v5810_v13 }
0x127f   :  { %5564 = vmatprep.subr.bf16.mxu1 %v6326_v2 }
0x1282   :  { %5565 = vmatpush3.bf16.msra.mxu1 %v5811_v22  ;;  %v5824_v22 = vld [vmem:[#allocation23 + $0xb4] ss:$8 sps:$4 sm:$0xff]  }
0x1283   :  { %5566 = vmatprep.subr.bf16.mxu1 %v6326_v2 }
0x1286   :  { %5567 = vmatpush3.bf16.msra.mxu1 %v5812_v19  ;;  %v5825_v19 = vld [vmem:[#allocation23 + $0xc0] ss:$8 sps:$4 sm:$0xff]  }
0x12e9   :  { %v7316_v54 = vpop.f32.mrb[64].mxu1 }
0x12ea   :  { %v5508_v57 = vpop.f32.mrb[65].mxu1  ;;  %v4152_v8 = vpack.c.bf16 %v7316_v54, %v7316_v54  ;;  %v4965_v54 = vld [vmem:[%s7405_s17 + $0x1] ss:$0 sm:$0xff] }
0x12eb   :  { %v3813_v59 = vpop.f32.mrb[66].mxu1 }
0x12ec   :  { %v5509_v60 = vpop.f32.mrb[67].mxu1 }
0x12f3   :  { %v7318_v62 = vpop.f32.mrb[92].mxu0 }
0x12f4   :  { %v5514_v40 = vpop.f32.mrb[93].mxu0  ;;  %v4153_v11 = vpack.c.bf16 %v7318_v62, %v7318_v62 }
0x12f5   :  { %v3861_v53 = vpop.f32.mrb[94].mxu0 }
0x12f6   :  { %v5515_v1 = vpop.f32.mrb[95].mxu0 }
0x1301   :  { %v3954_v0 = vpop.f32.mrb[96].mxu0 }
0x1302   :  { %v4155_v6 = vpack.c.bf16 %v3954_v0, %v3954_v0  ;;  %v5526_v7 = vpop.f32.mrb[97].mxu0  ;;  %v5815_v0 = vld [vmem:[#allocation23 + $0x84] ss:$8 sps:$4 sm:$0xff]  }
0x1303   :  { %v3957_v9 = vpop.f32.mrb[98].mxu0  ;;  %4458 = vmatprep.subr.bf16.mxu0 %v5815_v0  ;;  %v5816_v7 = vld [vmem:[#allocation23 + $0x90] ss:$8 sps:$4 sm:$0xff]  }
0x1304   :  { %4164 = vrot.lane.b32.xlu1 %v4155_v6, %s6331_s21  ;;  %v5527_v55 = vpop.f32.mrb[99].mxu0  ;;  %v5818_v6 = vld [vmem:[#allocation23 + $0x94] ss:$8 sps:$4 sm:$0xff]   ;;  %4459 = vmatpush1.bf16.msra.mxu0 %v5813_v3 }
0x1305   :  { %4460 = vmatprep.subr.bf16.mxu0 %v5818_v6 }
0x1308   :  { %4461 = vmatpush1.bf16.msra.mxu0 %v5816_v7 }
0x132c   :  { %v3906_v18 = vpop.f32.mrb[68].mxu1 }
0x132d   :  { %v4154_v20 = vpack.c.bf16 %v3906_v18, %v3906_v18  ;;  %v5520_v21 = vpop.f32.mrb[69].mxu1 }
0x132e   :  { %v3909_v58 = vpop.f32.mrb[70].mxu1  ;;  %v5819_v21 = vld [vmem:[#allocation23 + $0xa0] ss:$8 sps:$4 sm:$0xff]  }
0x132f   :  { %4162 = vrot.lane.b32.xlu0 %v4154_v20, %s6331_s21  ;;  %v5521_v15 = vpop.f32.mrb[71].mxu1  ;;  %v5821_v20 = vld [vmem:[#allocation23 + $0xa4] ss:$8 sps:$4 sm:$0xff]   ;;  %v5822_v58 = vld [vmem:[#allocation23 + $0xb0] ss:$8 sps:$4 sm:$0xff]  }
0x1330   :  { %4462 = vmatprep.subr.bf16.mxu0 %v5821_v20  ;;  %v5827_v15 = vld [vmem:[#allocation23 + $0xc4] ss:$8 sps:$4 sm:$0xff]  }
0x1331   :  { %4463 = vmatpush1.bf16.msra.mxu0 %v5819_v21 }
0x1332   :  { %4464 = vmatprep.subr.bf16.mxu0 %v5824_v22 }
0x1334   :  { %v4002_v23 = vpop.f32.mrb[72].mxu1 }
0x1335   :  { %v4156_v24 = vpack.c.bf16 %v4002_v23, %v4002_v23  ;;  %v5532_v63 = vpop.f32.mrb[73].mxu1  ;;  %4465 = vmatpush1.bf16.msra.mxu0 %v5822_v58  ;;  %v5830_v23 = vld [vmem:[#allocation23 + $0xd4] ss:$8 sps:$4 sm:$0xff]  }
0x1336   :  { %v4005_v25 = vpop.f32.mrb[74].mxu1  ;;  %v4050_v61 = vpop.f32.mrb[100].mxu0  ;;  %4466 = vmatprep.subr.bf16.mxu0 %v5827_v15  ;;  %v5833_v63 = vld [vmem:[#allocation23 + $0xe4] ss:$8 sps:$4 sm:$0xff]  }
0x1337   :  { %v4157_v14 = vpack.c.bf16 %v4050_v61, %v4050_v61  ;;  %4168 = vrot.lane.b32.xlu0 %v4156_v24, %s6305_s6  ;;  %v5533_v16 = vpop.f32.mrb[75].mxu1  ;;  %v5538_v17 = vpop.f32.mrb[101].mxu0  ;;  %v5828_v24 = vld [vmem:[#allocation23 + $0xd0] ss:$8 sps:$4 sm:$0xff]   ;;  %v5831_v25 = vld [vmem:[#allocation23 + $0xe0] ss:$8 sps:$4 sm:$0xff]  }
0x1338   :  { %v4053_v26 = vpop.f32.mrb[102].mxu0  ;;  %v5836_v61 = vld [vmem:[#allocation23 + $0xf4] ss:$8 sps:$4 sm:$0xff]   ;;  %v5837_v16 = vld [vmem:[#allocation25 + $0xc0] sm:$0xff]  }
0x1339   :  { %4170 = vrot.lane.b32.xlu1 %v4157_v14, %s6305_s6  ;;  %v5539_v27 = vpop.f32.mrb[103].mxu0  ;;  %4467 = vmatpush1.bf16.msra.mxu0 %v5825_v19  ;;  %v5834_v14 = vld [vmem:[#allocation23 + $0xf0] ss:$8 sps:$4 sm:$0xff]   ;;  %v5838_v17 = vld [vmem:[#allocation25 + $0x80] sm:$0xff]   ;;  %v5839_v26 = vld [vmem:[#allocation25 + $0xc8] sm:$0xff]  }
0x133a   :  { %4468 = vmatprep.subr.bf16.mxu0 %v5830_v23  ;;  %5188 = vmatprep.subr.bf16.mxu1 %v5837_v16  ;;  %v5840_v27 = vld [vmem:[#allocation25 + $0x88] sm:$0xff]  }
0x133c   :  { %v4098_v56 = vpop.f32.mrb[76].mxu1 }
0x133d   :  { %v4158_v28 = vpack.c.bf16 %v4098_v56, %v4098_v56  ;;  %v5544_v46 = vpop.f32.mrb[77].mxu1  ;;  %4469 = vmatpush1.bf16.msra.mxu0 %v5828_v24  ;;  %v5841_v56 = vld [vmem:[#allocation25 + $0xd0] sm:$0xff]  }
0x133e   :  { %v4101_v2 = vpop.f32.mrb[78].mxu1  ;;  %v4146_v47 = vpop.f32.mrb[104].mxu0  ;;  %4470 = vmatprep.subr.bf16.mxu0 %v5833_v63  ;;  %v5843_v46 = vld [vmem:[#allocation25 + $0xd8] sm:$0xff]  }
0x133f   :  { %v4159_v51 = vpack.c.bf16 %v4146_v47, %v4146_v47  ;;  %4174 = vrot.lane.b32.xlu0 %v4158_v28, %s6330_s0  ;;  %v5545_v37 = vpop.f32.mrb[79].mxu1  ;;  %v5550_v29 = vpop.f32.mrb[105].mxu0  ;;  %v5842_v28 = vld [vmem:[#allocation25 + $0x90] sm:$0xff]   ;;  %v5844_v2 = vld [vmem:[#allocation25 + $0x98] sm:$0xff]   ;;  %v5845_v47 = vld [vmem:[#allocation25 + $0xe0] sm:$0xff]  }
0x1340   :  { %v4149_v31 = vpop.f32.mrb[106].mxu0  ;;  %v5847_v37 = vld [vmem:[#allocation25 + $0xe8] sm:$0xff]  }
0x1341   :  { %4176 = vrot.lane.b32.xlu1 %v4159_v51, %s6330_s0  ;;  %v5551_v32 = vpop.f32.mrb[107].mxu0  ;;  %4471 = vmatpush1.bf16.msra.mxu0 %v5831_v25  ;;  %v5846_v51 = vld [vmem:[#allocation25 + $0xa0] sm:$0xff]  }
0x1342   :  { %4472 = vmatprep.subr.bf16.mxu0 %v5836_v61 }
0x1345   :  { %4473 = vmatpush1.bf16.msra.mxu0 %v5834_v14 }
0x1376   :  { %v4165_v34 = vpop.permute.xlu1 %4164 }
0x1377   :  { %v4183_v41 = vsel %vm1529_vm10, %v4153_v11, %v4165_v34  ;;  %v4975_v11 = vld [vmem:[%s7406_s18 + $0x1] ss:$0 sm:$0xff] }
0x13a1   :  { %v4163_v5 = vpop.permute.xlu0 %4162 }
0x13a2   :  { %v4180_v42 = vsel %vm1529_vm10, %v4152_v8, %v4163_v5 }
0x13a9   :  { %v4169_v36 = vpop.permute.xlu0 %4168 }
0x13aa   :  { %v4185_v30 = vsel %vm2426_vm13, %v4180_v42, %v4169_v36 }
0x13ab   :  { %v4171_v39 = vpop.permute.xlu1 %4170 }
0x13ac   :  { %v4187_v45 = vsel %vm2426_vm13, %v4183_v41, %v4171_v39 }
0x13b1   :  { %v4175_v35 = vpop.permute.xlu0 %4174 }
0x13b2   :  { %v4189_v38 = vsel %vm2431_vm14, %v4185_v30, %v4175_v35  ;;  %v4976_v30 = vld [vmem:[%s7407_s19 + $0x1] ss:$0 sm:$0xff] }
0x13b3   :  { %v4177_v48 = vpop.permute.xlu1 %4176 }
0x13b4   :  { %v4191_v52 = vsel %vm2431_vm14, %v4187_v45, %v4177_v48 }
0x13b5   :  { %v4966_v57 = vcombine.low %v4189_v38, %v4191_v52 }
0x13b7   :  { %5569 = vmatmul.mubr.bf16.vlgmr.msra.gmra.mrb[80].mxu1 %v4966_v57  ;;  %v5848_v57 = vld [vmem:[#allocation25 + $0xa8] sm:$0xff]  }
0x13b8   :  { %5189 = vmatpush3.bf16.msra.mxu1 %v5838_v17 }
0x13b9   :  { %5190 = vmatprep.subr.bf16.mxu1 %v5839_v26 }
0x13bc   :  { %5191 = vmatpush3.bf16.msra.mxu1 %v5840_v27 }
0x13bd   :  { %5192 = vmatprep.subr.bf16.mxu1 %v5841_v56 }
0x13c0   :  { %5193 = vmatpush3.bf16.msra.mxu1 %v5842_v28 }
0x13c1   :  { %5194 = vmatprep.subr.bf16.mxu1 %v5843_v46 }
0x13c4   :  { %5195 = vmatpush3.bf16.msra.mxu1 %v5844_v2 }
0x13c5   :  { %5196 = vmatprep.subr.bf16.mxu1 %v5845_v47 }
0x13c8   :  { %5197 = vmatpush3.bf16.msra.mxu1 %v5846_v51 }
0x13c9   :  { %5198 = vmatprep.subr.bf16.mxu1 %v5847_v37 }
0x13cc   :  { %5199 = vmatpush3.bf16.msra.mxu1 %v5848_v57 }
0x148a   :  { %v4302_v59 = vpop.f32.mrb[80].mxu1 }
0x148b   :  { %v4303_v60 = vadd.f32 %v4965_v54, %v4302_v59  ;;  %v5570_v62 = vpop.f32.mrb[81].mxu1  ;;  %v5850_v59 = vld [vmem:[#allocation25 + $0xb0] sm:$0xff]  }
0x148c   :  { %v4305_v40 = vpop.f32.mrb[82].mxu1  ;;  %v5852_v62 = vld [vmem:[#allocation25 + $0xb8] sm:$0xff]  }
0x148d   :  { %v4306_v53 = vadd.f32 %v4965_v54, %v4305_v40  ;;  %v5571_v1 = vpop.f32.mrb[83].mxu1  ;;  %v4309_v12 = vadd.f32 %v4303_v60, %v7111_v43  ;;  %v5849_v54 = vld [vmem:[#allocation25 + $0xf0] sm:$0xff]   ;;  %v5851_v60 = vld [vmem:[#allocation25 + $0xf8] sm:$0xff]  }
0x148e   :  { %5200 = vmatprep.subr.bf16.mxu1 %v5849_v54  ;;  %v4977_v40 = vld [vmem:[%s7411_s23 + $0x1] ss:$2 sm:$0x3] }
0x148f   :  { %4313 = vadd.xlane.f32.xlu0 %v4309_v12  ;;  %v4310_v50 = vadd.f32 %v4306_v53, %v7113_v44  ;;  %5201 = vmatpush3.bf16.msra.mxu1 %v5850_v59  ;;  %v4371_v53 = vrot.slane %v4977_v40, %v6825_v33  ;;  %v4375_v1 = vrot.slane %v4977_v40, %v6844_v49  ;;  %v4994_v33 = vld [vmem:[%s7413_s25 + $0x1] ss:$0 sm:$0xff] }
0x1490   :  { %5202 = vmatprep.subr.bf16.mxu1 %v5851_v60 }
0x1491   :  { %4315 = vadd.xlane.f32.xlu1 %v4310_v50 }
0x1493   :  { %5203 = vmatpush3.bf16.msra.mxu1 %v5852_v62 }
0x151c   :  { %v4314_v9 = vpop.xlane.xlu0 %4313 }
0x151d   :  { %v4317_v55 = vmul.f32 0.0078125, %v4314_v9 }
0x151e   :  { %v4316_v4 = vpop.xlane.xlu1 %4315 }
0x151f   :  { %v4319_v10 = vsub.f32 %v4309_v12, %v4317_v55  ;;  %v4318_v13 = vmul.f32 0.0078125, %v4316_v4 }
0x1521   :  { %v7348_v18 = vsub.f32 %v4310_v50, %v4318_v13  ;;  %v4321_v43 = vmul.f32 %v4319_v10, %v4319_v10 }
0x1523   :  { %4323 = vadd.xlane.f32.xlu0 %v4321_v43  ;;  %v4322_v44 = vmul.f32 %v7348_v18, %v7348_v18 }
0x1527   :  { %4325 = vadd.xlane.f32.xlu0 %v4322_v44 }
0x15b0   :  { %v4324_v29 = vpop.xlane.xlu0 %4323 }
0x15b1   :  { %v4327_v31 = vmul.f32 0.0078125, %v4324_v29 }
0x15b3   :  { %v4329_v32 = vadd.f32 1e-05, %v4327_v31  ;;  %v5011_v31 = vld [vmem:[%s7454_s4 + $0x1] ss:$0 sm:$0xff] }
0x15b4   :  { %v4326_v5 = vpop.xlane.xlu0 %4325 }
0x15b5   :  { %5925 = vrsqrt.f32 %v4329_v32  ;;  %v4328_v34 = vmul.f32 0.0078125, %v4326_v5 }
0x15b7   :  { %v4330_v36 = vadd.f32 1e-05, %v4328_v34  ;;  %v5012_v34 = vld [vmem:[%s7455_s30 + $0x1] ss:$0 sm:$0xff] }
0x15b9   :  { %5927 = vrsqrt.f32 %v4330_v36 }
0x15bf   :  { %v5926_v39 = vpop.eup %5925 }
0x15c0   :  { %v4333_v8 = vmul.f32 %v5926_v39, %v4319_v10 }
0x15c2   :  { %v4339_v42 = vmul.f32 %v4975_v11, %v4333_v8 }
0x15c3   :  { %v5928_v35 = vpop.eup %5927 }
0x15c4   :  { %v4334_v41 = vmul.f32 %v5928_v35, %v7348_v18  ;;  %v4345_v48 = vadd.f32 %v4976_v30, %v4339_v42 }
0x15c6   :  { %v4340_v45 = vmul.f32 %v4975_v11, %v4334_v41 }
0x15c8   :  { %v4346_v38 = vadd.f32 %v4976_v30, %v4340_v45 }
0x15ca   :  { %v4347_v52 = vpack.c.bf16 %v4346_v38, %v4345_v48 }
0x15cc   :  { %4491 = vmatmul.mubr.bf16.vlgmr.msra.gmra.mrb[108].mxu0 %v4347_v52 }
0x169f   :  { %v4492_v12 = vpop.f32.mrb[108].mxu0 }
0x16a0   :  { %v4493_v50 = vadd.f32 %v4492_v12, %v4371_v53  ;;  %v4494_v3 = vpop.f32.mrb[109].mxu0 }
0x16a1   :  { %v4495_v0 = vadd.f32 %v4494_v3, %v4375_v1  ;;  %v4496_v6 = vpop.f32.mrb[110].mxu0 }
0x16a2   :  { %v4497_v7 = vadd.f32 %v4496_v6, %v4371_v53  ;;  %v4498_v9 = vpop.f32.mrb[111].mxu0  ;;  %v4501_v4 = vmax.f32 %v4493_v50, 0.0 }
0x16a3   :  { %v4499_v55 = vadd.f32 %v4498_v9, %v4375_v1  ;;  %v4502_v13 = vmax.f32 %v4495_v0, 0.0 }
0x16a4   :  { %v4503_v10 = vmax.f32 %v4497_v7, 0.0 }
0x16a5   :  { %v4504_v18 = vmax.f32 %v4499_v55, 0.0 }
0x16a6   :  { %v4505_v43 = vpack.c.bf16 %v4503_v10, %v4501_v4 }
0x16a7   :  { %v4506_v44 = vpack.c.bf16 %v4504_v18, %v4502_v13 }
0x16a9   :  { %4673 = vmatprep.mubr.bf16.mxu1 %v4506_v44 }
0x16aa   :  { %4674 = vmatmul.mubr.bf16.vlgmr.msra.gmra.mrb[84].mxu1 %v4505_v43 }
0x177d   :  { %v5204_v20 = vpop.f32.mrb[84].mxu1 }
0x177e   :  { %v5205_v49 = vpop.f32.mrb[85].mxu1 }
0x177f   :  { %v5206_v21 = vadd.f32 %v5205_v49, %v5204_v20  ;;  %v5207_v22 = vpop.f32.mrb[86].mxu1 }
0x1780   :  { %v5208_v58 = vpop.f32.mrb[87].mxu1 }
0x1781   :  { %v4676_v15 = vadd.f32 %v5206_v21, %v4994_v33  ;;  %v5209_v19 = vadd.f32 %v5208_v58, %v5207_v22 }
0x1783   :  { %v4679_v23 = vadd.f32 %v5209_v19, %v4994_v33  ;;  %v4682_v24 = vadd.f32 %v4676_v15, %v4345_v48 }
0x1785   :  { %4686 = vadd.xlane.f32.xlu1 %v4682_v24  ;;  %v4683_v63 = vadd.f32 %v4679_v23, %v4346_v38 }
0x1787   :  { %4688 = vadd.xlane.f32.xlu0 %v4683_v63 }
0x1812   :  { %v4687_v25 = vpop.xlane.xlu1 %4686 }
0x1813   :  { %v4690_v61 = vmul.f32 0.0078125, %v4687_v25 }
0x1814   :  { %v4689_v14 = vpop.xlane.xlu0 %4688 }
0x1815   :  { %v4692_v16 = vsub.f32 %v4682_v24, %v4690_v61  ;;  %v4691_v17 = vmul.f32 0.0078125, %v4689_v14 }
0x1817   :  { %v4693_v26 = vsub.f32 %v4683_v63, %v4691_v17  ;;  %v4694_v27 = vmul.f32 %v4692_v16, %v4692_v16 }
0x1819   :  { %4696 = vadd.xlane.f32.xlu1 %v4694_v27  ;;  %v4695_v56 = vmul.f32 %v4693_v26, %v4693_v26 }
0x181b   :  { %4698 = vadd.xlane.f32.xlu0 %v4695_v56 }
0x18a6   :  { %v4697_v28 = vpop.xlane.xlu1 %4696 }
0x18a7   :  { %v4700_v46 = vmul.f32 0.0078125, %v4697_v28 }
0x18a8   :  { %v4699_v2 = vpop.xlane.xlu0 %4698 }
0x18a9   :  { %v4702_v47 = vadd.f32 1e-05, %v4700_v46  ;;  %v4701_v51 = vmul.f32 0.0078125, %v4699_v2 }
0x18ab   :  { %5929 = vrsqrt.f32 %v4702_v47  ;;  %v4703_v37 = vadd.f32 1e-05, %v4701_v51 }
0x18ad   :  { %5931 = vrsqrt.f32 %v4703_v37 }
0x18b5   :  { %v5930_v29 = vpop.eup %5929 }
0x18b6   :  { %v4706_v32 = vmul.f32 %v5930_v29, %v4692_v16 }
0x18b7   :  { %v5932_v5 = vpop.eup %5931 }
0x18b8   :  { %v4707_v36 = vmul.f32 %v5932_v5, %v4693_v26  ;;  %v4712_v39 = vmul.f32 %v5011_v31, %v4706_v32 }
0x18ba   :  { %v4713_v8 = vmul.f32 %v5011_v31, %v4707_v36  ;;  %v4718_v11 = vadd.f32 %v5012_v34, %v4712_v39 }
0x18bc   :  { %v4719_v35 = vadd.f32 %v5012_v34, %v4713_v8  ;;  %4720 = vst [vmem:[#allocation26] sm:$0xff] %v4718_v11 }
0x18be   :  { %4721 = vst [vmem:[#allocation26 + $0x8] sm:$0xff] %v4719_v35 }
0x18bf   :  { %6274 = shalt.err (!%p6271_p12)
}
0x18c0   :  { %s7456_s22 = sld [smem:[#allocation49_spill]] }
0x18c6   :  { %s6275_s29 = scalar_lea.hbm %s7456_s22, 256 }
0x18c7   :  { %p6276_p13 = scmp.ne.s32.totalorder %s7456_s22, %s6275_s29  ;;  %p6279_p0 = scmp.lt.u32.totalorder %s6275_s29, %s7456_s22 }
0x18c9   :  { %p6281_p1 = pnand %p6279_p0, %p6276_p13 }
0x18cb   :  { %6284 = shalt.err (!%p6281_p1)
}
0x18cc   :  { %4733 = dma.vmem_to_hbm [thread:$0]  %s4728_s20, 256, %s7456_s22, [#allocation4], %s6314_s14, %s6314_s14, %s6315_s3  }
0x18cd   :  { %6301 = dma.done.wait [#allocation4], 256  }
0x18ce   :  { %6302 = vsyncadd [#allocation4], 4294967040 }
0x18cf   :  { %4737 = vsyncpa [#allocation3], 1 }
0x18d0   :  { %4738 = vsyncpa [#allocation6], 1 }
0x18d1   :  { %4739 = vsyncpa [#allocation9], 1 }
0x18d2   :  { %4740 = vsyncpa [#allocation12], 1 }
0x18d3   :  { %4741 = vsyncpa [#allocation15], 1 }
0x18d4   :  { %4742 = vsyncpa [#allocation18], 1 }
0x18d5   :  { %4743 = vsyncpa [#allocation21], 1 }
0x18d6   :  { %4744 = vsyncpa [#allocation24], 1 }
0x18d7   :  { %4745 = vsyncpa [#allocation4], 1 }

</bundles_post_ra>
